<compile_context>
chip_gen: v6e
topology: v6e:2x2x1
jax: 0.10.0
libtpu: 0.0.40
codegen_flags: <defaults>
</compile_context>

<pallas_src>
import math

import jax
import jax.numpy as jnp
import numpy as np
from jax.experimental import pallas as pl
from jax.experimental.pallas import tpu as pltpu

# ----------------------------- configuration -------------------------------
SIGNAL = 32     # signal_dim
HIDDEN = 32     # hidden_dim
LATENT = 8      # latent_dim
PARAM = 4       # param_dim (>1 -> sigmoid head + BCE branch active)

LEAK = 0.2
SMALL = 1e-8
NF_LOG = math.log(2.0 * math.pi + SMALL)
KL_WEIGHT = 10.0
RAMP = False

# ------------------------- packed lane layout (xin) -------------------------
LANES = 128
X0 = 0                 # x     at lanes [0, PARAM)
EPS0 = LATENT          # eps   at lanes [LATENT, 2*LATENT)  (== q_logvar lanes)
Y0 = 2 * LATENT        # y     at lanes [Y0, Y0+SIGNAL)
ONE = LANES - 1        # constant-1 lane (bias rows of the weights hit this)

assert X0 + PARAM <= EPS0
assert EPS0 == LATENT                      # reparameterization fold needs this
assert EPS0 + LATENT <= Y0
assert Y0 + SIGNAL <= ONE
assert 3 * HIDDEN <= ONE
assert 2 * LATENT < LANES and 2 * PARAM < LANES

# weight slot indices in the single (NW, 128, 128) bf16 stack
(W_Y1, W_Y2, W_Y3, W_R1HEAD, W_Q1X, W_Q1H, W_Q2, W_Q3, W_QHEAD,
 W_ZA, W_ZB, W_RF1H, W_R2, W_R3, W_R2HEAD) = range(15)
NW = 15


def compute_ramp(idx, ramp_start=1, ramp_end=100):
    if not RAMP:
        return 1.0
    idx = max(float(idx), 1.0)
    ramp = (math.log(idx) - math.log(ramp_start)) / (
        math.log(ramp_end) - math.log(ramp_start))
    return max(0.0, min(1.0, ramp))


# ------------------------------- fused kernel -------------------------------
def cvae_kernel(xin_ref, w_ref, xhat_ref, part_ref):
    """One batch chunk: full CVAE forward + per-chunk loss partial sums."""
    f32, bf16 = jnp.float32, jnp.bfloat16
    xin = xin_ref[...]                                   # (TB, 128) f32

    def mm(a, k):
        # bf16 matmul operands, f32 accumulation on the MXU
        return jnp.dot(a.astype(bf16), w_ref[k], preferred_element_type=f32)

    def leaky(h):
        return jnp.where(h >= 0, h, LEAK * h)

    # ---- fused y-branch stacks [r1 | q | r2], biases folded via lane ONE ----
    h = leaky(mm(xin, W_Y1))
    h = leaky(mm(h, W_Y2))
    h3 = leaky(mm(h, W_Y3))            # lanes 0:32 r1-h, 32:64 q-hy, 64:96 r2-hy

    # ---- Encoder r1 head: lanes 0:L = mean, L:2L = log_var ----
    r1h = mm(h3, W_R1HEAD)
    # NOTE: PyTorch forward also draws r1_z_samp here but never uses it.

    # ---- Q network ----
    h = leaky(mm(xin, W_Q1X) + mm(h3, W_Q1H))       # cat([x, hy]) @ W folded
    h = leaky(mm(h, W_Q2))
    h = leaky(mm(h, W_Q3))
    qh = mm(h, W_QHEAD)                             # lanes 0:L mean, L:2L log_var

    # ---- Decoder r2; reparameterization folded into the first matmul ----
    #   z @ Wz = q_mean @ W_ZA + (exp(.5*q_logvar)*eps) @ W_ZB
    # (eps sits at lanes L:2L of xin, exactly the q_logvar lanes of qh)
    u = jnp.exp(0.5 * qh) * xin
    h = leaky(mm(qh, W_ZA) + mm(u, W_ZB) + mm(h3, W_RF1H))
    h = leaky(mm(h, W_R2))
    h = leaky(mm(h, W_R3))
    r2h = mm(h, W_R2HEAD)                           # lanes 0:P loc, P:2P log_var

    # ---- x_hat = [loc0, sigmoid(loc1:)] written as a lane-dense slab ----
    lane = jax.lax.broadcasted_iota(jnp.int32, r2h.shape, 1)
    xhat = jnp.where(lane == 0, r2h,
                     jnp.where(lane < PARAM, jax.nn.sigmoid(r2h), 0.0))
    xhat_ref[...] = xhat

    # ------------------- per-chunk loss partial sums (f32) -------------------
    # Full-batch "numeric" reconstruction loss (with the PyTorch broadcast
    # quirk) reduces algebraically to sum(nf) + sum(ie) over the whole batch,
    # which decomposes exactly into per-chunk sums.
    lv0 = r2h[:, PARAM:PARAM + 1]                               # (TB,1)
    nf = -0.5 * (lv0 + NF_LOG)
    ie = -0.5 * (xhat[:, 0:1] - xin[:, 0:1]) ** 2 / (jnp.exp(lv0) + SMALL)
    numeric_sum = jnp.sum(nf + ie)

    if PARAM > 1:
        # BCEWithLogitsLoss applied to the already-sigmoided head (bug-for-bug)
        # computed lane-aligned: logits at xhat lanes 1:P, targets at xin 1:P.
        bce_el = (jnp.maximum(xhat, 0.0) - xhat * xin
                  + jnp.log1p(jnp.exp(-jnp.abs(xhat))))
        bce_sum = jnp.sum(jnp.where((lane >= 1) & (lane < PARAM), bce_el, 0.0))
    else:
        bce_sum = jnp.float32(0.0)

    q_mean, q_lv = qh[:, :LATENT], qh[:, LATENT:2 * LATENT]
    r1_mean, r1_lv = r1h[:, :LATENT], r1h[:, LATENT:2 * LATENT]
    term = (jnp.exp(q_lv - r1_lv) + (r1_mean - q_mean) ** 2
            / (jnp.exp(r1_lv) + SMALL) - 1.0 + r1_lv - q_lv)
    kl_sum = 0.5 * jnp.sum(term)

    plane = jax.lax.broadcasted_iota(jnp.int32, (8, LANES), 1)
    part_ref[...] = jnp.where(plane == 0, numeric_sum,
                              jnp.where(plane == 1, bce_sum,
                                        jnp.where(plane == 2, kl_sum, 0.0)))


# ------------------------------ parameter init -------------------------------
def init_params(key):
    keys = iter(jax.random.split(key, 64))

    def lin(din, dout, scale=0.1):
        kw, kb = next(keys), next(keys)
        w = scale * jax.random.normal(kw, (din, dout), jnp.float32)
        b = scale * jax.random.normal(kb, (1, dout), jnp.float32)
        return (w, b)

    return {
        'r1': dict(l1=lin(SIGNAL, HIDDEN), l2=lin(HIDDEN, HIDDEN),
                   l3=lin(HIDDEN, HIDDEN), mean=lin(HIDDEN, LATENT),
                   lv=lin(HIDDEN, LATENT)),
        'q': dict(y1=lin(SIGNAL, HIDDEN), y2=lin(HIDDEN, HIDDEN),
                  y3=lin(HIDDEN, HIDDEN), f1=lin(PARAM + HIDDEN, HIDDEN),
                  f2=lin(HIDDEN, HIDDEN), f3=lin(HIDDEN, HIDDEN),
                  mean=lin(HIDDEN, LATENT), lv=lin(HIDDEN, LATENT)),
        'r2': dict(y1=lin(SIGNAL, HIDDEN), y2=lin(HIDDEN, HIDDEN),
                   y3=lin(HIDDEN, HIDDEN), f1=lin(LATENT + HIDDEN, HIDDEN),
                   f2=lin(HIDDEN, HIDDEN), f3=lin(HIDDEN, HIDDEN),
                   loc=lin(HIDDEN, PARAM), lv=lin(HIDDEN, PARAM)),
    }


def pack_params(p):
    """Pack all weights+biases into one (NW,128,128) bf16 slab.

    Biases live in row ONE of each slot (the activations carry a constant-1
    lane at ONE); the y-branch layers are block-diagonal over [r1 | q | r2].
    """
    H, L, P, S = HIDDEN, LATENT, PARAM, SIGNAL
    r1, q, r2 = p['r1'], p['q'], p['r2']
    slots = np.zeros((NW, LANES, LANES), np.float32)

    def w_(t):
        return np.asarray(t[0], np.float32)

    def b_(t):
        return np.asarray(t[1], np.float32)[0]

    # y-stack layer 1: input is xin (y at lanes Y0:Y0+S, constant at ONE)
    for blk, lay in enumerate((r1['l1'], q['y1'], r2['y1'])):
        slots[W_Y1, Y0:Y0 + S, blk * H:(blk + 1) * H] = w_(lay)
        slots[W_Y1, ONE, blk * H:(blk + 1) * H] = b_(lay)
    slots[W_Y1, ONE, ONE] = 1.0

    # y-stack layers 2,3: block-diagonal over the three branches
    for slot, layers in ((W_Y2, (r1['l2'], q['y2'], r2['y2'])),
                         (W_Y3, (r1['l3'], q['y3'], r2['y3']))):
        for blk, lay in enumerate(layers):
            slots[slot, blk * H:(blk + 1) * H, blk * H:(blk + 1) * H] = w_(lay)
            slots[slot, ONE, blk * H:(blk + 1) * H] = b_(lay)
        slots[slot, ONE, ONE] = 1.0

    def head(slot, pairs, width):
        for j, lay in enumerate(pairs):
            slots[slot, 0:H, j * width:(j + 1) * width] = w_(lay)
            slots[slot, ONE, j * width:(j + 1) * width] = b_(lay)

    head(W_R1HEAD, (r1['mean'], r1['lv']), L)      # [mean | log_var]
    head(W_QHEAD, (q['mean'], q['lv']), L)         # [mean | log_var]
    head(W_R2HEAD, (r2['loc'], r2['lv']), P)       # [loc  | log_var]

    # Q fc stack: cat([x, hy]) @ f1 split into x-part (xin) and hy-part (H3)
    slots[W_Q1X, X0:X0 + P, 0:H] = w_(q['f1'])[:P]
    slots[W_Q1H, H:2 * H, 0:H] = w_(q['f1'])[P:]
    slots[W_Q1H, ONE, 0:H] = b_(q['f1'])
    slots[W_Q1H, ONE, ONE] = 1.0
    for slot, lay in ((W_Q2, q['f2']), (W_Q3, q['f3'])):
        slots[slot, 0:H, 0:H] = w_(lay)
        slots[slot, ONE, 0:H] = b_(lay)
        slots[slot, ONE, ONE] = 1.0

    # decoder fc stack: cat([z, hy]) @ f1 with z = q_mean + exp(.5*lv)*eps
    # folded as qh @ W_ZA + u @ W_ZB (+ hy part from H3).
    slots[W_ZA, 0:L, 0:H] = w_(r2['f1'])[:L]
    slots[W_ZB, L:2 * L, 0:H] = w_(r2['f1'])[:L]
    slots[W_RF1H, 2 * H:3 * H, 0:H] = w_(r2['f1'])[L:]
    slots[W_RF1H, ONE, 0:H] = b_(r2['f1'])
    slots[W_RF1H, ONE, ONE] = 1.0
    for slot, lay in ((W_R2, r2['f2']), (W_R3, r2['f3'])):
        slots[slot, 0:H, 0:H] = w_(lay)
        slots[slot, ONE, 0:H] = b_(lay)
        slots[slot, ONE, ONE] = 1.0

    return jnp.asarray(slots, jnp.bfloat16)


# --------------------------------- wrapper -----------------------------------
@jax.jit
def cvae_forward(x, y, eps_q, w_stack, ramp):
    """ramp: runtime f32 scalar (no per-epoch recompiles when RAMP=True)."""
    f32 = jnp.float32
    B = x.shape[0]
    TB = min(128, B)
    assert B % TB == 0, "batch must be a multiple of the chunk size"
    G = B // TB

    # lane-dense packed activation input: [x | 0 | eps | y | 0 ... | 1]
    xin = jnp.concatenate([
        x.astype(f32),
        jnp.zeros((B, EPS0 - PARAM), f32),
        eps_q.astype(f32),
        y.astype(f32),
        jnp.zeros((B, ONE - (Y0 + SIGNAL)), f32),
        jnp.ones((B, 1), f32),
    ], axis=1)

    xhat_full, parts = pl.pallas_call(
        cvae_kernel,
        grid=(G,),
        in_specs=[
            pl.BlockSpec((TB, LANES), lambda i: (i, 0)),          # activations
            pl.BlockSpec((NW, LANES, LANES), lambda i: (0, 0, 0)),  # weights, resident
        ],
        out_specs=(
            pl.BlockSpec((TB, LANES), lambda i: (i, 0)),
            pl.BlockSpec((8, LANES), lambda i: (i, 0)),
        ),
        out_shape=(
            jax.ShapeDtypeStruct((B, LANES), f32),
            jax.ShapeDtypeStruct((G * 8, LANES), f32),
        ),
        compiler_params=pltpu.CompilerParams(
            dimension_semantics=("parallel",)),
    )(xin, w_stack)

    # tiny cross-chunk reduction + final scalar combination (exact algebra)
    sums = jnp.sum(parts.reshape(G, 8, LANES)[:, 0, :3], axis=0)  # (3,)
    numeric = sums[0]
    if PARAM > 1:
        bce = sums[1] / (B * (PARAM - 1))
    else:
        bce = jnp.float32(0.0)
    recon = numeric + 1.0 * bce
    kl = ramp * KL_WEIGHT * sums[2] / B
    loss = -recon + kl
    return xhat_full[:, :PARAM], loss, recon, kl


# --------------------------- pure-JAX reference -------------------------------
def ref_forward(x, y, eps_q, p, epoch):
    def leaky(h):
        return jnp.where(h >= 0, h, LEAK * h)

    def mlp3(h, l1, l2, l3):
        for (w, b) in (l1, l2, l3):
            h = leaky(h @ w + b)
        return h

    r1 = p['r1']
    h = mlp3(y, r1['l1'], r1['l2'], r1['l3'])
    r1_mean = h @ r1['mean'][0] + r1['mean'][1]
    r1_lv = h @ r1['lv'][0] + r1['lv'][1]

    q = p['q']
    hy = mlp3(y, q['y1'], q['y2'], q['y3'])
    h = mlp3(jnp.concatenate([x, hy], axis=1), q['f1'], q['f2'], q['f3'])
    q_mean = h @ q['mean'][0] + q['mean'][1]
    q_lv = h @ q['lv'][0] + q['lv'][1]
    z = q_mean + jnp.exp(0.5 * q_lv) * eps_q

    r2 = p['r2']
    hy2 = mlp3(y, r2['y1'], r2['y2'], r2['y3'])
    h = mlp3(jnp.concatenate([z, hy2], axis=1), r2['f1'], r2['f2'], r2['f3'])
    loc = h @ r2['loc'][0] + r2['loc'][1]
    xlv = h @ r2['lv'][0] + r2['lv'][1]
    xhat = jnp.concatenate([loc[:, :1], jax.nn.sigmoid(loc[:, 1:])], axis=1)

    lv0 = xlv[:, 0]
    nf = -0.5 * (lv0 + NF_LOG)
    sq = (xhat[:, 0] - x[:, 0]) ** 2
    ie = -0.5 * sq / (jnp.exp(lv0) + SMALL)
    recon_vec = jnp.sum(nf[:, None] + ie[None, :], axis=1)      # PyTorch broadcast
    numeric = jnp.mean(recon_vec)
    logits, targets = xhat[:, 1:], x[:, 1:]
    bce = jnp.mean(jnp.maximum(logits, 0.0) - logits * targets
                   + jnp.log1p(jnp.exp(-jnp.abs(logits))))
    recon = numeric + bce
    term = (jnp.exp(q_lv - r1_lv) + (r1_mean - q_mean) ** 2
            / (jnp.exp(r1_lv) + SMALL) - 1.0 + r1_lv - q_lv)
    kl = compute_ramp(epoch) * KL_WEIGHT * jnp.mean(0.5 * jnp.sum(term, axis=1))
    loss = -recon + kl
    return xhat, loss, recon, kl


# ----------------------------------- main -------------------------------------
if __name__ == "__main__":
    key = jax.random.PRNGKey(0)
    k_x, k_y, k_eps, k_p = jax.random.split(key, 4)

    BATCH = 256          # several mini-batches per call; grid of 128-row chunks
    x = jax.random.normal(k_x, (BATCH, PARAM), jnp.float32)
    # columns 1: behave like probability targets for the BCE branch
    x = x.at[:, 1:].set(jax.nn.sigmoid(x[:, 1:]))
    y = jax.random.normal(k_y, (BATCH, SIGNAL), jnp.float32)
    eps_q = jax.random.normal(k_eps, (BATCH, LATENT), jnp.float32)

    # round the model weights to bf16 once; kernel and reference share them,
    # so the only kernel/ref difference is bf16 rounding of matmul activations.
    params = init_params(k_p)
    params = jax.tree.map(
        lambda a: a.astype(jnp.bfloat16).astype(jnp.float32), params)
    w_stack = pack_params(params)

    epoch = 10
    ramp = jnp.float32(compute_ramp(epoch, 1, 100))

    xhat, loss, recon, kl = cvae_forward(x, y, eps_q, w_stack, ramp)
    jax.block_until_ready((xhat, loss, recon, kl))

    xhat_r, loss_r, recon_r, kl_r = ref_forward(x, y, eps_q, params, epoch)
    # bf16 matmul operands in the kernel introduce ~0.2-1% activation error,
    # amplified a little by the exp()s in the KL -> modest tolerances.
    np.testing.assert_allclose(np.asarray(xhat), np.asarray(xhat_r),
                               rtol=5e-2, atol=5e-2)
    np.testing.assert_allclose(np.asarray(loss), np.asarray(loss_r),
                               rtol=5e-2, atol=5e-2)
    np.testing.assert_allclose(np.asarray(recon), np.asarray(recon_r),
                               rtol=5e-2, atol=5e-2)
    np.testing.assert_allclose(np.asarray(kl), np.asarray(kl_r),
                               rtol=5e-2, atol=5e-2)

    print("KERNEL_OK")
</pallas_src>

<mosaic_0001>
module attributes {stable_mosaic.version = 11 : i64} {
  func.func @cvae_kernel(%arg0: i32, %arg1: memref<128x128xf32, #tpu.memory_space<vmem>>, %arg2: memref<15x128x128xbf16, #tpu.memory_space<vmem>>, %arg3: memref<128x128xf32, #tpu.memory_space<vmem>>, %arg4: memref<8x128xf32, #tpu.memory_space<vmem>>) attributes {dimension_semantics = [#tpu.dimension_semantics<parallel>], iteration_bounds = array<i64: 2>, scalar_prefetch = 0 : i64, scratch_operands = 0 : i64, tpu.core_type = #tpu.core_type<tc>, window_params = [{transform_indices = @transform_0, window_bounds = array<i64: 128, 128>}, {pipeline_mode = #tpu.pipeline_mode<synchronous>, transform_indices = @transform_1, window_bounds = array<i64: 15, 128, 128>}, {transform_indices = @transform_2, window_bounds = array<i64: 128, 128>}, {transform_indices = @transform_3, window_bounds = array<i64: 8, 128>}]} {
    %c0 = arith.constant 0 : index
    %c0_0 = arith.constant 0 : index
    %0 = vector.load %arg1[%c0, %c0_0] : memref<128x128xf32, #tpu.memory_space<vmem>>, vector<128x128xf32>
    %1 = arith.truncf %0 : vector<128x128xf32> to vector<128x128xbf16>
    %c0_1 = arith.constant 0 : index
    %c0_2 = arith.constant 0 : index
    %c0_3 = arith.constant 0 : index
    %2 = vector.load %arg2[%c0_1, %c0_2, %c0_3] : memref<15x128x128xbf16, #tpu.memory_space<vmem>>, vector<1x128x128xbf16>
    %3 = vector.shape_cast %2 : vector<1x128x128xbf16> to vector<128x128xbf16>
    %cst = arith.constant dense<0.000000e+00> : vector<128x128xf32>
    %4 = tpu.matmul %1, %3, %cst {dimension_numbers = #tpu.dot_dimension_numbers<[1], [0], [0], [1], [0, 0, 1, 1], [], []>} : vector<128x128xbf16>, vector<128x128xbf16>, vector<128x128xf32> -> vector<128x128xf32>
    %cst_4 = arith.constant 0.000000e+00 : f32
    %5 = vector.broadcast %cst_4 : f32 to vector<128x128xf32>
    %6 = arith.cmpf oge, %4, %5 : vector<128x128xf32>
    %cst_5 = arith.constant 2.000000e-01 : f32
    %7 = vector.broadcast %cst_5 : f32 to vector<128x128xf32>
    %8 = arith.mulf %7, %4 : vector<128x128xf32>
    %9 = arith.select %6, %4, %8 : vector<128x128xi1>, vector<128x128xf32>
    %10 = arith.truncf %9 : vector<128x128xf32> to vector<128x128xbf16>
    %c1 = arith.constant 1 : index
    %c0_6 = arith.constant 0 : index
    %c0_7 = arith.constant 0 : index
    %11 = vector.load %arg2[%c1, %c0_6, %c0_7] : memref<15x128x128xbf16, #tpu.memory_space<vmem>>, vector<1x128x128xbf16>
    %12 = vector.shape_cast %11 : vector<1x128x128xbf16> to vector<128x128xbf16>
    %cst_8 = arith.constant dense<0.000000e+00> : vector<128x128xf32>
    %13 = tpu.matmul %10, %12, %cst_8 {dimension_numbers = #tpu.dot_dimension_numbers<[1], [0], [0], [1], [0, 0, 1, 1], [], []>} : vector<128x128xbf16>, vector<128x128xbf16>, vector<128x128xf32> -> vector<128x128xf32>
    %cst_9 = arith.constant 0.000000e+00 : f32
    %14 = vector.broadcast %cst_9 : f32 to vector<128x128xf32>
    %15 = arith.cmpf oge, %13, %14 : vector<128x128xf32>
    %cst_10 = arith.constant 2.000000e-01 : f32
    %16 = vector.broadcast %cst_10 : f32 to vector<128x128xf32>
    %17 = arith.mulf %16, %13 : vector<128x128xf32>
    %18 = arith.select %15, %13, %17 : vector<128x128xi1>, vector<128x128xf32>
    %19 = arith.truncf %18 : vector<128x128xf32> to vector<128x128xbf16>
    %c2 = arith.constant 2 : index
    %c0_11 = arith.constant 0 : index
    %c0_12 = arith.constant 0 : index
    %20 = vector.load %arg2[%c2, %c0_11, %c0_12] : memref<15x128x128xbf16, #tpu.memory_space<vmem>>, vector<1x128x128xbf16>
    %21 = vector.shape_cast %20 : vector<1x128x128xbf16> to vector<128x128xbf16>
    %cst_13 = arith.constant dense<0.000000e+00> : vector<128x128xf32>
    %22 = tpu.matmul %19, %21, %cst_13 {dimension_numbers = #tpu.dot_dimension_numbers<[1], [0], [0], [1], [0, 0, 1, 1], [], []>} : vector<128x128xbf16>, vector<128x128xbf16>, vector<128x128xf32> -> vector<128x128xf32>
    %cst_14 = arith.constant 0.000000e+00 : f32
    %23 = vector.broadcast %cst_14 : f32 to vector<128x128xf32>
    %24 = arith.cmpf oge, %22, %23 : vector<128x128xf32>
    %cst_15 = arith.constant 2.000000e-01 : f32
    %25 = vector.broadcast %cst_15 : f32 to vector<128x128xf32>
    %26 = arith.mulf %25, %22 : vector<128x128xf32>
    %27 = arith.select %24, %22, %26 : vector<128x128xi1>, vector<128x128xf32>
    %28 = arith.truncf %27 : vector<128x128xf32> to vector<128x128xbf16>
    %c3 = arith.constant 3 : index
    %c0_16 = arith.constant 0 : index
    %c0_17 = arith.constant 0 : index
    %29 = vector.load %arg2[%c3, %c0_16, %c0_17] : memref<15x128x128xbf16, #tpu.memory_space<vmem>>, vector<1x128x128xbf16>
    %30 = vector.shape_cast %29 : vector<1x128x128xbf16> to vector<128x128xbf16>
    %cst_18 = arith.constant dense<0.000000e+00> : vector<128x128xf32>
    %31 = tpu.matmul %28, %30, %cst_18 {dimension_numbers = #tpu.dot_dimension_numbers<[1], [0], [0], [1], [0, 0, 1, 1], [], []>} : vector<128x128xbf16>, vector<128x128xbf16>, vector<128x128xf32> -> vector<128x128xf32>
    %32 = arith.truncf %0 : vector<128x128xf32> to vector<128x128xbf16>
    %c4 = arith.constant 4 : index
    %c0_19 = arith.constant 0 : index
    %c0_20 = arith.constant 0 : index
    %33 = vector.load %arg2[%c4, %c0_19, %c0_20] : memref<15x128x128xbf16, #tpu.memory_space<vmem>>, vector<1x128x128xbf16>
    %34 = vector.shape_cast %33 : vector<1x128x128xbf16> to vector<128x128xbf16>
    %cst_21 = arith.constant dense<0.000000e+00> : vector<128x128xf32>
    %35 = tpu.matmul %32, %34, %cst_21 {dimension_numbers = #tpu.dot_dimension_numbers<[1], [0], [0], [1], [0, 0, 1, 1], [], []>} : vector<128x128xbf16>, vector<128x128xbf16>, vector<128x128xf32> -> vector<128x128xf32>
    %36 = arith.truncf %27 : vector<128x128xf32> to vector<128x128xbf16>
    %c5 = arith.constant 5 : index
    %c0_22 = arith.constant 0 : index
    %c0_23 = arith.constant 0 : index
    %37 = vector.load %arg2[%c5, %c0_22, %c0_23] : memref<15x128x128xbf16, #tpu.memory_space<vmem>>, vector<1x128x128xbf16>
    %38 = vector.shape_cast %37 : vector<1x128x128xbf16> to vector<128x128xbf16>
    %cst_24 = arith.constant dense<0.000000e+00> : vector<128x128xf32>
    %39 = tpu.matmul %36, %38, %cst_24 {dimension_numbers = #tpu.dot_dimension_numbers<[1], [0], [0], [1], [0, 0, 1, 1], [], []>} : vector<128x128xbf16>, vector<128x128xbf16>, vector<128x128xf32> -> vector<128x128xf32>
    %40 = arith.addf %35, %39 : vector<128x128xf32>
    %cst_25 = arith.constant 0.000000e+00 : f32
    %41 = vector.broadcast %cst_25 : f32 to vector<128x128xf32>
    %42 = arith.cmpf oge, %40, %41 : vector<128x128xf32>
    %cst_26 = arith.constant 2.000000e-01 : f32
    %43 = vector.broadcast %cst_26 : f32 to vector<128x128xf32>
    %44 = arith.mulf %43, %40 : vector<128x128xf32>
    %45 = arith.select %42, %40, %44 : vector<128x128xi1>, vector<128x128xf32>
    %46 = arith.truncf %45 : vector<128x128xf32> to vector<128x128xbf16>
    %c6 = arith.constant 6 : index
    %c0_27 = arith.constant 0 : index
    %c0_28 = arith.constant 0 : index
    %47 = vector.load %arg2[%c6, %c0_27, %c0_28] : memref<15x128x128xbf16, #tpu.memory_space<vmem>>, vector<1x128x128xbf16>
    %48 = vector.shape_cast %47 : vector<1x128x128xbf16> to vector<128x128xbf16>
    %cst_29 = arith.constant dense<0.000000e+00> : vector<128x128xf32>
    %49 = tpu.matmul %46, %48, %cst_29 {dimension_numbers = #tpu.dot_dimension_numbers<[1], [0], [0], [1], [0, 0, 1, 1], [], []>} : vector<128x128xbf16>, vector<128x128xbf16>, vector<128x128xf32> -> vector<128x128xf32>
    %cst_30 = arith.constant 0.000000e+00 : f32
    %50 = vector.broadcast %cst_30 : f32 to vector<128x128xf32>
    %51 = arith.cmpf oge, %49, %50 : vector<128x128xf32>
    %cst_31 = arith.constant 2.000000e-01 : f32
    %52 = vector.broadcast %cst_31 : f32 to vector<128x128xf32>
    %53 = arith.mulf %52, %49 : vector<128x128xf32>
    %54 = arith.select %51, %49, %53 : vector<128x128xi1>, vector<128x128xf32>
    %55 = arith.truncf %54 : vector<128x128xf32> to vector<128x128xbf16>
    %c7 = arith.constant 7 : index
    %c0_32 = arith.constant 0 : index
    %c0_33 = arith.constant 0 : index
    %56 = vector.load %arg2[%c7, %c0_32, %c0_33] : memref<15x128x128xbf16, #tpu.memory_space<vmem>>, vector<1x128x128xbf16>
    %57 = vector.shape_cast %56 : vector<1x128x128xbf16> to vector<128x128xbf16>
    %cst_34 = arith.constant dense<0.000000e+00> : vector<128x128xf32>
    %58 = tpu.matmul %55, %57, %cst_34 {dimension_numbers = #tpu.dot_dimension_numbers<[1], [0], [0], [1], [0, 0, 1, 1], [], []>} : vector<128x128xbf16>, vector<128x128xbf16>, vector<128x128xf32> -> vector<128x128xf32>
    %cst_35 = arith.constant 0.000000e+00 : f32
    %59 = vector.broadcast %cst_35 : f32 to vector<128x128xf32>
    %60 = arith.cmpf oge, %58, %59 : vector<128x128xf32>
    %cst_36 = arith.constant 2.000000e-01 : f32
    %61 = vector.broadcast %cst_36 : f32 to vector<128x128xf32>
    %62 = arith.mulf %61, %58 : vector<128x128xf32>
    %63 = arith.select %60, %58, %62 : vector<128x128xi1>, vector<128x128xf32>
    %64 = arith.truncf %63 : vector<128x128xf32> to vector<128x128xbf16>
    %c8 = arith.constant 8 : index
    %c0_37 = arith.constant 0 : index
    %c0_38 = arith.constant 0 : index
    %65 = vector.load %arg2[%c8, %c0_37, %c0_38] : memref<15x128x128xbf16, #tpu.memory_space<vmem>>, vector<1x128x128xbf16>
    %66 = vector.shape_cast %65 : vector<1x128x128xbf16> to vector<128x128xbf16>
    %cst_39 = arith.constant dense<0.000000e+00> : vector<128x128xf32>
    %67 = tpu.matmul %64, %66, %cst_39 {dimension_numbers = #tpu.dot_dimension_numbers<[1], [0], [0], [1], [0, 0, 1, 1], [], []>} : vector<128x128xbf16>, vector<128x128xbf16>, vector<128x128xf32> -> vector<128x128xf32>
    %cst_40 = arith.constant 5.000000e-01 : f32
    %68 = vector.broadcast %cst_40 : f32 to vector<128x128xf32>
    %69 = arith.mulf %68, %67 : vector<128x128xf32>
    %70 = math.exp %69 : vector<128x128xf32>
    %71 = arith.mulf %70, %0 : vector<128x128xf32>
    %72 = arith.truncf %67 : vector<128x128xf32> to vector<128x128xbf16>
    %c9 = arith.constant 9 : index
    %c0_41 = arith.constant 0 : index
    %c0_42 = arith.constant 0 : index
    %73 = vector.load %arg2[%c9, %c0_41, %c0_42] : memref<15x128x128xbf16, #tpu.memory_space<vmem>>, vector<1x128x128xbf16>
    %74 = vector.shape_cast %73 : vector<1x128x128xbf16> to vector<128x128xbf16>
    %cst_43 = arith.constant dense<0.000000e+00> : vector<128x128xf32>
    %75 = tpu.matmul %72, %74, %cst_43 {dimension_numbers = #tpu.dot_dimension_numbers<[1], [0], [0], [1], [0, 0, 1, 1], [], []>} : vector<128x128xbf16>, vector<128x128xbf16>, vector<128x128xf32> -> vector<128x128xf32>
    %76 = arith.truncf %71 : vector<128x128xf32> to vector<128x128xbf16>
    %c10 = arith.constant 10 : index
    %c0_44 = arith.constant 0 : index
    %c0_45 = arith.constant 0 : index
    %77 = vector.load %arg2[%c10, %c0_44, %c0_45] : memref<15x128x128xbf16, #tpu.memory_space<vmem>>, vector<1x128x128xbf16>
    %78 = vector.shape_cast %77 : vector<1x128x128xbf16> to vector<128x128xbf16>
    %cst_46 = arith.constant dense<0.000000e+00> : vector<128x128xf32>
    %79 = tpu.matmul %76, %78, %cst_46 {dimension_numbers = #tpu.dot_dimension_numbers<[1], [0], [0], [1], [0, 0, 1, 1], [], []>} : vector<128x128xbf16>, vector<128x128xbf16>, vector<128x128xf32> -> vector<128x128xf32>
    %80 = arith.addf %75, %79 : vector<128x128xf32>
    %81 = arith.truncf %27 : vector<128x128xf32> to vector<128x128xbf16>
    %c11 = arith.constant 11 : index
    %c0_47 = arith.constant 0 : index
    %c0_48 = arith.constant 0 : index
    %82 = vector.load %arg2[%c11, %c0_47, %c0_48] : memref<15x128x128xbf16, #tpu.memory_space<vmem>>, vector<1x128x128xbf16>
    %83 = vector.shape_cast %82 : vector<1x128x128xbf16> to vector<128x128xbf16>
    %cst_49 = arith.constant dense<0.000000e+00> : vector<128x128xf32>
    %84 = tpu.matmul %81, %83, %cst_49 {dimension_numbers = #tpu.dot_dimension_numbers<[1], [0], [0], [1], [0, 0, 1, 1], [], []>} : vector<128x128xbf16>, vector<128x128xbf16>, vector<128x128xf32> -> vector<128x128xf32>
    %85 = arith.addf %80, %84 : vector<128x128xf32>
    %cst_50 = arith.constant 0.000000e+00 : f32
    %86 = vector.broadcast %cst_50 : f32 to vector<128x128xf32>
    %87 = arith.cmpf oge, %85, %86 : vector<128x128xf32>
    %cst_51 = arith.constant 2.000000e-01 : f32
    %88 = vector.broadcast %cst_51 : f32 to vector<128x128xf32>
    %89 = arith.mulf %88, %85 : vector<128x128xf32>
    %90 = arith.select %87, %85, %89 : vector<128x128xi1>, vector<128x128xf32>
    %91 = arith.truncf %90 : vector<128x128xf32> to vector<128x128xbf16>
    %c12 = arith.constant 12 : index
    %c0_52 = arith.constant 0 : index
    %c0_53 = arith.constant 0 : index
    %92 = vector.load %arg2[%c12, %c0_52, %c0_53] : memref<15x128x128xbf16, #tpu.memory_space<vmem>>, vector<1x128x128xbf16>
    %93 = vector.shape_cast %92 : vector<1x128x128xbf16> to vector<128x128xbf16>
    %cst_54 = arith.constant dense<0.000000e+00> : vector<128x128xf32>
    %94 = tpu.matmul %91, %93, %cst_54 {dimension_numbers = #tpu.dot_dimension_numbers<[1], [0], [0], [1], [0, 0, 1, 1], [], []>} : vector<128x128xbf16>, vector<128x128xbf16>, vector<128x128xf32> -> vector<128x128xf32>
    %cst_55 = arith.constant 0.000000e+00 : f32
    %95 = vector.broadcast %cst_55 : f32 to vector<128x128xf32>
    %96 = arith.cmpf oge, %94, %95 : vector<128x128xf32>
    %cst_56 = arith.constant 2.000000e-01 : f32
    %97 = vector.broadcast %cst_56 : f32 to vector<128x128xf32>
    %98 = arith.mulf %97, %94 : vector<128x128xf32>
    %99 = arith.select %96, %94, %98 : vector<128x128xi1>, vector<128x128xf32>
    %100 = arith.truncf %99 : vector<128x128xf32> to vector<128x128xbf16>
    %c13 = arith.constant 13 : index
    %c0_57 = arith.constant 0 : index
    %c0_58 = arith.constant 0 : index
    %101 = vector.load %arg2[%c13, %c0_57, %c0_58] : memref<15x128x128xbf16, #tpu.memory_space<vmem>>, vector<1x128x128xbf16>
    %102 = vector.shape_cast %101 : vector<1x128x128xbf16> to vector<128x128xbf16>
    %cst_59 = arith.constant dense<0.000000e+00> : vector<128x128xf32>
    %103 = tpu.matmul %100, %102, %cst_59 {dimension_numbers = #tpu.dot_dimension_numbers<[1], [0], [0], [1], [0, 0, 1, 1], [], []>} : vector<128x128xbf16>, vector<128x128xbf16>, vector<128x128xf32> -> vector<128x128xf32>
    %cst_60 = arith.constant 0.000000e+00 : f32
    %104 = vector.broadcast %cst_60 : f32 to vector<128x128xf32>
    %105 = arith.cmpf oge, %103, %104 : vector<128x128xf32>
    %cst_61 = arith.constant 2.000000e-01 : f32
    %106 = vector.broadcast %cst_61 : f32 to vector<128x128xf32>
    %107 = arith.mulf %106, %103 : vector<128x128xf32>
    %108 = arith.select %105, %103, %107 : vector<128x128xi1>, vector<128x128xf32>
    %109 = arith.truncf %108 : vector<128x128xf32> to vector<128x128xbf16>
    %c14 = arith.constant 14 : index
    %c0_62 = arith.constant 0 : index
    %c0_63 = arith.constant 0 : index
    %110 = vector.load %arg2[%c14, %c0_62, %c0_63] : memref<15x128x128xbf16, #tpu.memory_space<vmem>>, vector<1x128x128xbf16>
    %111 = vector.shape_cast %110 : vector<1x128x128xbf16> to vector<128x128xbf16>
    %cst_64 = arith.constant dense<0.000000e+00> : vector<128x128xf32>
    %112 = tpu.matmul %109, %111, %cst_64 {dimension_numbers = #tpu.dot_dimension_numbers<[1], [0], [0], [1], [0, 0, 1, 1], [], []>} : vector<128x128xbf16>, vector<128x128xbf16>, vector<128x128xf32> -> vector<128x128xf32>
    %113 = tpu.iota {dimensions = array<i32: 1>} : vector<128x128xi32>
    %c0_i32 = arith.constant 0 : i32
    %114 = vector.broadcast %c0_i32 : i32 to vector<128x128xi32>
    %115 = arith.cmpi eq, %113, %114 : vector<128x128xi32>
    %c4_i32 = arith.constant 4 : i32
    %116 = vector.broadcast %c4_i32 : i32 to vector<128x128xi32>
    %117 = arith.cmpi slt, %113, %116 : vector<128x128xi32>
    %118 = arith.negf %112 : vector<128x128xf32>
    %119 = math.exp %118 : vector<128x128xf32>
    %cst_65 = arith.constant 1.000000e+00 : f32
    %120 = vector.broadcast %cst_65 : f32 to vector<128x128xf32>
    %121 = arith.addf %120, %119 : vector<128x128xf32>
    %122 = arith.divf %120, %121 : vector<128x128xf32>
    %cst_66 = arith.constant 0.000000e+00 : f32
    %123 = vector.broadcast %cst_66 : f32 to vector<128x128xf32>
    %124 = arith.select %117, %122, %123 : vector<128x128xi1>, vector<128x128xf32>
    %125 = arith.select %115, %112, %124 : vector<128x128xi1>, vector<128x128xf32>
    %c0_67 = arith.constant 0 : index
    %c0_68 = arith.constant 0 : index
    %126 = vector.load %arg3[%c0_67, %c0_68] : memref<128x128xf32, #tpu.memory_space<vmem>>, vector<128x128xf32>
    tpu.vector_store %arg3[%c0_67, %c0_68], %125 {strides = array<i32>} : memref<128x128xf32, #tpu.memory_space<vmem>>, vector<128x128xf32>,
    %127 = vector.extract_strided_slice %112 {offsets = [0, 4], sizes = [128, 1], strides = [1, 1]} : vector<128x128xf32> to vector<128x1xf32>
    %cst_69 = arith.constant 1.83787704 : f32
    %128 = vector.broadcast %cst_69 : f32 to vector<128x1xf32>
    %129 = arith.addf %127, %128 : vector<128x1xf32>
    %cst_70 = arith.constant -5.000000e-01 : f32
    %130 = vector.broadcast %cst_70 : f32 to vector<128x1xf32>
    %131 = arith.mulf %130, %129 : vector<128x1xf32>
    %132 = vector.extract_strided_slice %125 {offsets = [0, 0], sizes = [128, 1], strides = [1, 1]} : vector<128x128xf32> to vector<128x1xf32>
    %133 = vector.extract_strided_slice %0 {offsets = [0, 0], sizes = [128, 1], strides = [1, 1]} : vector<128x128xf32> to vector<128x1xf32>
    %134 = arith.subf %132, %133 : vector<128x1xf32>
    %135 = arith.mulf %134, %134 : vector<128x1xf32>
    %cst_71 = arith.constant -5.000000e-01 : f32
    %136 = vector.broadcast %cst_71 : f32 to vector<128x1xf32>
    %137 = arith.mulf %136, %135 : vector<128x1xf32>
    %138 = math.exp %127 : vector<128x1xf32>
    %cst_72 = arith.constant 9.99999993E-9 : f32
    %139 = vector.broadcast %cst_72 : f32 to vector<128x1xf32>
    %140 = arith.addf %138, %139 : vector<128x1xf32>
    %141 = arith.divf %137, %140 : vector<128x1xf32>
    %142 = arith.addf %131, %141 : vector<128x1xf32>
    %143 = vector.shape_cast %142 : vector<128x1xf32> to vector<1x128x1xf32>
    %cst_73 = arith.constant dense<0.000000e+00> : vector<1xf32>
    %144 = vector.multi_reduction <add>, %143, %cst_73 [1, 2] : vector<1x128x1xf32> to vector<1xf32>
    %145 = vector.shape_cast %144 : vector<1xf32> to vector<1x1x1xf32>
    %146 = vector.extract %145[0, 0, 0] : f32 from vector<1x1x1xf32>
    %cst_74 = arith.constant 0.000000e+00 : f32
    %147 = vector.broadcast %cst_74 : f32 to vector<128x128xf32>
    %148 = arith.maximumf %125, %147 : vector<128x128xf32>
    %149 = arith.mulf %125, %0 : vector<128x128xf32>
    %150 = arith.subf %148, %149 : vector<128x128xf32>
    %151 = math.absf %125 : vector<128x128xf32>
    %cst_75 = arith.constant 0.000000e+00 : f32
    %152 = vector.broadcast %cst_75 : f32 to vector<128x128xf32>
    %153 = arith.subf %152, %151 : vector<128x128xf32>
    %154 = math.exp %153 : vector<128x128xf32>
    %155 = math.log1p %154 : vector<128x128xf32>
    %156 = arith.addf %150, %155 : vector<128x128xf32>
    %c1_i32 = arith.constant 1 : i32
    %157 = vector.broadcast %c1_i32 : i32 to vector<128x128xi32>
    %158 = arith.cmpi sge, %113, %157 : vector<128x128xi32>
    %c4_i32_76 = arith.constant 4 : i32
    %159 = vector.broadcast %c4_i32_76 : i32 to vector<128x128xi32>
    %160 = arith.cmpi slt, %113, %159 : vector<128x128xi32>
    %161 = arith.andi %158, %160 : vector<128x128xi1>
    %cst_77 = arith.constant 0.000000e+00 : f32
    %162 = vector.broadcast %cst_77 : f32 to vector<128x128xf32>
    %163 = arith.select %161, %156, %162 : vector<128x128xi1>, vector<128x128xf32>
    %164 = vector.shape_cast %163 : vector<128x128xf32> to vector<1x128x128xf32>
    %cst_78 = arith.constant dense<0.000000e+00> : vector<1xf32>
    %165 = vector.multi_reduction <add>, %164, %cst_78 [1, 2] : vector<1x128x128xf32> to vector<1xf32>
    %166 = vector.shape_cast %165 : vector<1xf32> to vector<1x1x1xf32>
    %167 = vector.extract %166[0, 0, 0] : f32 from vector<1x1x1xf32>
    %168 = vector.extract_strided_slice %67 {offsets = [0, 0], sizes = [128, 8], strides = [1, 1]} : vector<128x128xf32> to vector<128x8xf32>
    %169 = vector.extract_strided_slice %67 {offsets = [0, 8], sizes = [128, 8], strides = [1, 1]} : vector<128x128xf32> to vector<128x8xf32>
    %170 = vector.extract_strided_slice %31 {offsets = [0, 0], sizes = [128, 8], strides = [1, 1]} : vector<128x128xf32> to vector<128x8xf32>
    %171 = vector.extract_strided_slice %31 {offsets = [0, 8], sizes = [128, 8], strides = [1, 1]} : vector<128x128xf32> to vector<128x8xf32>
    %172 = arith.subf %169, %171 : vector<128x8xf32>
    %173 = math.exp %172 : vector<128x8xf32>
    %174 = arith.subf %170, %168 : vector<128x8xf32>
    %175 = arith.mulf %174, %174 : vector<128x8xf32>
    %176 = math.exp %171 : vector<128x8xf32>
    %cst_79 = arith.constant 9.99999993E-9 : f32
    %177 = vector.broadcast %cst_79 : f32 to vector<128x8xf32>
    %178 = arith.addf %176, %177 : vector<128x8xf32>
    %179 = arith.divf %175, %178 : vector<128x8xf32>
    %180 = arith.addf %173, %179 : vector<128x8xf32>
    %cst_80 = arith.constant 1.000000e+00 : f32
    %181 = vector.broadcast %cst_80 : f32 to vector<128x8xf32>
    %182 = arith.subf %180, %181 : vector<128x8xf32>
    %183 = arith.addf %182, %171 : vector<128x8xf32>
    %184 = arith.subf %183, %169 : vector<128x8xf32>
    %185 = vector.shape_cast %184 : vector<128x8xf32> to vector<1x128x8xf32>
    %cst_81 = arith.constant dense<0.000000e+00> : vector<1xf32>
    %186 = vector.multi_reduction <add>, %185, %cst_81 [1, 2] : vector<1x128x8xf32> to vector<1xf32>
    %187 = vector.shape_cast %186 : vector<1xf32> to vector<1x1x1xf32>
    %188 = vector.extract %187[0, 0, 0] : f32 from vector<1x1x1xf32>
    %cst_82 = arith.constant 5.000000e-01 : f32
    %189 = arith.mulf %cst_82, %188 : f32
    %190 = tpu.iota {dimensions = array<i32: 1>} : vector<8x128xi32>
    %c0_i32_83 = arith.constant 0 : i32
    %191 = vector.broadcast %c0_i32_83 : i32 to vector<8x128xi32>
    %192 = arith.cmpi eq, %190, %191 : vector<8x128xi32>
    %c1_i32_84 = arith.constant 1 : i32
    %193 = vector.broadcast %c1_i32_84 : i32 to vector<8x128xi32>
    %194 = arith.cmpi eq, %190, %193 : vector<8x128xi32>
    %c2_i32 = arith.constant 2 : i32
    %195 = vector.broadcast %c2_i32 : i32 to vector<8x128xi32>
    %196 = arith.cmpi eq, %190, %195 : vector<8x128xi32>
    %cst_85 = arith.constant 0.000000e+00 : f32
    %197 = vector.broadcast %189 : f32 to vector<8x128xf32>
    %198 = vector.broadcast %cst_85 : f32 to vector<8x128xf32>
    %199 = arith.select %196, %197, %198 : vector<8x128xi1>, vector<8x128xf32>
    %200 = vector.broadcast %167 : f32 to vector<8x128xf32>
    %201 = arith.select %194, %200, %199 : vector<8x128xi1>, vector<8x128xf32>
    %202 = vector.broadcast %146 : f32 to vector<8x128xf32>
    %203 = arith.select %192, %202, %201 : vector<8x128xi1>, vector<8x128xf32>
    %c0_86 = arith.constant 0 : index
    %c0_87 = arith.constant 0 : index
    %204 = vector.load %arg4[%c0_86, %c0_87] : memref<8x128xf32, #tpu.memory_space<vmem>>, vector<8x128xf32>
    tpu.vector_store %arg4[%c0_86, %c0_87], %203 {strides = array<i32>} : memref<8x128xf32, #tpu.memory_space<vmem>>, vector<8x128xf32>,
    return
  }
  func.func @transform_0(%arg0: i32) -> (i32, i32) {
    %c0_i32 = arith.constant 0 : i32
    %c0_i32_0 = arith.constant 0 : i32
    return %arg0, %c0_i32 : i32, i32
  }
  func.func @transform_1(%arg0: i32) -> (i32, i32, i32) {
    %c0_i32 = arith.constant 0 : i32
    %c0_i32_0 = arith.constant 0 : i32
    %c0_i32_1 = arith.constant 0 : i32
    %c0_i32_2 = arith.constant 0 : i32
    return %c0_i32, %c0_i32_0, %c0_i32_1 : i32, i32, i32
  }
  func.func @transform_2(%arg0: i32) -> (i32, i32) {
    %c0_i32 = arith.constant 0 : i32
    %c0_i32_0 = arith.constant 0 : i32
    return %arg0, %c0_i32 : i32, i32
  }
  func.func @transform_3(%arg0: i32) -> (i32, i32) {
    %c0_i32 = arith.constant 0 : i32
    %c0_i32_0 = arith.constant 0 : i32
    return %arg0, %c0_i32 : i32, i32
  }
}

</mosaic_0001>

<bundles_post_ra>
// kernel: cvae_forward.1
= control target key start
LH: loop header
LB: loop body
LE: loop exit
PB: predicated region body
PF: predicated region fallthrough
CT: control target
= control target key end

     0   :  { %s6311_s12 = smov 0   ;;  %s7874_s0 = inlined_call_operand.vmem [shape: f32[256,128], index: 0, kind: input, shape index: {}]   ;;  %s7875_s1 = inlined_call_operand.vmem [shape: bf16[15,128,128], index: 1, kind: input, shape index: {}]   ;;  %s7876_s2 = inlined_call_operand.vmem [shape: f32[256,128], index: 2, kind: output, shape index: {0}]   ;;  %s7877_s3 = inlined_call_operand.vmem [shape: f32[16,128], index: 3, kind: output, shape index: {1}]  }
   0x1 LB: > { %s6317_s13 = sadd.s32 4294967295, %s6285_s12   ;;  %p4668_p0 = scmp.ge.s32.totalorder %s6285_s12, 1  ;;  %s6285_s12 = sphi %s6311_s12, %s14_s12  }
   0x2   : > { %p141_p1 = scmp.lt.s32.totalorder %s6285_s12, 3 }
   0x4   : > { %p142_p2 = pnand %p4668_p0, %p141_p1 }
   0x6   : > { %145 = sbr.rel (%p142_p2) target bundleno = 3067 (0xbfb), region = 28 }
   0xb   : > { %v5806_v0 = vld [vmem:[%s7875_s1 + $0x38] sm:$0xff]   ;;  %s4669_s16 = sshll.u32 %s6317_s13, 4  ;;  %v5807_v1 = vld [vmem:[%s7875_s1 + $0x30] sm:$0xff]   ;;  %v5808_v2 = vld [vmem:[%s7875_s1 + $0x28] sm:$0xff]   ;;  %s6287_s19 = smov 120  }
   0xc   : > { %p170_p3 = scmp.lt.s32.totalorder %s4669_s16, 31  ;;  %5292 = vmatprep.subr.bf16.mxu0 %v5806_v0  ;;  %v5809_v3 = vld [vmem:[%s7875_s1 + $0x20] sm:$0xff]   ;;  %v5810_v7 = vld [vmem:[%s7875_s1 + $0x18] sm:$0xff]   ;;  %v5815_v9 = vld [vmem:[%s7875_s1 + $0x70] sm:$0xff]   ;;  %s6288_s23 = smov 124  }
   0xd   : > { %5293 = vmatpush3.bf16.msra.mxu0 %v5806_v0  ;;  %v5814_v8 = vld [vmem:[%s7875_s1 + $0x78] sm:$0xff]   ;;  %v5811_v10 = vld [vmem:[%s7875_s1 + $0x10] sm:$0xff]   ;;  %v5812_v11 = vld [vmem:[%s7875_s1 + $0x8] sm:$0xff]   ;;  %p181_p4 = scmp.lt.s32.totalorder %s6317_s13, 1 }
   0xe   : > { %s8151_s16 = smov (!%p170_p3, %s4669_s16), 31  ;;  %5294 = vmatprep.subr.bf16.mxu0 %v5807_v1  ;;  %5324 = vmatprep.subr.bf16.mxu1 %v5814_v8  ;;  %v5816_v12 = vld [vmem:[%s7875_s1 + $0x68] sm:$0xff]   ;;  %v5817_v13 = vld [vmem:[%s7875_s1 + $0x60] sm:$0xff]   ;;  %v5818_v15 = vld [vmem:[%s7875_s1 + $0x58] sm:$0xff]  }
   0xf   : > { %s4670_s21 = sshll.u32 %s8151_s16, 3  ;;  %5325 = vmatpush3.bf16.msra.mxu1 %v5814_v8  ;;  %v5813_v14 = vld [vmem:[%s7875_s1] sm:$0xff]   ;;  %v5819_v37 = vld [vmem:[%s7875_s1 + $0x50] sm:$0xff]   ;;  %v5820_v38 = vld [vmem:[%s7875_s1 + $0x48] sm:$0xff]   ;;  %s6289_s16 = smov 8  }
  0x10   : > { %s6339_s24 = scalar_lea.vmem %s7874_s0, %s4670_s21  ;;  %5326 = vmatprep.subr.bf16.mxu1 %v5815_v9  ;;  %v5821_v39 = vld [vmem:[%s7875_s1 + $0x40] sm:$0xff]   ;;  %v5822_v40 = vld [vmem:[%s7875_s1 + $0xb8] sm:$0xff]   ;;  %v5823_v41 = vld [vmem:[%s7875_s1 + $0xb0] sm:$0xff]   ;;  %s7024_s27 = scalar_lea.vmem %s7876_s2, %s4670_s21 }
  0x11   : > { %5295 = vmatpush3.bf16.msra.mxu0 %v5807_v1  ;;  %v186_v4 = vld [vmem:[%s6339_s24] sm:$0xff]  ;;  %v187_v5 = vld [vmem:[%s6339_s24 + $0x8] sm:$0xff]  ;;  %v188_v16 = vld [vmem:[%s6339_s24 + $0x10] sm:$0xff]  ;;  %s6290_s21 = smov 4   ;;  %s8153_s13 = smov (!%p181_p4, %s6317_s13), 1 }
  0x12   : > { %5296 = vmatprep.subr.bf16.mxu0 %v5808_v2  ;;  %v6346_v6 = vpack.c.bf16 %v187_v5, %v186_v4  ;;  %v189_v17 = vld [vmem:[%s6339_s24 + $0x18] sm:$0xff]  ;;  %v190_v18 = vld [vmem:[%s6339_s24 + $0x20] sm:$0xff]  ;;  %v191_v19 = vld [vmem:[%s6339_s24 + $0x28] sm:$0xff]  ;;  %s4673_s29 = sshll.u32 %s8153_s13, 3 }
  0x13   : > { %5327 = vmatpush3.bf16.msra.mxu1 %v5815_v9  ;;  %v6380_v20 = vpack.c.bf16 %v189_v17, %v188_v16  ;;  %v6382_v21 = vpack.c.bf16 %v191_v19, %v190_v18  ;;  %v192_v22 = vld [vmem:[%s6339_s24 + $0x30] sm:$0xff]  ;;  %v193_v23 = vld [vmem:[%s6339_s24 + $0x38] sm:$0xff]  ;;  %v194_v24 = vld [vmem:[%s6339_s24 + $0x40] sm:$0xff]  ;;  %s184_s6 = scalar_lea.vmem %s7877_s3, %s4673_s29 }
  0x14   : > { %5308 = vmatprep.mubr.bf16.mxu0 %v6346_v6  ;;  %5328 = vmatprep.subr.bf16.mxu1 %v5816_v12  ;;  %v195_v25 = vld [vmem:[%s6339_s24 + $0x48] sm:$0xff]  ;;  %v6390_v26 = vpack.c.bf16 %v193_v23, %v192_v22  ;;  %v196_v28 = vld [vmem:[%s6339_s24 + $0x50] sm:$0xff]  ;;  %v197_v29 = vld [vmem:[%s6339_s24 + $0x58] sm:$0xff] }
  0x15   : > { %5297 = vmatpush3.bf16.msra.mxu0 %v5808_v2  ;;  %v6392_v27 = vpack.c.bf16 %v195_v25, %v194_v24  ;;  %v198_v30 = vld [vmem:[%s6339_s24 + $0x60] sm:$0xff]  ;;  %v199_v31 = vld [vmem:[%s6339_s24 + $0x68] sm:$0xff]  ;;  %v6400_v32 = vpack.c.bf16 %v197_v29, %v196_v28  ;;  %v200_v34 = vld [vmem:[%s6339_s24 + $0x70] sm:$0xff] }
  0x16   : > { %5298 = vmatprep.subr.bf16.mxu0 %v5809_v3  ;;  %v6402_v33 = vpack.c.bf16 %v199_v31, %v198_v30  ;;  %v201_v35 = vld [vmem:[%s6339_s24 + $0x78] sm:$0xff]  ;;  %v5824_v42 = vld [vmem:[%s7875_s1 + $0xa8] sm:$0xff]   ;;  %v5825_v43 = vld [vmem:[%s7875_s1 + $0xa0] sm:$0xff]  }
  0x17   : > { %5329 = vmatpush3.bf16.msra.mxu1 %v5816_v12  ;;  %v6408_v36 = vpack.c.bf16 %v201_v35, %v200_v34  ;;  %v5826_v44 = vld [vmem:[%s7875_s1 + $0x98] sm:$0xff]  }
  0x18   : > { %5330 = vmatprep.subr.bf16.mxu1 %v5817_v13 }
  0x19   : > { %5299 = vmatpush3.bf16.msra.mxu0 %v5809_v3 }
  0x1a   : > { %5300 = vmatprep.subr.bf16.mxu0 %v5810_v7 }
  0x1b   : > { %5331 = vmatpush3.bf16.msra.mxu1 %v5817_v13 }
  0x1c   : > { %5332 = vmatprep.subr.bf16.mxu1 %v5818_v15 }
  0x1d   : > { %5301 = vmatpush3.bf16.msra.mxu0 %v5810_v7 }
  0x1e   : > { %5302 = vmatprep.subr.bf16.mxu0 %v5811_v10 }
  0x1f   : > { %5333 = vmatpush3.bf16.msra.mxu1 %v5818_v15 }
  0x20   : > { %5334 = vmatprep.subr.bf16.mxu1 %v5819_v37 }
  0x21   : > { %5303 = vmatpush3.bf16.msra.mxu0 %v5811_v10 }
  0x22   : > { %5304 = vmatprep.subr.bf16.mxu0 %v5812_v11 }
  0x23   : > { %5335 = vmatpush3.bf16.msra.mxu1 %v5819_v37 }
  0x24   : > { %5336 = vmatprep.subr.bf16.mxu1 %v5820_v38 }
  0x25   : > { %5305 = vmatpush3.bf16.msra.mxu0 %v5812_v11 }
  0x26   : > { %5306 = vmatprep.subr.bf16.mxu0 %v5813_v14 }
  0x27   : > { %5337 = vmatpush3.bf16.msra.mxu1 %v5820_v38 }
  0x28   : > { %5338 = vmatprep.subr.bf16.mxu1 %v5821_v39 }
  0x29   : > { %5307 = vmatpush3.bf16.msra.mxu0 %v5813_v14 }
  0x2a   : > { %5356 = vmatprep.subr.bf16.mxu0 %v5822_v40 }
  0x2b   : > { %5339 = vmatpush3.bf16.msra.mxu1 %v5821_v39 }
  0x2c   : > { %5309 = vmatmul.mubr.bf16.vlgmr.msra.gmra.mxu0 %v6380_v20 }
  0x2d   : > { %5312 = vmatprep.mubr.bf16.mxu0 %v6382_v21  ;;  %5357 = vmatpush3.bf16.msra.mxu0 %v5822_v40 }
  0x2e   : > { %5358 = vmatprep.subr.bf16.mxu0 %v5823_v41 }
  0x31   : > { %5359 = vmatpush3.bf16.msra.mxu0 %v5823_v41 }
  0x32   : > { %5360 = vmatprep.subr.bf16.mxu0 %v5824_v42 }
  0x34   : > { %5313 = vmatmul.mubr.bf16.gmra.mxu0 %v6390_v26 }
  0x35   : > { %5316 = vmatprep.mubr.bf16.mxu0 %v6392_v27  ;;  %5361 = vmatpush3.bf16.msra.mxu0 %v5824_v42 }
  0x36   : > { %5362 = vmatprep.subr.bf16.mxu0 %v5825_v43 }
  0x39   : > { %5363 = vmatpush3.bf16.msra.mxu0 %v5825_v43 }
  0x3a   : > { %5364 = vmatprep.subr.bf16.mxu0 %v5826_v44 }
  0x3c   : > { %5317 = vmatmul.mubr.bf16.gmra.mxu0 %v6400_v32 }
  0x3d   : > { %5320 = vmatprep.mubr.bf16.mxu0 %v6402_v33  ;;  %5365 = vmatpush3.bf16.msra.mxu0 %v5826_v44 }
  0x44   : > { %5321 = vmatmul.mubr.bf16.gmra.mxu0 %v6408_v36 }
  0xec   : > { %v5310_v45 = vpop.f32.mrf.mxu0 }
  0xed   : > { %v389_v50 = vmul.f32 0.2, %v5310_v45  ;;  %vm373_vm2 = vcmp.ge.f32.partialorder %v5310_v45, 0.0 }
  0xee   : > { %v308_v46 = vpop.f32.mrf.mxu0 }
  0xef   : > { %v387_v48 = vmul.f32 0.2, %v308_v46  ;;  %vm371_vm1 = vcmp.ge.f32.partialorder %v308_v46, 0.0  ;;  %v405_v57 = vsel %vm373_vm2, %v5310_v45, %v389_v50  ;;  %v5827_v45 = vld [vmem:[%s7875_s1 + $0x90] sm:$0xff]  }
  0xf0   : > { %v5311_v47 = vpop.f32.mrf.mxu0  ;;  %5366 = vmatprep.subr.bf16.mxu0 %v5827_v45  ;;  %v5832_v50 = vld [vmem:[%s7875_s1 + $0xf0] sm:$0xff]  }
  0xf1   : > { %vm374_vm0 = vcmp.ge.f32.partialorder %v5311_v47, 0.0  ;;  %v390_v49 = vmul.f32 0.2, %v5311_v47  ;;  %v403_v55 = vsel %vm371_vm1, %v308_v46, %v387_v48  ;;  %5367 = vmatpush3.bf16.msra.mxu0 %v5827_v45  ;;  %v5828_v46 = vld [vmem:[%s7875_s1 + $0x88] sm:$0xff]   ;;  %v5830_v48 = vld [vmem:[%s7875_s1 + $0xf8] sm:$0xff]  }
  0xf2   : > { %v311_v51 = vpop.f32.mrf.mxu0  ;;  %5368 = vmatprep.subr.bf16.mxu0 %v5828_v46  ;;  %5388 = vmatprep.subr.bf16.mxu1 %v5830_v48 }
  0xf3   : > { %vm372_vm3 = vcmp.ge.f32.partialorder %v311_v51, 0.0  ;;  %v388_v52 = vmul.f32 0.2, %v311_v51  ;;  %v406_v53 = vsel %vm374_vm0, %v5311_v47, %v390_v49  ;;  %v5829_v47 = vld [vmem:[%s7875_s1 + $0x80] sm:$0xff]   ;;  %v5831_v49 = vld [vmem:[%s7875_s1 + $0x178] sm:$0xff]  }
  0xf4   : > { %v5314_v54 = vpop.f32.mrf.mxu0  ;;  %v420_v60 = vpack.c.bf16 %v406_v53, %v405_v57  ;;  %v5838_v53 = vld [vmem:[%s7875_s1 + $0xd8] sm:$0xff]  }
  0xf5   : > { %v404_v56 = vsel %vm372_vm3, %v311_v51, %v388_v52  ;;  %v393_v0 = vmul.f32 0.2, %v5314_v54  ;;  %vm377_vm6 = vcmp.ge.f32.partialorder %v5314_v54, 0.0  ;;  %5369 = vmatpush3.bf16.msra.mxu0 %v5828_v46  ;;  %v5834_v51 = vld [vmem:[%s7875_s1 + $0xe8] sm:$0xff]   ;;  %v5836_v52 = vld [vmem:[%s7875_s1 + $0xe0] sm:$0xff]  }
  0xf6   : > { %v324_v58 = vpop.f32.mrf.mxu0  ;;  %v419_v59 = vpack.c.bf16 %v404_v56, %v403_v55  ;;  %5370 = vmatprep.subr.bf16.mxu0 %v5829_v47 }
  0xf7   : > { %v391_v62 = vmul.f32 0.2, %v324_v58  ;;  %vm375_vm5 = vcmp.ge.f32.partialorder %v324_v58, 0.0  ;;  %v409_v8 = vsel %vm377_vm6, %v5314_v54, %v393_v0 }
  0xf8   : > { %v5315_v61 = vpop.f32.mrf.mxu0  ;;  %5340 = vmatprep.mubr.bf16.mxu1 %v419_v59 }
  0xf9   : > { %vm378_vm4 = vcmp.ge.f32.partialorder %v5315_v61, 0.0  ;;  %v394_v63 = vmul.f32 0.2, %v5315_v61  ;;  %5341 = vmatmul.mubr.bf16.vlgmr.msra.gmra.mxu1 %v420_v60  ;;  %v407_v5 = vsel %vm375_vm5, %v324_v58, %v391_v62  ;;  %5371 = vmatpush3.bf16.msra.mxu0 %v5829_v47 }
  0xfa   : > { %v327_v1 = vpop.f32.mrf.mxu0  ;;  %5420 = vmatprep.subr.bf16.mxu0 %v5831_v49  ;;  %5389 = vmatpush3.bf16.msra.mxu1 %v5830_v48 }
  0xfb   : > { %vm376_vm7 = vcmp.ge.f32.partialorder %v327_v1, 0.0  ;;  %v392_v2 = vmul.f32 0.2, %v327_v1  ;;  %v410_v3 = vsel %vm378_vm4, %v5315_v61, %v394_v63  ;;  %5390 = vmatprep.subr.bf16.mxu1 %v5832_v50 }
  0xfc   : > { %v5318_v4 = vpop.f32.mrf.mxu0  ;;  %v422_v11 = vpack.c.bf16 %v410_v3, %v409_v8 }
  0xfd   : > { %v408_v7 = vsel %vm376_vm7, %v327_v1, %v392_v2  ;;  %v397_v15 = vmul.f32 0.2, %v5318_v4  ;;  %vm381_vm10 = vcmp.ge.f32.partialorder %v5318_v4, 0.0 }
  0xfe   : > { %v340_v9 = vpop.f32.mrf.mxu0  ;;  %v421_v10 = vpack.c.bf16 %v408_v7, %v407_v5  ;;  %5391 = vmatpush3.bf16.msra.mxu1 %v5832_v50  ;;  %v5833_v7 = vld [vmem:[%s7875_s1 + $0x170] sm:$0xff]  }
  0xff   : > { %v395_v13 = vmul.f32 0.2, %v340_v9  ;;  %vm379_vm9 = vcmp.ge.f32.partialorder %v340_v9, 0.0  ;;  %v413_v24 = vsel %vm381_vm10, %v5318_v4, %v397_v15  ;;  %5392 = vmatprep.subr.bf16.mxu1 %v5834_v51 }
 0x100   : > { %v5319_v12 = vpop.f32.mrf.mxu0  ;;  %5344 = vmatprep.mubr.bf16.mxu1 %v421_v10 }
 0x101   : > { %vm382_vm8 = vcmp.ge.f32.partialorder %v5319_v12, 0.0  ;;  %v398_v14 = vmul.f32 0.2, %v5319_v12  ;;  %5345 = vmatmul.mubr.bf16.gmra.mxu1 %v422_v11  ;;  %v411_v22 = vsel %vm379_vm9, %v340_v9, %v395_v13 }
 0x102   : > { %v343_v16 = vpop.f32.mrf.mxu0  ;;  %5393 = vmatpush3.bf16.msra.mxu1 %v5834_v51 }
 0x103   : > { %vm380_vm11 = vcmp.ge.f32.partialorder %v343_v16, 0.0  ;;  %v396_v17 = vmul.f32 0.2, %v343_v16  ;;  %v414_v18 = vsel %vm382_vm8, %v5319_v12, %v398_v14  ;;  %5394 = vmatprep.subr.bf16.mxu1 %v5836_v52  ;;  %v5835_v14 = vld [vmem:[%s7875_s1 + $0x168] sm:$0xff]  }
 0x104   : > { %v5322_v19 = vpop.f32.mrf.mxu0  ;;  %v424_v29 = vpack.c.bf16 %v414_v18, %v413_v24 }
 0x105   : > { %v412_v23 = vsel %vm380_vm11, %v343_v16, %v396_v17  ;;  %v401_v35 = vmul.f32 0.2, %v5322_v19  ;;  %vm385_vm14 = vcmp.ge.f32.partialorder %v5322_v19, 0.0 }
 0x106   : > { %v356_v25 = vpop.f32.mrf.mxu0  ;;  %v423_v28 = vpack.c.bf16 %v412_v23, %v411_v22  ;;  %5395 = vmatpush3.bf16.msra.mxu1 %v5836_v52 }
 0x107   : > { %v399_v31 = vmul.f32 0.2, %v356_v25  ;;  %vm383_vm13 = vcmp.ge.f32.partialorder %v356_v25, 0.0  ;;  %v417_v42 = vsel %vm385_vm14, %v5322_v19, %v401_v35  ;;  %5396 = vmatprep.subr.bf16.mxu1 %v5838_v53 }
 0x108   : > { %v5323_v30 = vpop.f32.mrf.mxu0  ;;  %5348 = vmatprep.mubr.bf16.mxu1 %v423_v28 }
 0x109   : > { %vm386_vm12 = vcmp.ge.f32.partialorder %v5323_v30, 0.0  ;;  %v402_v34 = vmul.f32 0.2, %v5323_v30  ;;  %5349 = vmatmul.mubr.bf16.gmra.mxu1 %v424_v29  ;;  %v415_v40 = vsel %vm383_vm13, %v356_v25, %v399_v31  ;;  %v5837_v25 = vld [vmem:[%s7875_s1 + $0x160] sm:$0xff]  }
 0x10a   : > { %v359_v37 = vpop.f32.mrf.mxu0  ;;  %5397 = vmatpush3.bf16.msra.mxu1 %v5838_v53 }
 0x10b   : > { %vm384_vm15 = vcmp.ge.f32.partialorder %v359_v37, 0.0  ;;  %v400_v38 = vmul.f32 0.2, %v359_v37  ;;  %v418_v39 = vsel %vm386_vm12, %v5323_v30, %v402_v34 }
 0x10c   : > { %v426_v44 = vpack.c.bf16 %v418_v39, %v417_v42 }
 0x10d   : > { %v416_v41 = vsel %vm384_vm15, %v359_v37, %v400_v38  ;;  %v5839_v37 = vld [vmem:[%s7875_s1 + $0x158] sm:$0xff]  }
 0x10e   : > { %v425_v43 = vpack.c.bf16 %v416_v41, %v415_v40 }
 0x110   : > { %5352 = vmatprep.mubr.bf16.mxu1 %v425_v43 }
 0x111   : > { %5353 = vmatmul.mubr.bf16.gmra.mxu1 %v426_v44 }
 0x1b9   : > { %v5342_v54 = vpop.f32.mrf.mxu1 }
 0x1ba   : > { %v607_v59 = vmul.f32 0.2, %v5342_v54  ;;  %vm591_vm2 = vcmp.ge.f32.partialorder %v5342_v54, 0.0 }
 0x1bb   : > { %v526_v55 = vpop.f32.mrf.mxu1 }
 0x1bc   : > { %v605_v57 = vmul.f32 0.2, %v526_v55  ;;  %vm589_vm1 = vcmp.ge.f32.partialorder %v526_v55, 0.0  ;;  %v623_v2 = vsel %vm591_vm2, %v5342_v54, %v607_v59  ;;  %v5841_v59 = vld [vmem:[%s7875_s1 + $0x150] sm:$0xff]  }
 0x1bd   : > { %v5343_v56 = vpop.f32.mrf.mxu1 }
 0x1be   : > { %vm592_vm0 = vcmp.ge.f32.partialorder %v5343_v56, 0.0  ;;  %v608_v58 = vmul.f32 0.2, %v5343_v56  ;;  %v621_v0 = vsel %vm589_vm1, %v526_v55, %v605_v57 }
 0x1bf   : > { %v529_v60 = vpop.f32.mrf.mxu1 }
 0x1c0   : > { %vm590_vm3 = vcmp.ge.f32.partialorder %v529_v60, 0.0  ;;  %v606_v61 = vmul.f32 0.2, %v529_v60  ;;  %v624_v62 = vsel %vm592_vm0, %v5343_v56, %v608_v58  ;;  %v5840_v58 = vld [vmem:[%s7875_s1 + $0xd0] sm:$0xff]  }
 0x1c1   : > { %v5346_v63 = vpop.f32.mrf.mxu1  ;;  %v638_v5 = vpack.c.bf16 %v624_v62, %v623_v2  ;;  %5398 = vmatprep.subr.bf16.mxu1 %v5840_v58  ;;  %v5844_v62 = vld [vmem:[%s7875_s1 + $0xc0] sm:$0xff]  }
 0x1c2   : > { %v622_v1 = vsel %vm590_vm3, %v529_v60, %v606_v61  ;;  %v611_v11 = vmul.f32 0.2, %v5346_v63  ;;  %vm595_vm6 = vcmp.ge.f32.partialorder %v5346_v63, 0.0  ;;  %5399 = vmatpush3.bf16.msra.mxu1 %v5840_v58  ;;  %v5842_v60 = vld [vmem:[%s7875_s1 + $0xc8] sm:$0xff]  }
 0x1c3   : > { %v542_v3 = vpop.f32.mrf.mxu1  ;;  %v637_v4 = vpack.c.bf16 %v622_v1, %v621_v0  ;;  %v5843_v61 = vld [vmem:[%s7875_s1 + $0x148] sm:$0xff]   ;;  %5400 = vmatprep.subr.bf16.mxu1 %v5842_v60  ;;  %v5846_v0 = vld [vmem:[%s7875_s1 + $0x138] sm:$0xff]  }
 0x1c4   : > { %v609_v9 = vmul.f32 0.2, %v542_v3  ;;  %vm593_vm5 = vcmp.ge.f32.partialorder %v542_v3, 0.0  ;;  %v627_v19 = vsel %vm595_vm6, %v5346_v63, %v611_v11  ;;  %v5845_v63 = vld [vmem:[%s7875_s1 + $0x140] sm:$0xff]  }
 0x1c5   : > { %v5347_v8 = vpop.f32.mrf.mxu1  ;;  %5372 = vmatprep.mubr.bf16.mxu0 %v637_v4 }
 0x1c6   : > { %vm596_vm4 = vcmp.ge.f32.partialorder %v5347_v8, 0.0  ;;  %v612_v10 = vmul.f32 0.2, %v5347_v8  ;;  %5373 = vmatmul.mubr.bf16.vlgmr.msra.gmra.mxu0 %v638_v5  ;;  %v625_v17 = vsel %vm593_vm5, %v542_v3, %v609_v9  ;;  %5401 = vmatpush3.bf16.msra.mxu1 %v5842_v60 }
 0x1c7   : > { %v545_v12 = vpop.f32.mrf.mxu1  ;;  %5421 = vmatpush3.bf16.msra.mxu0 %v5831_v49  ;;  %5402 = vmatprep.subr.bf16.mxu1 %v5844_v62 }
 0x1c8   : > { %vm594_vm7 = vcmp.ge.f32.partialorder %v545_v12, 0.0  ;;  %v610_v13 = vmul.f32 0.2, %v545_v12  ;;  %5422 = vmatprep.subr.bf16.mxu0 %v5833_v7  ;;  %v628_v15 = vsel %vm596_vm4, %v5347_v8, %v612_v10 }
 0x1c9   : > { %v5350_v16 = vpop.f32.mrf.mxu1  ;;  %v640_v24 = vpack.c.bf16 %v628_v15, %v627_v19 }
 0x1ca   : > { %v626_v18 = vsel %vm594_vm7, %v545_v12, %v610_v13  ;;  %v615_v31 = vmul.f32 0.2, %v5350_v16  ;;  %vm599_vm10 = vcmp.ge.f32.partialorder %v5350_v16, 0.0  ;;  %5403 = vmatpush3.bf16.msra.mxu1 %v5844_v62 }
 0x1cb   : > { %v558_v22 = vpop.f32.mrf.mxu1  ;;  %v639_v23 = vpack.c.bf16 %v626_v18, %v625_v17  ;;  %5423 = vmatpush3.bf16.msra.mxu0 %v5833_v7  ;;  %5452 = vmatprep.subr.bf16.mxu1 %v5846_v0  ;;  %v5847_v18 = vld [vmem:[%s7875_s1 + $0x130] sm:$0xff]  }
 0x1cc   : > { %5424 = vmatprep.subr.bf16.mxu0 %v5835_v14  ;;  %v613_v29 = vmul.f32 0.2, %v558_v22  ;;  %vm597_vm9 = vcmp.ge.f32.partialorder %v558_v22, 0.0  ;;  %v631_v42 = vsel %vm599_vm10, %v5350_v16, %v615_v31 }
 0x1cd   : > { %v5351_v28 = vpop.f32.mrf.mxu1  ;;  %5376 = vmatprep.mubr.bf16.mxu0 %v639_v23 }
 0x1ce   : > { %vm600_vm8 = vcmp.ge.f32.partialorder %v5351_v28, 0.0  ;;  %v616_v30 = vmul.f32 0.2, %v5351_v28  ;;  %5377 = vmatmul.mubr.bf16.gmra.mxu0 %v640_v24  ;;  %v629_v40 = vsel %vm597_vm9, %v558_v22, %v613_v29  ;;  %v5848_v29 = vld [vmem:[%s7875_s1 + $0x128] sm:$0xff]  }
 0x1cf   : > { %v561_v34 = vpop.f32.mrf.mxu1  ;;  %5425 = vmatpush3.bf16.msra.mxu0 %v5835_v14 }
 0x1d0   : > { %vm598_vm11 = vcmp.ge.f32.partialorder %v561_v34, 0.0  ;;  %v614_v35 = vmul.f32 0.2, %v561_v34  ;;  %5426 = vmatprep.subr.bf16.mxu0 %v5837_v25  ;;  %v632_v38 = vsel %vm600_vm8, %v5351_v28, %v616_v30 }
 0x1d1   : > { %v5354_v39 = vpop.f32.mrf.mxu1  ;;  %v642_v45 = vpack.c.bf16 %v632_v38, %v631_v42 }
 0x1d2   : > { %v630_v41 = vsel %vm598_vm11, %v561_v34, %v614_v35  ;;  %v619_v49 = vmul.f32 0.2, %v5354_v39  ;;  %vm603_vm14 = vcmp.ge.f32.partialorder %v5354_v39, 0.0 }
 0x1d3   : > { %v574_v43 = vpop.f32.mrf.mxu1  ;;  %v641_v44 = vpack.c.bf16 %v630_v41, %v629_v40  ;;  %5427 = vmatpush3.bf16.msra.mxu0 %v5837_v25  ;;  %v5849_v41 = vld [vmem:[%s7875_s1 + $0x120] sm:$0xff]  }
 0x1d4   : > { %5428 = vmatprep.subr.bf16.mxu0 %v5839_v37  ;;  %v617_v47 = vmul.f32 0.2, %v574_v43  ;;  %vm601_vm13 = vcmp.ge.f32.partialorder %v574_v43, 0.0  ;;  %v635_v55 = vsel %vm603_vm14, %v5354_v39, %v619_v49 }
 0x1d5   : > { %v5355_v46 = vpop.f32.mrf.mxu1  ;;  %5380 = vmatprep.mubr.bf16.mxu0 %v641_v44 }
 0x1d6   : > { %vm604_vm12 = vcmp.ge.f32.partialorder %v5355_v46, 0.0  ;;  %v620_v48 = vmul.f32 0.2, %v5355_v46  ;;  %5381 = vmatmul.mubr.bf16.gmra.mxu0 %v642_v45  ;;  %v633_v53 = vsel %vm601_vm13, %v574_v43, %v617_v47 }
 0x1d7   : > { %v577_v50 = vpop.f32.mrf.mxu1  ;;  %5429 = vmatpush3.bf16.msra.mxu0 %v5839_v37 }
 0x1d8   : > { %vm602_vm15 = vcmp.ge.f32.partialorder %v577_v50, 0.0  ;;  %v618_v51 = vmul.f32 0.2, %v577_v50  ;;  %v636_v52 = vsel %vm604_vm12, %v5355_v46, %v620_v48  ;;  %5430 = vmatprep.subr.bf16.mxu0 %v5841_v59  ;;  %v5850_v48 = vld [vmem:[%s7875_s1 + $0x118] sm:$0xff]  }
 0x1d9   : > { %v644_v57 = vpack.c.bf16 %v636_v52, %v635_v55 }
 0x1da   : > { %v634_v54 = vsel %vm602_vm15, %v577_v50, %v618_v51 }
 0x1db   : > { %v643_v56 = vpack.c.bf16 %v634_v54, %v633_v53  ;;  %5431 = vmatpush3.bf16.msra.mxu0 %v5841_v59 }
 0x1dc   : > { %5432 = vmatprep.subr.bf16.mxu0 %v5843_v61 }
 0x1dd   : > { %5384 = vmatprep.mubr.bf16.mxu0 %v643_v56 }
 0x1de   : > { %5385 = vmatmul.mubr.bf16.gmra.mxu0 %v644_v57  ;;  %v5851_v57 = vld [vmem:[%s7875_s1 + $0x110] sm:$0xff]  }
 0x1df   : > { %5433 = vmatpush3.bf16.msra.mxu0 %v5843_v61 }
 0x1e0   : > { %5434 = vmatprep.subr.bf16.mxu0 %v5845_v63 }
 0x1e3   : > { %5435 = vmatpush3.bf16.msra.mxu0 %v5845_v63 }
 0x286   : > { %v5374_v1 = vpop.f32.mrf.mxu0 }
 0x287   : > { %v825_v7 = vmul.f32 0.2, %v5374_v1  ;;  %vm809_vm2 = vcmp.ge.f32.partialorder %v5374_v1, 0.0 }
 0x288   : > { %v744_v2 = vpop.f32.mrf.mxu0 }
 0x289   : > { %v823_v4 = vmul.f32 0.2, %v744_v2  ;;  %vm807_vm1 = vcmp.ge.f32.partialorder %v744_v2, 0.0  ;;  %v841_v14 = vsel %vm809_vm2, %v5374_v1, %v825_v7 }
 0x28a   : > { %v5375_v3 = vpop.f32.mrf.mxu0 }
 0x28b   : > { %vm810_vm0 = vcmp.ge.f32.partialorder %v5375_v3, 0.0  ;;  %v826_v5 = vmul.f32 0.2, %v5375_v3  ;;  %v839_v12 = vsel %vm807_vm1, %v744_v2, %v823_v4 }
 0x28c   : > { %v747_v8 = vpop.f32.mrf.mxu0 }
 0x28d   : > { %vm808_vm3 = vcmp.ge.f32.partialorder %v747_v8, 0.0  ;;  %v824_v9 = vmul.f32 0.2, %v747_v8  ;;  %v842_v10 = vsel %vm810_vm0, %v5375_v3, %v826_v5 }
 0x28e   : > { %v5378_v11 = vpop.f32.mrf.mxu0  ;;  %v6497_v17 = vpack.c.bf16 %v842_v10, %v841_v14 }
 0x28f   : > { %v840_v13 = vsel %vm808_vm3, %v747_v8, %v824_v9  ;;  %v829_v24 = vmul.f32 0.2, %v5378_v11  ;;  %vm813_vm6 = vcmp.ge.f32.partialorder %v5378_v11, 0.0  ;;  %v5853_v8 = vld [vmem:[%s7875_s1 + $0x100] sm:$0xff]  }
 0x290   : > { %v760_v15 = vpop.f32.mrf.mxu0  ;;  %v6495_v16 = vpack.c.bf16 %v840_v13, %v839_v12 }
 0x291   : > { %v827_v22 = vmul.f32 0.2, %v760_v15  ;;  %vm811_vm5 = vcmp.ge.f32.partialorder %v760_v15, 0.0  ;;  %v845_v37 = vsel %vm813_vm6, %v5378_v11, %v829_v24 }
 0x292   : > { %v5379_v19 = vpop.f32.mrf.mxu0  ;;  %5404 = vmatprep.mubr.bf16.mxu1 %v6495_v16  ;;  %5436 = vmatprep.mubr.bf16.mxu0 %v6495_v16 }
 0x293   : > { %vm814_vm4 = vcmp.ge.f32.partialorder %v5379_v19, 0.0  ;;  %v830_v23 = vmul.f32 0.2, %v5379_v19  ;;  %5405 = vmatmul.mubr.bf16.vlgmr.msra.gmra.mxu1 %v6497_v17  ;;  %5437 = vmatmul.mubr.bf16.vlgmr.msra.gmra.mxu0 %v6497_v17  ;;  %v843_v34 = vsel %vm811_vm5, %v760_v15, %v827_v22 }
 0x294   : > { %5453 = vmatpush3.bf16.msra.mxu1 %v5846_v0  ;;  %v763_v25 = vpop.f32.mrf.mxu0  ;;  %v5852_v0 = vld [vmem:[%s7875_s1 + $0x108] sm:$0xff]  }
 0x295   : > { %vm812_vm7 = vcmp.ge.f32.partialorder %v763_v25, 0.0  ;;  %v828_v28 = vmul.f32 0.2, %v763_v25  ;;  %5454 = vmatprep.subr.bf16.mxu1 %v5847_v18  ;;  %v846_v30 = vsel %vm814_vm4, %v5379_v19, %v830_v23 }
 0x296   : > { %v5382_v31 = vpop.f32.mrf.mxu0  ;;  %v6511_v40 = vpack.c.bf16 %v846_v30, %v845_v37 }
 0x297   : > { %v844_v35 = vsel %vm812_vm7, %v763_v25, %v828_v28  ;;  %v833_v45 = vmul.f32 0.2, %v5382_v31  ;;  %vm817_vm10 = vcmp.ge.f32.partialorder %v5382_v31, 0.0 }
 0x298   : > { %5455 = vmatpush3.bf16.msra.mxu1 %v5847_v18  ;;  %v776_v38 = vpop.f32.mrf.mxu0  ;;  %v6509_v39 = vpack.c.bf16 %v844_v35, %v843_v34 }
 0x299   : > { %5456 = vmatprep.subr.bf16.mxu1 %v5848_v29  ;;  %v831_v43 = vmul.f32 0.2, %v776_v38  ;;  %vm815_vm9 = vcmp.ge.f32.partialorder %v776_v38, 0.0  ;;  %v849_v53 = vsel %vm817_vm10, %v5382_v31, %v833_v45 }
 0x29a   : > { %v5383_v42 = vpop.f32.mrf.mxu0  ;;  %5408 = vmatprep.mubr.bf16.mxu1 %v6509_v39  ;;  %5440 = vmatprep.mubr.bf16.mxu0 %v6509_v39 }
 0x29b   : > { %vm818_vm8 = vcmp.ge.f32.partialorder %v5383_v42, 0.0  ;;  %v834_v44 = vmul.f32 0.2, %v5383_v42  ;;  %5409 = vmatmul.mubr.bf16.gmra.mxu1 %v6511_v40  ;;  %5441 = vmatmul.mubr.bf16.gmra.mxu0 %v6511_v40  ;;  %v847_v51 = vsel %vm815_vm9, %v776_v38, %v831_v43 }
 0x29c   : > { %5457 = vmatpush3.bf16.msra.mxu1 %v5848_v29  ;;  %v779_v46 = vpop.f32.mrf.mxu0 }
 0x29d   : > { %vm816_vm11 = vcmp.ge.f32.partialorder %v779_v46, 0.0  ;;  %v832_v47 = vmul.f32 0.2, %v779_v46  ;;  %5458 = vmatprep.subr.bf16.mxu1 %v5849_v41  ;;  %v850_v49 = vsel %vm818_vm8, %v5383_v42, %v834_v44 }
 0x29e   : > { %v5386_v50 = vpop.f32.mrf.mxu0  ;;  %v6525_v56 = vpack.c.bf16 %v850_v49, %v849_v53 }
 0x29f   : > { %v848_v52 = vsel %vm816_vm11, %v779_v46, %v832_v47  ;;  %v837_v61 = vmul.f32 0.2, %v5386_v50  ;;  %vm821_vm14 = vcmp.ge.f32.partialorder %v5386_v50, 0.0 }
 0x2a0   : > { %5459 = vmatpush3.bf16.msra.mxu1 %v5849_v41  ;;  %v792_v54 = vpop.f32.mrf.mxu0  ;;  %v6523_v55 = vpack.c.bf16 %v848_v52, %v847_v51 }
 0x2a1   : > { %5460 = vmatprep.subr.bf16.mxu1 %v5850_v48  ;;  %v835_v59 = vmul.f32 0.2, %v792_v54  ;;  %vm819_vm13 = vcmp.ge.f32.partialorder %v792_v54, 0.0  ;;  %v853_v4 = vsel %vm821_vm14, %v5386_v50, %v837_v61 }
 0x2a2   : > { %v5387_v58 = vpop.f32.mrf.mxu0  ;;  %5412 = vmatprep.mubr.bf16.mxu1 %v6523_v55  ;;  %5444 = vmatprep.mubr.bf16.mxu0 %v6523_v55 }
 0x2a3   : > { %vm822_vm12 = vcmp.ge.f32.partialorder %v5387_v58, 0.0  ;;  %v838_v60 = vmul.f32 0.2, %v5387_v58  ;;  %5413 = vmatmul.mubr.bf16.gmra.mxu1 %v6525_v56  ;;  %5445 = vmatmul.mubr.bf16.gmra.mxu0 %v6525_v56  ;;  %v851_v2 = vsel %vm819_vm13, %v792_v54, %v835_v59 }
 0x2a4   : > { %5461 = vmatpush3.bf16.msra.mxu1 %v5850_v48  ;;  %v795_v62 = vpop.f32.mrf.mxu0 }
 0x2a5   : > { %vm820_vm15 = vcmp.ge.f32.partialorder %v795_v62, 0.0  ;;  %v836_v63 = vmul.f32 0.2, %v795_v62  ;;  %5462 = vmatprep.subr.bf16.mxu1 %v5851_v57  ;;  %v854_v1 = vsel %vm822_vm12, %v5387_v58, %v838_v60 }
 0x2a6   : > { %v6539_v7 = vpack.c.bf16 %v854_v1, %v853_v4 }
 0x2a7   : > { %v852_v3 = vsel %vm820_vm15, %v795_v62, %v836_v63 }
 0x2a8   : > { %5463 = vmatpush3.bf16.msra.mxu1 %v5851_v57  ;;  %v6537_v5 = vpack.c.bf16 %v852_v3, %v851_v2 }
 0x2a9   : > { %5464 = vmatprep.subr.bf16.mxu1 %v5852_v0 }
 0x2aa   : > { %5416 = vmatprep.mubr.bf16.mxu1 %v6537_v5  ;;  %5448 = vmatprep.mubr.bf16.mxu0 %v6537_v5 }
 0x2ab   : > { %5417 = vmatmul.mubr.bf16.gmra.mxu1 %v6539_v7  ;;  %5449 = vmatmul.mubr.bf16.gmra.mxu0 %v6539_v7 }
 0x2ac   : > { %5465 = vmatpush3.bf16.msra.mxu1 %v5852_v0  ;;  %5468 = vmatprep.mubr.bf16.mxu1 %v6346_v6  ;;  %v5854_v6 = vld [vmem:[%s7875_s1 + $0x1b8] sm:$0xff]  }
 0x2ad   : > { %5466 = vmatprep.subr.bf16.mxu1 %v5853_v8  ;;  %5484 = vmatprep.subr.bf16.mxu0 %v5854_v6 }
 0x2ae   : > { %5485 = vmatpush3.bf16.msra.mxu0 %v5854_v6 }
 0x2b0   : > { %5467 = vmatpush3.bf16.msra.mxu1 %v5853_v8 }
 0x2b3   : > { %5469 = vmatmul.mubr.bf16.vlgmr.msra.gmra.mxu1 %v6380_v20  ;;  %v5855_v20 = vld [vmem:[%s7875_s1 + $0x1b0] sm:$0xff]  }
 0x2b4   : > { %5472 = vmatprep.mubr.bf16.mxu1 %v6382_v21  ;;  %5486 = vmatprep.subr.bf16.mxu0 %v5855_v20  ;;  %v5856_v21 = vld [vmem:[%s7875_s1 + $0x1a8] sm:$0xff]  }
 0x2b5   : > { %5487 = vmatpush3.bf16.msra.mxu0 %v5855_v20 }
 0x2b6   : > { %5488 = vmatprep.subr.bf16.mxu0 %v5856_v21 }
 0x2b9   : > { %5489 = vmatpush3.bf16.msra.mxu0 %v5856_v21 }
 0x2bb   : > { %5473 = vmatmul.mubr.bf16.gmra.mxu1 %v6390_v26  ;;  %v5857_v26 = vld [vmem:[%s7875_s1 + $0x1a0] sm:$0xff]  }
 0x2bc   : > { %5476 = vmatprep.mubr.bf16.mxu1 %v6392_v27  ;;  %5490 = vmatprep.subr.bf16.mxu0 %v5857_v26  ;;  %v5858_v27 = vld [vmem:[%s7875_s1 + $0x198] sm:$0xff]  }
 0x2bd   : > { %5491 = vmatpush3.bf16.msra.mxu0 %v5857_v26 }
 0x2be   : > { %5492 = vmatprep.subr.bf16.mxu0 %v5858_v27 }
 0x2c1   : > { %5493 = vmatpush3.bf16.msra.mxu0 %v5858_v27 }
 0x2c3   : > { %5477 = vmatmul.mubr.bf16.gmra.mxu1 %v6400_v32  ;;  %v5859_v32 = vld [vmem:[%s7875_s1 + $0x190] sm:$0xff]  }
 0x2c4   : > { %5480 = vmatprep.mubr.bf16.mxu1 %v6402_v33  ;;  %5494 = vmatprep.subr.bf16.mxu0 %v5859_v32  ;;  %v5860_v33 = vld [vmem:[%s7875_s1 + $0x188] sm:$0xff]  }
 0x2c5   : > { %5495 = vmatpush3.bf16.msra.mxu0 %v5859_v32 }
 0x2c6   : > { %5496 = vmatprep.subr.bf16.mxu0 %v5860_v33 }
 0x2c9   : > { %5497 = vmatpush3.bf16.msra.mxu0 %v5860_v33 }
 0x2cb   : > { %5481 = vmatmul.mubr.bf16.gmra.mxu1 %v6408_v36  ;;  %v5861_v36 = vld [vmem:[%s7875_s1 + $0x180] sm:$0xff]  }
 0x2cc   : > { %5498 = vmatprep.subr.bf16.mxu0 %v5861_v36 }
 0x2cd   : > { %5499 = vmatpush3.bf16.msra.mxu0 %v5861_v36  ;;  %v5862_v36 = vld [vmem:[%s7875_s1 + $0x1f8] sm:$0xff]  }
 0x2ce   : > { %5516 = vmatprep.subr.bf16.mxu1 %v5862_v36 }
 0x2cf   : > { %5517 = vmatpush3.bf16.msra.mxu1 %v5862_v36 }
 0x353   : > { %v6580_v9 = vpop.f32.mrf.mxu1  ;;  %v6583_v11 = vpop.f32.mrf.mxu0 }
 0x354   : > { %v4194_v10 = vmul.f32 1.442695, %v6580_v9 }
 0x355   : > { %v6585_v12 = vpop.f32.mrf.mxu1  ;;  %v1141_v18 = vpop.f32.mrf.mxu0 }
 0x356   : > { %5926 = vpow2.f32 %v4194_v10  ;;  %v4190_v13 = vmul.f32 1.442695, %v6585_v12  ;;  %v5863_v10 = vld [vmem:[%s7875_s1 + $0x1f0] sm:$0xff]  }
 0x357   : > { %v6588_v14 = vpop.f32.mrf.mxu1  ;;  %v5439_v25 = vpop.f32.mrf.mxu0  ;;  %5518 = vmatprep.subr.bf16.mxu1 %v5863_v10 }
 0x358   : > { %7975 = vst [vmem:[#allocation2_spill] sm:$0xff] %v6588_v14  ;;  %v4196_v15 = vmul.f32 1.442695, %v6588_v14  ;;  %5928 = vpow2.f32 %v4190_v13  ;;  %5519 = vmatpush3.bf16.msra.mxu1 %v5863_v10 }
 0x359   : > { %v6591_v19 = vpop.f32.mrf.mxu1  ;;  %v1144_v31 = vpop.f32.mrf.mxu0 }
 0x35a   : > { %7976 = vst [vmem:[#allocation3_spill] sm:$0xff] %v6591_v19  ;;  %5930 = vpow2.f32 %v4196_v15  ;;  %v4192_v22 = vmul.f32 1.442695, %v6591_v19 }
 0x35b   : > { %v6594_v23 = vpop.f32.mrf.mxu1  ;;  %v6607_v43 = vpop.f32.mrf.mxu0 }
 0x35c   : > { %7977 = vst [vmem:[#allocation4_spill] sm:$0xff] %v6594_v23  ;;  %5932 = vpow2.f32 %v4192_v22  ;;  %v4202_v24 = vmul.f32 1.442695, %v6594_v23 }
 0x35d   : > { %v6597_v28 = vpop.f32.mrf.mxu1  ;;  %v1157_v51 = vpop.f32.mrf.mxu0 }
 0x35e   : > { %7978 = vst [vmem:[#allocation5_spill] sm:$0xff] %v6597_v28  ;;  %5934 = vpow2.f32 %v4202_v24  ;;  %v4198_v29 = vmul.f32 1.442695, %v6597_v28 }
 0x35f   : > { %v6600_v30 = vpop.f32.mrf.mxu1  ;;  %v5443_v59 = vpop.f32.mrf.mxu0 }
 0x360   : > { %7979 = vst [vmem:[#allocation6_spill] sm:$0xff] %v6600_v30  ;;  %5936 = vpow2.f32 %v4198_v29  ;;  %v4204_v35 = vmul.f32 1.442695, %v6600_v30 }
 0x361   : > { %v6602_v34 = vpop.f32.mrf.mxu1  ;;  %v1160_v1 = vpop.f32.mrf.mxu0 }
 0x362   : > { %7980 = vst [vmem:[#allocation7_spill] sm:$0xff] %v6602_v34  ;;  %v4200_v44 = vmul.f32 1.442695, %v6602_v34  ;;  %5938 = vpow2.f32 %v4204_v35 }
 0x363   : > { %v5927_v37 = vpop.eup %5926  ;;  %v6605_v38 = vpop.f32.mrf.mxu1 }
 0x364   : > { %7981 = vst [vmem:[#allocation8_spill] sm:$0xff] %v6605_v38  ;;  %v4224_v41 = vadd.f32 1e-08, %v5927_v37  ;;  %5940 = vpow2.f32 %v4200_v44  ;;  %v6632_v6 = vpop.f32.mrf.mxu0 }
 0x365   : > { %v5929_v42 = vpop.eup %5928  ;;  %v6610_v45 = vpop.f32.mrf.mxu1 }
 0x366   : > { %7982 = vst [vmem:[#allocation9_spill] sm:$0xff] %v6610_v45  ;;  %4258 = vrot.lane.b32.xlu1 %v4224_v41, %s6287_s19  ;;  %v4222_v46 = vadd.f32 1e-08, %v5929_v42  ;;  %v4206_v53 = vmul.f32 1.442695, %v6610_v45  ;;  %v1173_v15 = vpop.f32.mrf.mxu0 }
 0x367   : > { %v5931_v47 = vpop.eup %5930  ;;  %v6613_v48 = vpop.f32.mrf.mxu1 }
 0x368   : > { %7983 = vst [vmem:[#allocation10_spill] sm:$0xff] %v6613_v48  ;;  %4254 = vrot.lane.b32.xlu0 %v4222_v46, %s6287_s19  ;;  %v4225_v49 = vadd.f32 1e-08, %v5931_v47  ;;  %5942 = vpow2.f32 %v4206_v53  ;;  %v5447_v44 = vpop.f32.mrf.mxu0 }
 0x369   : > { %v5933_v50 = vpop.eup %5932  ;;  %v6616_v52 = vpop.f32.mrf.mxu1 }
 0x36a   : > { %7984 = vst [vmem:[#allocation11_spill] sm:$0xff] %v6616_v52  ;;  %4260 = vrot.lane.b32.xlu1 %v4225_v49, %s6287_s19  ;;  %v4223_v54 = vadd.f32 1e-08, %v5933_v50  ;;  %v4208_v60 = vmul.f32 1.442695, %v6616_v52 }
 0x36b   : > { %v5935_v57 = vpop.eup %5934  ;;  %v6620_v58 = vpop.f32.mrf.mxu1 }
 0x36c   : > { %7985 = vst [vmem:[#allocation12_spill] sm:$0xff] %v6620_v58  ;;  %4256 = vrot.lane.b32.xlu0 %v4223_v54, %s6287_s19  ;;  %v4228_v62 = vadd.f32 1e-08, %v5935_v57  ;;  %5944 = vpow2.f32 %v4208_v60 }
 0x36d   : > { %v6624_v61 = vpop.f32.mrf.mxu1  ;;  %v5937_v63 = vpop.eup %5936 }
 0x36e   : > { %7986 = vst [vmem:[#allocation13_spill] sm:$0xff] %v6624_v61  ;;  %v4226_v3 = vadd.f32 1e-08, %v5937_v63 }
 0x36f   : > { %v6626_v0 = vpop.f32.mrf.mxu1  ;;  %v5939_v4 = vpop.eup %5938 }
 0x370   : > { %7987 = vst [vmem:[#allocation14_spill] sm:$0xff] %v6626_v0  ;;  %4266 = vrot.lane.b32.xlu0 %v4228_v62, %s6287_s19  ;;  %v4229_v27 = vadd.f32 1e-08, %v5939_v4 }
 0x371   : > { %v6629_v2 = vpop.f32.mrf.mxu1  ;;  %v5941_v21 = vpop.eup %5940 }
 0x372   : > { %7988 = vst [vmem:[#allocation15_spill] sm:$0xff] %v6629_v2  ;;  %v4227_v24 = vadd.f32 1e-08, %v5941_v21 }
 0x373   : > { %v5470_v8 = vpop.f32.mrf.mxu1 }
 0x374   : > { %4262 = vrot.lane.b32.xlu0 %v4226_v3, %s6287_s19  ;;  %v1295_v32 = vadd.f32 %v5470_v8, %v6583_v11  ;;  %v5865_v3 = vld [vmem:[%s7875_s1 + $0x1e0] sm:$0xff]  }
 0x375   : > { %v1286_v20 = vpop.f32.mrf.mxu1  ;;  %v5943_v35 = vpop.eup %5942 }
 0x376   : > { %v1287_v26 = vadd.f32 %v1286_v20, %v1141_v18  ;;  %v1367_v37 = vmul.f32 0.2, %v1295_v32  ;;  %vm1351_vm2 = vcmp.ge.f32.partialorder %v1295_v32, 0.0  ;;  %v4230_v50 = vadd.f32 1e-08, %v5943_v35  ;;  %v1176_v20 = vpop.f32.mrf.mxu0 }
 0x377   : > { %v5471_v33 = vpop.f32.mrf.mxu1 }
 0x378   : > { %v1298_v13 = vadd.f32 %v5471_v33, %v5439_v25  ;;  %4268 = vrot.lane.b32.xlu0 %v4229_v27, %s6287_s19  ;;  %v1365_v18 = vmul.f32 0.2, %v1287_v26  ;;  %vm1349_vm1 = vcmp.ge.f32.partialorder %v1287_v26, 0.0  ;;  %v5864_v25 = vld [vmem:[%s7875_s1 + $0x1e8] sm:$0xff]   ;;  %v1383_v57 = vsel %vm1351_vm2, %v1295_v32, %v1367_v37  ;;  %v5450_v10 = vpop.f32.mrf.mxu0 }
 0x379   : > { %v1289_v22 = vpop.f32.mrf.mxu1  ;;  %v5945_v49 = vpop.eup %5944  ;;  %5520 = vmatprep.subr.bf16.mxu1 %v5864_v25 }
 0x37a   : > { %vm1352_vm0 = vcmp.ge.f32.partialorder %v1298_v13, 0.0  ;;  %v1368_v29 = vmul.f32 0.2, %v1298_v13  ;;  %v1290_v11 = vadd.f32 %v1289_v22, %v1144_v31  ;;  %v1381_v53 = vsel %vm1349_vm1, %v1287_v26, %v1365_v18  ;;  %5521 = vmatpush3.bf16.msra.mxu1 %v5864_v25 }
 0x37b   : > { %v5474_v41 = vpop.f32.mrf.mxu1  ;;  %v4231_v21 = vadd.f32 1e-08, %v5945_v49  ;;  %5522 = vmatprep.subr.bf16.mxu1 %v5865_v3 }
 0x37c   : > { %vm1350_vm3 = vcmp.ge.f32.partialorder %v1290_v11, 0.0  ;;  %v1366_v42 = vmul.f32 0.2, %v1290_v11  ;;  %4264 = vrot.lane.b32.xlu0 %v4227_v24, %s6287_s19  ;;  %v1384_v46 = vsel %vm1352_vm0, %v1298_v13, %v1368_v29  ;;  %v1311_v60 = vadd.f32 %v5474_v41, %v6607_v43 }
 0x37d   : > { %v1302_v47 = vpop.f32.mrf.mxu1  ;;  %v1398_v4 = vpack.c.bf16 %v1384_v46, %v1383_v57 }
 0x37e   : > { %v1303_v31 = vadd.f32 %v1302_v47, %v1157_v51  ;;  %v1382_v54 = vsel %vm1350_vm3, %v1290_v11, %v1366_v42  ;;  %v1371_v43 = vmul.f32 0.2, %v1311_v60  ;;  %vm1355_vm6 = vcmp.ge.f32.partialorder %v1311_v60, 0.0  ;;  %5523 = vmatpush3.bf16.msra.mxu1 %v5865_v3  ;;  %v1189_v42 = vpop.f32.mrf.mxu0 }
 0x37f   : > { %v5475_v62 = vpop.f32.mrf.mxu1  ;;  %v1397_v63 = vpack.c.bf16 %v1382_v54, %v1381_v53 }
 0x380   : > { %v1314_v8 = vadd.f32 %v5475_v62, %v5443_v59  ;;  %4270 = vrot.lane.b32.xlu0 %v4230_v50, %s6287_s19  ;;  %v1369_v26 = vmul.f32 0.2, %v1303_v31  ;;  %vm1353_vm5 = vcmp.ge.f32.partialorder %v1303_v31, 0.0  ;;  %v5866_v59 = vld [vmem:[%s7875_s1 + $0x1d8] sm:$0xff]   ;;  %v1387_v37 = vsel %vm1355_vm6, %v1311_v60, %v1371_v43  ;;  %v5451_v53 = vpop.f32.mrf.mxu0 }
 0x381   : > { %v1305_v51 = vpop.f32.mrf.mxu1  ;;  %5500 = vmatprep.mubr.bf16.mxu0 %v1397_v63  ;;  %5524 = vmatprep.subr.bf16.mxu1 %v5866_v59 }
 0x382   : > { %vm1356_vm4 = vcmp.ge.f32.partialorder %v1314_v8, 0.0  ;;  %v1372_v27 = vmul.f32 0.2, %v1314_v8  ;;  %v1306_v32 = vadd.f32 %v1305_v51, %v1160_v1  ;;  %5501 = vmatmul.mubr.bf16.vlgmr.msra.gmra.mxu0 %v1398_v4  ;;  %v1385_v24 = vsel %vm1353_vm5, %v1303_v31, %v1369_v26  ;;  %5525 = vmatpush3.bf16.msra.mxu1 %v5866_v59 }
 0x383   : > { %v5478_v33 = vpop.f32.mrf.mxu1 }
 0x384   : > { %vm1354_vm7 = vcmp.ge.f32.partialorder %v1306_v32, 0.0  ;;  %v1370_v36 = vmul.f32 0.2, %v1306_v32  ;;  %4272 = vrot.lane.b32.xlu0 %v4231_v21, %s6287_s19  ;;  %v1388_v22 = vsel %vm1356_vm4, %v1314_v8, %v1372_v27  ;;  %v1327_v29 = vadd.f32 %v5478_v33, %v6632_v6  ;;  %v1192_v21 = vpop.f32.mrf.mxu0 }
 0x385   : > { %v1318_v13 = vpop.f32.mrf.mxu1  ;;  %v1400_v25 = vpack.c.bf16 %v1388_v22, %v1387_v37  ;;  %v5871_v37 = vld [vmem:[%s7875_s1 + $0x230] sm:$0xff]  }
 0x386   : > { %v1319_v1 = vadd.f32 %v1318_v13, %v1173_v15  ;;  %v1386_v18 = vsel %vm1354_vm7, %v1306_v32, %v1370_v36  ;;  %v1375_v15 = vmul.f32 0.2, %v1327_v29  ;;  %vm1359_vm10 = vcmp.ge.f32.partialorder %v1327_v29, 0.0 }
 0x387   : > { %v5479_v11 = vpop.f32.mrf.mxu1  ;;  %v1399_v35 = vpack.c.bf16 %v1386_v18, %v1385_v24  ;;  %v5867_v18 = vld [vmem:[%s7875_s1 + $0x1d0] sm:$0xff]  }
 0x388   : > { %v1330_v41 = vadd.f32 %v5479_v11, %v5447_v44  ;;  %v1373_v47 = vmul.f32 0.2, %v1319_v1  ;;  %vm1357_vm9 = vcmp.ge.f32.partialorder %v1319_v1, 0.0  ;;  %v1391_v8 = vsel %vm1359_vm10, %v1327_v29, %v1375_v15  ;;  %5526 = vmatprep.subr.bf16.mxu1 %v5867_v18  ;;  %v5868_v29 = vld [vmem:[%s7875_s1 + $0x1c8] sm:$0xff]   ;;  %v5869_v11 = vld [vmem:[%s7875_s1 + $0x1c0] sm:$0xff]  }
 0x389   : > { %v1321_v46 = vpop.f32.mrf.mxu1  ;;  %5504 = vmatprep.mubr.bf16.mxu0 %v1399_v35  ;;  %5527 = vmatpush3.bf16.msra.mxu1 %v5867_v18  ;;  %v5870_v35 = vld [vmem:[%s7875_s1 + $0x238] sm:$0xff]  }
 0x38a   : > { %vm1360_vm8 = vcmp.ge.f32.partialorder %v1330_v41, 0.0  ;;  %v1376_v49 = vmul.f32 0.2, %v1330_v41  ;;  %v1322_v50 = vadd.f32 %v1321_v46, %v1176_v20  ;;  %5505 = vmatmul.mubr.bf16.gmra.mxu0 %v1400_v25  ;;  %v1389_v60 = vsel %vm1357_vm9, %v1319_v1, %v1373_v47  ;;  %5528 = vmatprep.subr.bf16.mxu1 %v5868_v29  ;;  %v5873_v25 = vld [vmem:[%s7875_s1 + $0x220] sm:$0xff]  }
 0x38b   : > { %v5482_v31 = vpop.f32.mrf.mxu1  ;;  %5548 = vmatprep.subr.bf16.mxu0 %v5870_v35 }
 0x38c   : > { %vm1358_vm11 = vcmp.ge.f32.partialorder %v1322_v50, 0.0  ;;  %v1374_v6 = vmul.f32 0.2, %v1322_v50  ;;  %v1392_v57 = vsel %vm1360_vm8, %v1330_v41, %v1376_v49  ;;  %v1343_v63 = vadd.f32 %v5482_v31, %v5450_v10  ;;  %5549 = vmatpush3.bf16.msra.mxu0 %v5870_v35  ;;  %v5872_v41 = vld [vmem:[%s7875_s1 + $0x228] sm:$0xff]  }
 0x38d   : > { %v1334_v54 = vpop.f32.mrf.mxu1  ;;  %v1402_v20 = vpack.c.bf16 %v1392_v57, %v1391_v8  ;;  %5529 = vmatpush3.bf16.msra.mxu1 %v5868_v29  ;;  %5550 = vmatprep.subr.bf16.mxu0 %v5871_v37 }
 0x38e   : > { %v1335_v44 = vadd.f32 %v1334_v54, %v1189_v42  ;;  %v1390_v62 = vsel %vm1358_vm11, %v1322_v50, %v1374_v6  ;;  %v1379_v33 = vmul.f32 0.2, %v1343_v63  ;;  %vm1363_vm14 = vcmp.ge.f32.partialorder %v1343_v63, 0.0  ;;  %5530 = vmatprep.subr.bf16.mxu1 %v5869_v11  ;;  %v5874_v42 = vld [vmem:[%s7875_s1 + $0x218] sm:$0xff]  }
 0x38f   : > { %v5483_v3 = vpop.f32.mrf.mxu1  ;;  %v1401_v4 = vpack.c.bf16 %v1390_v62, %v1389_v60 }
 0x390   : > { %v1346_v51 = vadd.f32 %v5483_v3, %v5451_v53  ;;  %v1377_v27 = vmul.f32 0.2, %v1335_v44  ;;  %vm1361_vm13 = vcmp.ge.f32.partialorder %v1335_v44, 0.0  ;;  %v1395_v1 = vsel %vm1363_vm14, %v1343_v63, %v1379_v33  ;;  %5551 = vmatpush3.bf16.msra.mxu0 %v5871_v37 }
 0x391   : > { %v1337_v26 = vpop.f32.mrf.mxu1  ;;  %5508 = vmatprep.mubr.bf16.mxu0 %v1401_v4  ;;  %5531 = vmatpush3.bf16.msra.mxu1 %v5869_v11 }
 0x392   : > { %vm1364_vm12 = vcmp.ge.f32.partialorder %v1346_v51, 0.0  ;;  %v1380_v32 = vmul.f32 0.2, %v1346_v51  ;;  %v1338_v43 = vadd.f32 %v1337_v26, %v1192_v21  ;;  %5509 = vmatmul.mubr.bf16.gmra.mxu0 %v1402_v20  ;;  %v1393_v10 = vsel %vm1361_vm13, %v1335_v44, %v1377_v27  ;;  %5552 = vmatprep.subr.bf16.mxu0 %v5872_v41 }
 0x394   : > { %vm1362_vm15 = vcmp.ge.f32.partialorder %v1338_v43, 0.0  ;;  %v1378_v59 = vmul.f32 0.2, %v1338_v43  ;;  %v1396_v36 = vsel %vm1364_vm12, %v1346_v51, %v1380_v32  ;;  %5553 = vmatpush3.bf16.msra.mxu0 %v5872_v41 }
 0x395   : > { %v1404_v24 = vpack.c.bf16 %v1396_v36, %v1395_v1  ;;  %5554 = vmatprep.subr.bf16.mxu0 %v5873_v25 }
 0x396   : > { %v1394_v13 = vsel %vm1362_vm15, %v1338_v43, %v1378_v59 }
 0x397   : > { %v1403_v22 = vpack.c.bf16 %v1394_v13, %v1393_v10 }
 0x398   : > { %5555 = vmatpush3.bf16.msra.mxu0 %v5873_v25 }
 0x399   : > { %5512 = vmatprep.mubr.bf16.mxu0 %v1403_v22  ;;  %5556 = vmatprep.subr.bf16.mxu0 %v5874_v42 }
 0x39a   : > { %5513 = vmatmul.mubr.bf16.gmra.mxu0 %v1404_v24 }
 0x39c   : > { %5557 = vmatpush3.bf16.msra.mxu0 %v5874_v42 }
 0x442   : > { %v5502_v46 = vpop.f32.mrf.mxu0 }
 0x443   : > { %v1585_v31 = vmul.f32 0.2, %v5502_v46  ;;  %vm1569_vm2 = vcmp.ge.f32.partialorder %v5502_v46, 0.0 }
 0x444   : > { %v1504_v47 = vpop.f32.mrf.mxu0 }
 0x445   : > { %v1583_v50 = vmul.f32 0.2, %v1504_v47  ;;  %vm1567_vm1 = vcmp.ge.f32.partialorder %v1504_v47, 0.0  ;;  %v1601_v62 = vsel %vm1569_vm2, %v5502_v46, %v1585_v31 }
 0x446   : > { %v5503_v49 = vpop.f32.mrf.mxu0 }
 0x447   : > { %vm1570_vm0 = vcmp.ge.f32.partialorder %v5503_v49, 0.0  ;;  %v1586_v15 = vmul.f32 0.2, %v5503_v49  ;;  %v1599_v44 = vsel %vm1567_vm1, %v1504_v47, %v1583_v50 }
 0x448   : > { %v1507_v6 = vpop.f32.mrf.mxu0 }
 0x449   : > { %vm1568_vm3 = vcmp.ge.f32.partialorder %v1507_v6, 0.0  ;;  %v1584_v53 = vmul.f32 0.2, %v1507_v6  ;;  %v1602_v54 = vsel %vm1570_vm0, %v5503_v49, %v1586_v15 }
 0x44a   : > { %v5506_v57 = vpop.f32.mrf.mxu0  ;;  %v1616_v4 = vpack.c.bf16 %v1602_v54, %v1601_v62 }
 0x44b   : > { %v1600_v60 = vsel %vm1568_vm3, %v1507_v6, %v1584_v53  ;;  %v1589_v21 = vmul.f32 0.2, %v5506_v57  ;;  %vm1573_vm6 = vcmp.ge.f32.partialorder %v5506_v57, 0.0 }
 0x44c   : > { %v1520_v63 = vpop.f32.mrf.mxu0  ;;  %v1615_v3 = vpack.c.bf16 %v1600_v60, %v1599_v44 }
 0x44d   : > { %v1587_v51 = vmul.f32 0.2, %v1520_v63  ;;  %vm1571_vm5 = vcmp.ge.f32.partialorder %v1520_v63, 0.0  ;;  %v1605_v36 = vsel %vm1573_vm6, %v5506_v57, %v1589_v21  ;;  %v5878_v21 = vld [vmem:[%s7875_s1 + $0x278] sm:$0xff]  }
 0x44e   : > { %v5507_v8 = vpop.f32.mrf.mxu0  ;;  %5532 = vmatprep.mubr.bf16.mxu1 %v1615_v3 }
 0x44f   : > { %vm1574_vm4 = vcmp.ge.f32.partialorder %v5507_v8, 0.0  ;;  %v1590_v20 = vmul.f32 0.2, %v5507_v8  ;;  %5533 = vmatmul.mubr.bf16.vlgmr.msra.gmra.mxu1 %v1616_v4  ;;  %v1603_v33 = vsel %vm1571_vm5, %v1520_v63, %v1587_v51  ;;  %v5876_v51 = vld [vmem:[%s7875_s1 + $0x208] sm:$0xff]  }
 0x450   : > { %v1523_v26 = vpop.f32.mrf.mxu0 }
 0x451   : > { %vm1572_vm7 = vcmp.ge.f32.partialorder %v1523_v26, 0.0  ;;  %v1588_v27 = vmul.f32 0.2, %v1523_v26  ;;  %v1606_v32 = vsel %vm1574_vm4, %v5507_v8, %v1590_v20  ;;  %v5875_v8 = vld [vmem:[%s7875_s1 + $0x210] sm:$0xff]   ;;  %v5877_v20 = vld [vmem:[%s7875_s1 + $0x200] sm:$0xff]  }
 0x452   : > { %v5510_v43 = vpop.f32.mrf.mxu0  ;;  %v1618_v22 = vpack.c.bf16 %v1606_v32, %v1605_v36  ;;  %5558 = vmatprep.subr.bf16.mxu0 %v5875_v8 }
 0x453   : > { %v1604_v59 = vsel %vm1572_vm7, %v1523_v26, %v1588_v27  ;;  %v1593_v29 = vmul.f32 0.2, %v5510_v43  ;;  %vm1577_vm10 = vcmp.ge.f32.partialorder %v5510_v43, 0.0  ;;  %5559 = vmatpush3.bf16.msra.mxu0 %v5875_v8  ;;  %v5883_v26 = vld [vmem:[%s7875_s1 + $0x2b8] sm:$0xff]  }
 0x454   : > { %v1536_v10 = vpop.f32.mrf.mxu0  ;;  %v1617_v13 = vpack.c.bf16 %v1604_v59, %v1603_v33  ;;  %5560 = vmatprep.subr.bf16.mxu0 %v5876_v51  ;;  %5580 = vmatprep.subr.bf16.mxu1 %v5883_v26 }
 0x455   : > { %v1591_v24 = vmul.f32 0.2, %v1536_v10  ;;  %vm1575_vm9 = vcmp.ge.f32.partialorder %v1536_v10, 0.0  ;;  %v1609_v46 = vsel %vm1577_vm10, %v5510_v43, %v1593_v29  ;;  %5581 = vmatpush3.bf16.msra.mxu1 %v5883_v26  ;;  %v5882_v26 = vld [vmem:[%s7875_s1 + $0x258] sm:$0xff]  }
 0x456   : > { %v5511_v1 = vpop.f32.mrf.mxu0  ;;  %5536 = vmatprep.mubr.bf16.mxu1 %v1617_v13 }
 0x457   : > { %vm1578_vm8 = vcmp.ge.f32.partialorder %v5511_v1, 0.0  ;;  %v1594_v18 = vmul.f32 0.2, %v5511_v1  ;;  %5537 = vmatmul.mubr.bf16.gmra.mxu1 %v1618_v22  ;;  %v1607_v25 = vsel %vm1575_vm9, %v1536_v10, %v1591_v24  ;;  %5561 = vmatpush3.bf16.msra.mxu0 %v5876_v51 }
 0x458   : > { %v1539_v11 = vpop.f32.mrf.mxu0  ;;  %5562 = vmatprep.subr.bf16.mxu0 %v5877_v20 }
 0x459   : > { %vm1576_vm11 = vcmp.ge.f32.partialorder %v1539_v11, 0.0  ;;  %v1592_v35 = vmul.f32 0.2, %v1539_v11  ;;  %v1610_v37 = vsel %vm1578_vm8, %v5511_v1, %v1594_v18 }
 0x45a   : > { %v5514_v41 = vpop.f32.mrf.mxu0  ;;  %v1620_v50 = vpack.c.bf16 %v1610_v37, %v1609_v46 }
 0x45b   : > { %v1608_v42 = vsel %vm1576_vm11, %v1539_v11, %v1592_v35  ;;  %v1597_v53 = vmul.f32 0.2, %v5514_v41  ;;  %vm1581_vm14 = vcmp.ge.f32.partialorder %v5514_v41, 0.0  ;;  %5563 = vmatpush3.bf16.msra.mxu0 %v5877_v20 }
 0x45c   : > { %v1552_v47 = vpop.f32.mrf.mxu0  ;;  %v1619_v49 = vpack.c.bf16 %v1608_v42, %v1607_v25  ;;  %5612 = vmatprep.subr.bf16.mxu0 %v5878_v21 }
 0x45d   : > { %v1595_v31 = vmul.f32 0.2, %v1552_v47  ;;  %vm1579_vm13 = vcmp.ge.f32.partialorder %v1552_v47, 0.0  ;;  %v1613_v63 = vsel %vm1581_vm14, %v5514_v41, %v1597_v53  ;;  %v5879_v41 = vld [vmem:[%s7875_s1 + $0x270] sm:$0xff]  }
 0x45e   : > { %v5515_v15 = vpop.f32.mrf.mxu0  ;;  %5540 = vmatprep.mubr.bf16.mxu1 %v1619_v49 }
 0x45f   : > { %vm1582_vm12 = vcmp.ge.f32.partialorder %v5515_v15, 0.0  ;;  %v1598_v6 = vmul.f32 0.2, %v5515_v15  ;;  %5541 = vmatmul.mubr.bf16.gmra.mxu1 %v1620_v50  ;;  %v1611_v60 = vsel %vm1579_vm13, %v1552_v47, %v1595_v31 }
 0x460   : > { %v1555_v54 = vpop.f32.mrf.mxu0 }
 0x461   : > { %vm1580_vm15 = vcmp.ge.f32.partialorder %v1555_v54, 0.0  ;;  %v1596_v57 = vmul.f32 0.2, %v1555_v54  ;;  %v1614_v44 = vsel %vm1582_vm12, %v5515_v15, %v1598_v6  ;;  %v5880_v15 = vld [vmem:[%s7875_s1 + $0x268] sm:$0xff]  }
 0x462   : > { %v1622_v4 = vpack.c.bf16 %v1614_v44, %v1613_v63  ;;  %v5881_v63 = vld [vmem:[%s7875_s1 + $0x260] sm:$0xff]  }
 0x463   : > { %v1612_v62 = vsel %vm1580_vm15, %v1555_v54, %v1596_v57 }
 0x464   : > { %v1621_v3 = vpack.c.bf16 %v1612_v62, %v1611_v60 }
 0x466   : > { %5544 = vmatprep.mubr.bf16.mxu1 %v1621_v3 }
 0x467   : > { %5545 = vmatmul.mubr.bf16.gmra.mxu1 %v1622_v4 }
 0x50f   : > { %v5534_v27 = vpop.f32.mrf.mxu1 }
 0x510   : > { %v1803_v36 = vmul.f32 0.2, %v5534_v27  ;;  %vm1787_vm2 = vcmp.ge.f32.partialorder %v5534_v27, 0.0 }
 0x511   : > { %v1722_v32 = vpop.f32.mrf.mxu1 }
 0x512   : > { %v1801_v33 = vmul.f32 0.2, %v1722_v32  ;;  %vm1785_vm1 = vcmp.ge.f32.partialorder %v1722_v32, 0.0  ;;  %v1819_v29 = vsel %vm1787_vm2, %v5534_v27, %v1803_v36 }
 0x513   : > { %v5535_v43 = vpop.f32.mrf.mxu1 }
 0x514   : > { %vm1788_vm0 = vcmp.ge.f32.partialorder %v5535_v43, 0.0  ;;  %v1804_v59 = vmul.f32 0.2, %v5535_v43  ;;  %v1817_v24 = vsel %vm1785_vm1, %v1722_v32, %v1801_v33 }
 0x515   : > { %v1725_v10 = vpop.f32.mrf.mxu1 }
 0x516   : > { %vm1786_vm3 = vcmp.ge.f32.partialorder %v1725_v10, 0.0  ;;  %v1802_v13 = vmul.f32 0.2, %v1725_v10  ;;  %v1820_v22 = vsel %vm1788_vm0, %v5535_v43, %v1804_v59 }
 0x517   : > { %v5538_v1 = vpop.f32.mrf.mxu1  ;;  %v1834_v37 = vpack.c.bf16 %v1820_v22, %v1819_v29  ;;  %v5884_v22 = vld [vmem:[%s7875_s1 + $0x250] sm:$0xff]  }
 0x518   : > { %v1818_v18 = vsel %vm1786_vm3, %v1725_v10, %v1802_v13  ;;  %v1807_v47 = vmul.f32 0.2, %v5538_v1  ;;  %vm1791_vm6 = vcmp.ge.f32.partialorder %v5538_v1, 0.0 }
 0x519   : > { %v1738_v11 = vpop.f32.mrf.mxu1  ;;  %v1833_v35 = vpack.c.bf16 %v1818_v18, %v1817_v24 }
 0x51a   : > { %v1805_v42 = vmul.f32 0.2, %v1738_v11  ;;  %vm1789_vm5 = vcmp.ge.f32.partialorder %v1738_v11, 0.0  ;;  %v1823_v57 = vsel %vm1791_vm6, %v5538_v1, %v1807_v47 }
 0x51b   : > { %v5539_v25 = vpop.f32.mrf.mxu1  ;;  %5564 = vmatprep.mubr.bf16.mxu0 %v1833_v35 }
 0x51c   : > { %vm1792_vm4 = vcmp.ge.f32.partialorder %v5539_v25, 0.0  ;;  %v1808_v46 = vmul.f32 0.2, %v5539_v25  ;;  %5565 = vmatmul.mubr.bf16.vlgmr.msra.gmra.mxu0 %v1834_v37  ;;  %v1821_v53 = vsel %vm1789_vm5, %v1738_v11, %v1805_v42 }
 0x51d   : > { %v1741_v49 = vpop.f32.mrf.mxu1  ;;  %5613 = vmatpush3.bf16.msra.mxu0 %v5878_v21 }
 0x51e   : > { %vm1790_vm7 = vcmp.ge.f32.partialorder %v1741_v49, 0.0  ;;  %v1806_v50 = vmul.f32 0.2, %v1741_v49  ;;  %5614 = vmatprep.subr.bf16.mxu0 %v5879_v41  ;;  %v1824_v31 = vsel %vm1792_vm4, %v5539_v25, %v1808_v46 }
 0x51f   : > { %v5542_v6 = vpop.f32.mrf.mxu1  ;;  %v1836_v62 = vpack.c.bf16 %v1824_v31, %v1823_v57  ;;  %v5888_v31 = vld [vmem:[%s7875_s1 + $0x240] sm:$0xff]   ;;  %v5892_v57 = vld [vmem:[%s7875_s1 + $0x288] sm:$0xff]  }
 0x520   : > { %v1822_v54 = vsel %vm1790_vm7, %v1741_v49, %v1806_v50  ;;  %v1811_v51 = vmul.f32 0.2, %v5542_v6  ;;  %vm1795_vm10 = vcmp.ge.f32.partialorder %v5542_v6, 0.0  ;;  %v5885_v49 = vld [vmem:[%s7875_s1 + $0x2b0] sm:$0xff]   ;;  %v5886_v50 = vld [vmem:[%s7875_s1 + $0x248] sm:$0xff]  }
 0x521   : > { %v1754_v44 = vpop.f32.mrf.mxu1  ;;  %v1835_v60 = vpack.c.bf16 %v1822_v54, %v1821_v53  ;;  %5615 = vmatpush3.bf16.msra.mxu0 %v5879_v41  ;;  %5582 = vmatprep.subr.bf16.mxu1 %v5885_v49  ;;  %v5890_v53 = vld [vmem:[%s7875_s1 + $0x298] sm:$0xff]   ;;  %v5891_v54 = vld [vmem:[%s7875_s1 + $0x290] sm:$0xff]  }
 0x522   : > { %5616 = vmatprep.subr.bf16.mxu0 %v5880_v15  ;;  %v1809_v4 = vmul.f32 0.2, %v1754_v44  ;;  %vm1793_vm9 = vcmp.ge.f32.partialorder %v1754_v44, 0.0  ;;  %v1827_v59 = vsel %vm1795_vm10, %v5542_v6, %v1811_v51  ;;  %5583 = vmatpush3.bf16.msra.mxu1 %v5885_v49  ;;  %v5889_v6 = vld [vmem:[%s7875_s1 + $0x2a0] sm:$0xff]  }
 0x523   : > { %v5543_v3 = vpop.f32.mrf.mxu1  ;;  %5568 = vmatprep.mubr.bf16.mxu0 %v1835_v60  ;;  %v6741_v60 = vld [vmem:[%s7875_s1 + $0x2f8] sm:$0xff]  }
 0x524   : > { %vm1796_vm8 = vcmp.ge.f32.partialorder %v5543_v3, 0.0  ;;  %v1812_v8 = vmul.f32 0.2, %v5543_v3  ;;  %5569 = vmatmul.mubr.bf16.gmra.mxu0 %v1836_v62  ;;  %v1825_v43 = vsel %vm1793_vm9, %v1754_v44, %v1809_v4  ;;  %v5893_v44 = vld [vmem:[%s7875_s1 + $0x280] sm:$0xff]  }
 0x525   : > { %v1757_v20 = vpop.f32.mrf.mxu1  ;;  %5617 = vmatpush3.bf16.msra.mxu0 %v5880_v15  ;;  %v5887_v15 = vld [vmem:[%s7875_s1 + $0x2a8] sm:$0xff]  }
 0x526   : > { %vm1794_vm11 = vcmp.ge.f32.partialorder %v1757_v20, 0.0  ;;  %v1810_v21 = vmul.f32 0.2, %v1757_v20  ;;  %5618 = vmatprep.subr.bf16.mxu0 %v5881_v63  ;;  %v1828_v27 = vsel %vm1796_vm8, %v5543_v3, %v1812_v8  ;;  %5584 = vmatprep.subr.bf16.mxu1 %v5887_v15 }
 0x527   : > { %v5546_v32 = vpop.f32.mrf.mxu1  ;;  %v1838_v13 = vpack.c.bf16 %v1828_v27, %v1827_v59  ;;  %5585 = vmatpush3.bf16.msra.mxu1 %v5887_v15 }
 0x528   : > { %v1826_v33 = vsel %vm1794_vm11, %v1757_v20, %v1810_v21  ;;  %v1815_v29 = vmul.f32 0.2, %v5546_v32  ;;  %vm1799_vm14 = vcmp.ge.f32.partialorder %v5546_v32, 0.0  ;;  %5586 = vmatprep.subr.bf16.mxu1 %v5889_v6 }
 0x529   : > { %v1770_v36 = vpop.f32.mrf.mxu1  ;;  %v1837_v10 = vpack.c.bf16 %v1826_v33, %v1825_v43  ;;  %5619 = vmatpush3.bf16.msra.mxu0 %v5881_v63 }
 0x52a   : > { %5620 = vmatprep.subr.bf16.mxu0 %v5882_v26  ;;  %v1813_v24 = vmul.f32 0.2, %v1770_v36  ;;  %vm1797_vm13 = vcmp.ge.f32.partialorder %v1770_v36, 0.0  ;;  %v1831_v42 = vsel %vm1799_vm14, %v5546_v32, %v1815_v29 }
 0x52b   : > { %v5547_v1 = vpop.f32.mrf.mxu1  ;;  %5572 = vmatprep.mubr.bf16.mxu0 %v1837_v10  ;;  %5587 = vmatpush3.bf16.msra.mxu1 %v5889_v6 }
 0x52c   : > { %vm1800_vm12 = vcmp.ge.f32.partialorder %v5547_v1, 0.0  ;;  %v1816_v18 = vmul.f32 0.2, %v5547_v1  ;;  %5573 = vmatmul.mubr.bf16.gmra.mxu0 %v1838_v13  ;;  %v1829_v41 = vsel %vm1797_vm13, %v1770_v36, %v1813_v24  ;;  %5588 = vmatprep.subr.bf16.mxu1 %v5890_v53 }
 0x52d   : > { %v1773_v11 = vpop.f32.mrf.mxu1  ;;  %5621 = vmatpush3.bf16.msra.mxu0 %v5882_v26 }
 0x52e   : > { %vm1798_vm15 = vcmp.ge.f32.partialorder %v1773_v11, 0.0  ;;  %v1814_v35 = vmul.f32 0.2, %v1773_v11  ;;  %5622 = vmatprep.subr.bf16.mxu0 %v5884_v22  ;;  %v1832_v37 = vsel %vm1800_vm12, %v5547_v1, %v1816_v18 }
 0x52f   : > { %v1840_v47 = vpack.c.bf16 %v1832_v37, %v1831_v42  ;;  %5589 = vmatpush3.bf16.msra.mxu1 %v5890_v53 }
 0x530   : > { %v1830_v25 = vsel %vm1798_vm15, %v1773_v11, %v1814_v35  ;;  %5590 = vmatprep.subr.bf16.mxu1 %v5891_v54 }
 0x531   : > { %v1839_v46 = vpack.c.bf16 %v1830_v25, %v1829_v41  ;;  %5623 = vmatpush3.bf16.msra.mxu0 %v5884_v22 }
 0x532   : > { %5624 = vmatprep.subr.bf16.mxu0 %v5886_v50 }
 0x533   : > { %5576 = vmatprep.mubr.bf16.mxu0 %v1839_v46  ;;  %5591 = vmatpush3.bf16.msra.mxu1 %v5891_v54 }
 0x534   : > { %5577 = vmatmul.mubr.bf16.gmra.mxu0 %v1840_v47  ;;  %5592 = vmatprep.subr.bf16.mxu1 %v5892_v57 }
 0x535   : > { %5625 = vmatpush3.bf16.msra.mxu0 %v5886_v50 }
 0x536   : > { %5626 = vmatprep.subr.bf16.mxu0 %v5888_v31 }
 0x537   : > { %5593 = vmatpush3.bf16.msra.mxu1 %v5892_v57 }
 0x538   : > { %5594 = vmatprep.subr.bf16.mxu1 %v5893_v44 }
 0x539   : > { %5627 = vmatpush3.bf16.msra.mxu0 %v5888_v31 }
 0x53b   : > { %5595 = vmatpush3.bf16.msra.mxu1 %v5893_v44 }
 0x53c   : > { %5644 = vmatprep.subr.bf16.mxu1 %v6741_v60 }
 0x5dc   : > { %v6744_v62 = vpop.f32.mrf.mxu0 }
 0x5dd   : > { %v2005_v63 = vmul.f32 0.5, %v6744_v62 }
 0x5de   : > { %v6747_v3 = vpop.f32.mrf.mxu0 }
 0x5df   : > { %v2003_v4 = vmul.f32 0.5, %v6747_v3  ;;  %v2023_v8 = vmul.f32 1.442695, %v2005_v63 }
 0x5e0   : > { %v6750_v51 = vpop.f32.mrf.mxu0 }
 0x5e1   : > { %7989 = vst [vmem:[#allocation16_spill] sm:$0xff] %v6750_v51  ;;  %v2006_v20 = vmul.f32 0.5, %v6750_v51  ;;  %v2019_v21 = vmul.f32 1.442695, %v2003_v4  ;;  %5946 = vpow2.f32 %v2023_v8  ;;  %v2068_v59 = vpack.c.bf16 %v6750_v51, %v6744_v62 }
 0x5e2   : > { %v6753_v26 = vpop.f32.mrf.mxu0 }
 0x5e3   : > { %7990 = vst [vmem:[#allocation17_spill] sm:$0xff] %v6753_v26  ;;  %v2025_v27 = vmul.f32 1.442695, %v2006_v20  ;;  %v2004_v32 = vmul.f32 0.5, %v6753_v26  ;;  %v2067_v33 = vpack.c.bf16 %v6753_v26, %v6747_v3 }
 0x5e4   : > { %v6756_v43 = vpop.f32.mrf.mxu0 }
 0x5e5   : > { %7991 = vst [vmem:[#allocation18_spill] sm:$0xff] %v6756_v43  ;;  %5948 = vpow2.f32 %v2025_v27  ;;  %v2021_v36 = vmul.f32 1.442695, %v2004_v32  ;;  %v2009_v10 = vmul.f32 0.5, %v6756_v43  ;;  %5628 = vmatprep.mubr.bf16.mxu0 %v2067_v33 }
 0x5e6   : > { %5950 = vpow2.f32 %v2019_v21  ;;  %v6763_v13 = vpop.f32.mrf.mxu0  ;;  %5629 = vmatmul.mubr.bf16.vlgmr.msra.gmra.mxu0 %v2068_v59  ;;  %v6246_v59 = vld [vmem:[%s6339_s24 + $0x18] sm:$0xff] }
 0x5e7   : > { %7992 = vst [vmem:[#allocation19_spill] sm:$0xff] %v6763_v13  ;;  %5952 = vpow2.f32 %v2021_v36  ;;  %v2007_v22 = vmul.f32 0.5, %v6763_v13  ;;  %v2031_v29 = vmul.f32 1.442695, %v2009_v10 }
 0x5e8   : > { %v6766_v1 = vpop.f32.mrf.mxu0 }
 0x5e9   : > { %7993 = vst [vmem:[#allocation20_spill] sm:$0xff] %v6766_v1  ;;  %v2027_v24 = vmul.f32 1.442695, %v2007_v22  ;;  %v2010_v18 = vmul.f32 0.5, %v6766_v1  ;;  %v2070_v46 = vpack.c.bf16 %v6766_v1, %v6756_v43 }
 0x5ea   : > { %v6769_v11 = vpop.f32.mrf.mxu0 }
 0x5eb   : > { %7994 = vst [vmem:[#allocation21_spill] sm:$0xff] %v6769_v11  ;;  %v2033_v35 = vmul.f32 1.442695, %v2010_v18  ;;  %v2008_v37 = vmul.f32 0.5, %v6769_v11  ;;  %5954 = vpow2.f32 %v2027_v24  ;;  %v2069_v25 = vpack.c.bf16 %v6769_v11, %v6763_v13  ;;  %v6247_v24 = vld [vmem:[%s6339_s24] sm:$0xff] }
 0x5ec   : > { %v6772_v41 = vpop.f32.mrf.mxu0 }
 0x5ed   : > { %7995 = vst [vmem:[#allocation22_spill] sm:$0xff] %v6772_v41  ;;  %5956 = vpow2.f32 %v2033_v35  ;;  %v2029_v42 = vmul.f32 1.442695, %v2008_v37  ;;  %v2013_v47 = vmul.f32 0.5, %v6772_v41  ;;  %5632 = vmatprep.mubr.bf16.mxu0 %v2069_v25  ;;  %v6249_v25 = vld [vmem:[%s6339_s24 + $0x10] sm:$0xff] }
 0x5ee   : > { %5958 = vpow2.f32 %v2031_v29  ;;  %v6779_v49 = vpop.f32.mrf.mxu0  ;;  %5633 = vmatmul.mubr.bf16.gmra.mxu0 %v2070_v46  ;;  %v5947_v31 = vpop.eup %5946  ;;  %v6248_v29 = vld [vmem:[%s6339_s24 + $0x8] sm:$0xff] }
 0x5ef   : > { %7996 = vst [vmem:[#allocation23_spill] sm:$0xff] %v6779_v49  ;;  %5960 = vpow2.f32 %v2029_v42  ;;  %v2011_v50 = vmul.f32 0.5, %v6779_v49  ;;  %v2039_v57 = vmul.f32 1.442695, %v2013_v47  ;;  %v2053_v42 = vmul.f32 %v6249_v25, %v5947_v31 }
 0x5f0   : > { %v6782_v15 = vpop.f32.mrf.mxu0 }
 0x5f1   : > { %7997 = vst [vmem:[#allocation24_spill] sm:$0xff] %v6782_v15  ;;  %v2035_v6 = vmul.f32 1.442695, %v2011_v50  ;;  %v2014_v53 = vmul.f32 0.5, %v6782_v15  ;;  %v2072_v33 = vpack.c.bf16 %v6782_v15, %v6772_v41 }
 0x5f2   : > { %v5949_v54 = vpop.eup %5948  ;;  %v6785_v44 = vpop.f32.mrf.mxu0 }
 0x5f3   : > { %7998 = vst [vmem:[#allocation25_spill] sm:$0xff] %v6785_v44  ;;  %v5951_v63 = vpop.eup %5950  ;;  %v2041_v4 = vmul.f32 1.442695, %v2014_v53  ;;  %v2012_v8 = vmul.f32 0.5, %v6785_v44  ;;  %5962 = vpow2.f32 %v2035_v6  ;;  %v2071_v27 = vpack.c.bf16 %v6785_v44, %v6779_v49 }
 0x5f4   : > { %v5953_v20 = vpop.eup %5952  ;;  %v6788_v21 = vpop.f32.mrf.mxu0  ;;  %v2054_v36 = vmul.f32 %v6246_v59, %v5949_v54  ;;  %v2051_v18 = vmul.f32 %v6247_v24, %v5951_v63 }
 0x5f5   : > { %7999 = vst [vmem:[#allocation26_spill] sm:$0xff] %v6788_v21  ;;  %5964 = vpow2.f32 %v2041_v4  ;;  %v2037_v32 = vmul.f32 1.442695, %v2012_v8  ;;  %v2017_v10 = vmul.f32 0.5, %v6788_v21  ;;  %5636 = vmatprep.mubr.bf16.mxu0 %v2071_v27  ;;  %v2052_v35 = vmul.f32 %v6248_v29, %v5953_v20 }
 0x5f6   : > { %5966 = vpow2.f32 %v2039_v57  ;;  %v6796_v22 = vpop.f32.mrf.mxu0  ;;  %5637 = vmatmul.mubr.bf16.gmra.mxu0 %v2072_v33  ;;  %v2093_v54 = vpack.c.bf16 %v2054_v36, %v2053_v42  ;;  %v5895_v57 = vld [vmem:[%s7875_s1 + $0x2f0] sm:$0xff]   ;;  %v6250_v36 = vld [vmem:[%s6339_s24 + $0x20] sm:$0xff] }
 0x5f7   : > { %8000 = vst [vmem:[#allocation27_spill] sm:$0xff] %v6796_v22  ;;  %5968 = vpow2.f32 %v2037_v32  ;;  %v2015_v37 = vmul.f32 0.5, %v6796_v22  ;;  %v2092_v47 = vpack.c.bf16 %v2052_v35, %v2051_v18  ;;  %v2047_v4 = vmul.f32 1.442695, %v2017_v10  ;;  %v6251_v18 = vld [vmem:[%s6339_s24 + $0x28] sm:$0xff]  ;;  %v6253_v42 = vld [vmem:[%s6339_s24 + $0x30] sm:$0xff] }
 0x5f8   : > { %v6802_v46 = vpop.f32.mrf.mxu0  ;;  %v5955_v50 = vpop.eup %5954  ;;  %v5896_v35 = vld [vmem:[%s7875_s1 + $0x2e8] sm:$0xff]  }
 0x5f9   : > { %8001 = vst [vmem:[#allocation28_spill] sm:$0xff] %v6802_v46  ;;  %v2043_v6 = vmul.f32 1.442695, %v2015_v37  ;;  %v2018_v53 = vmul.f32 0.5, %v6802_v46  ;;  %5596 = vmatprep.mubr.bf16.mxu1 %v2092_v47  ;;  %v2074_v59 = vpack.c.bf16 %v6802_v46, %v6788_v21  ;;  %v2055_v10 = vmul.f32 %v6250_v36, %v5955_v50  ;;  %v6252_v37 = vld [vmem:[%s6339_s24 + $0x38] sm:$0xff] }
 0x5fa   : > { %v5957_v63 = vpop.eup %5956  ;;  %v6808_v8 = vpop.f32.mrf.mxu0  ;;  %5597 = vmatmul.mubr.bf16.vlgmr.msra.gmra.mxu1 %v2093_v54 }
 0x5fb   : > { %8002 = vst [vmem:[#allocation29_spill] sm:$0xff] %v6808_v8  ;;  %v5959_v31 = vpop.eup %5958  ;;  %v2049_v20 = vmul.f32 1.442695, %v2018_v53  ;;  %v2016_v27 = vmul.f32 0.5, %v6808_v8  ;;  %5970 = vpow2.f32 %v2043_v6  ;;  %5645 = vmatpush3.bf16.msra.mxu1 %v6741_v60  ;;  %v2073_v33 = vpack.c.bf16 %v6808_v8, %v6796_v22  ;;  %v5897_v53 = vld [vmem:[%s7875_s1 + $0x2e0] sm:$0xff]  }
 0x5fc   : > { %v5961_v32 = vpop.eup %5960  ;;  %5646 = vmatprep.subr.bf16.mxu1 %v5895_v57  ;;  %v2058_v60 = vmul.f32 %v6252_v37, %v5957_v63  ;;  %v2057_v47 = vmul.f32 %v6253_v42, %v5959_v31  ;;  %v6255_v31 = vld [vmem:[%s6339_s24 + $0x48] sm:$0xff]  ;;  %v6258_v42 = vld [vmem:[%s6339_s24 + $0x60] sm:$0xff] }
 0x5fd   : > { %5972 = vpow2.f32 %v2049_v20  ;;  %v2045_v24 = vmul.f32 1.442695, %v2016_v27  ;;  %v2056_v29 = vmul.f32 %v6251_v18, %v5961_v32  ;;  %5640 = vmatprep.mubr.bf16.mxu0 %v2073_v33  ;;  %v6254_v20 = vld [vmem:[%s6339_s24 + $0x40] sm:$0xff]  ;;  %v5898_v32 = vld [vmem:[%s7875_s1 + $0x2d8] sm:$0xff]  }
 0x5fe   : > { %5974 = vpow2.f32 %v2047_v4  ;;  %5641 = vmatmul.mubr.bf16.gmra.mxu0 %v2074_v59  ;;  %v2095_v6 = vpack.c.bf16 %v2058_v60, %v2057_v47  ;;  %v6256_v33 = vld [vmem:[%s6339_s24 + $0x58] sm:$0xff] }
 0x5ff   : > { %5976 = vpow2.f32 %v2045_v24  ;;  %v2094_v25 = vpack.c.bf16 %v2056_v29, %v2055_v10  ;;  %5647 = vmatpush3.bf16.msra.mxu1 %v5895_v57  ;;  %v6257_v10 = vld [vmem:[%s6339_s24 + $0x50] sm:$0xff] }
 0x600   : > { %v5963_v50 = vpop.eup %5962  ;;  %5648 = vmatprep.subr.bf16.mxu1 %v5896_v35 }
 0x601   : > { %5600 = vmatprep.mubr.bf16.mxu1 %v2094_v25  ;;  %v2059_v27 = vmul.f32 %v6254_v20, %v5963_v50  ;;  %v6259_v50 = vld [vmem:[%s6339_s24 + $0x68] sm:$0xff]  ;;  %v6261_v20 = vld [vmem:[%s6339_s24 + $0x70] sm:$0xff] }
 0x602   : > { %v5965_v54 = vpop.eup %5964  ;;  %5601 = vmatmul.mubr.bf16.gmra.mxu1 %v2095_v6 }
 0x603   : > { %v5967_v63 = vpop.eup %5966  ;;  %5649 = vmatpush3.bf16.msra.mxu1 %v5896_v35  ;;  %v2062_v59 = vmul.f32 %v6256_v33, %v5965_v54  ;;  %v5899_v35 = vld [vmem:[%s7875_s1 + $0x2d0] sm:$0xff]   ;;  %v6260_v54 = vld [vmem:[%s6339_s24 + $0x78] sm:$0xff] }
 0x604   : > { %v5969_v4 = vpop.eup %5968  ;;  %5650 = vmatprep.subr.bf16.mxu1 %v5897_v53  ;;  %v2061_v24 = vmul.f32 %v6257_v10, %v5967_v63  ;;  %v5911_v33 = vld [vmem:[%s7875_s1 + $0x370] sm:$0xff]   ;;  %v5914_v10 = vld [vmem:[%s7875_s1 + $0x358] sm:$0xff]  }
 0x605   : > { %v2060_v57 = vmul.f32 %v6255_v31, %v5969_v4 }
 0x606   : > { %v2097_v29 = vpack.c.bf16 %v2062_v59, %v2061_v24  ;;  %v5912_v59 = vld [vmem:[%s7875_s1 + $0x368] sm:$0xff]  }
 0x607   : > { %v2096_v36 = vpack.c.bf16 %v2060_v57, %v2059_v27  ;;  %5651 = vmatpush3.bf16.msra.mxu1 %v5897_v53  ;;  %v5900_v53 = vld [vmem:[%s7875_s1 + $0x2c8] sm:$0xff]   ;;  %v5901_v57 = vld [vmem:[%s7875_s1 + $0x2c0] sm:$0xff]  }
 0x608   : > { %v5971_v18 = vpop.eup %5970  ;;  %5652 = vmatprep.subr.bf16.mxu1 %v5898_v32 }
 0x609   : > { %5604 = vmatprep.mubr.bf16.mxu1 %v2096_v36  ;;  %v2063_v47 = vmul.f32 %v6258_v42, %v5971_v18  ;;  %v5913_v36 = vld [vmem:[%s7875_s1 + $0x360] sm:$0xff]  }
 0x60a   : > { %v5973_v37 = vpop.eup %5972  ;;  %5605 = vmatmul.mubr.bf16.gmra.mxu1 %v2097_v29 }
 0x60b   : > { %v5975_v60 = vpop.eup %5974  ;;  %5653 = vmatpush3.bf16.msra.mxu1 %v5898_v32  ;;  %v2066_v63 = vmul.f32 %v6260_v54, %v5973_v37  ;;  %v5910_v32 = vld [vmem:[%s7875_s1 + $0x378] sm:$0xff]  }
 0x60c   : > { %v5977_v25 = vpop.eup %5976  ;;  %5654 = vmatprep.subr.bf16.mxu1 %v5899_v35  ;;  %v2065_v27 = vmul.f32 %v6261_v20, %v5975_v60 }
 0x60d   : > { %v2064_v6 = vmul.f32 %v6259_v50, %v5977_v25 }
 0x60e   : > { %v2099_v31 = vpack.c.bf16 %v2066_v63, %v2065_v27 }
 0x60f   : > { %v2098_v4 = vpack.c.bf16 %v2064_v6, %v2063_v47  ;;  %5655 = vmatpush3.bf16.msra.mxu1 %v5899_v35 }
 0x610   : > { %5656 = vmatprep.subr.bf16.mxu1 %v5900_v53 }
 0x611   : > { %5608 = vmatprep.mubr.bf16.mxu1 %v2098_v4 }
 0x612   : > { %5609 = vmatmul.mubr.bf16.gmra.mxu1 %v2099_v31 }
 0x613   : > { %5657 = vmatpush3.bf16.msra.mxu1 %v5900_v53  ;;  %5660 = vmatprep.mubr.bf16.mxu1 %v6495_v16  ;;  %v5902_v16 = vld [vmem:[%s7875_s1 + $0x338] sm:$0xff]  }
 0x614   : > { %5658 = vmatprep.subr.bf16.mxu1 %v5901_v57  ;;  %5676 = vmatprep.subr.bf16.mxu0 %v5902_v16 }
 0x615   : > { %5677 = vmatpush3.bf16.msra.mxu0 %v5902_v16 }
 0x617   : > { %5659 = vmatpush3.bf16.msra.mxu1 %v5901_v57 }
 0x618   : > { %5708 = vmatprep.subr.bf16.mxu1 %v5910_v32 }
 0x61a   : > { %5661 = vmatmul.mubr.bf16.vlgmr.msra.gmra.mxu1 %v6497_v17  ;;  %v5903_v17 = vld [vmem:[%s7875_s1 + $0x330] sm:$0xff]  }
 0x61b   : > { %5664 = vmatprep.mubr.bf16.mxu1 %v6509_v39  ;;  %5678 = vmatprep.subr.bf16.mxu0 %v5903_v17  ;;  %v5904_v39 = vld [vmem:[%s7875_s1 + $0x328] sm:$0xff]  }
 0x61c   : > { %5679 = vmatpush3.bf16.msra.mxu0 %v5903_v17  ;;  %5709 = vmatpush3.bf16.msra.mxu1 %v5910_v32 }
 0x61d   : > { %5680 = vmatprep.subr.bf16.mxu0 %v5904_v39  ;;  %5710 = vmatprep.subr.bf16.mxu1 %v5911_v33 }
 0x620   : > { %5681 = vmatpush3.bf16.msra.mxu0 %v5904_v39  ;;  %5711 = vmatpush3.bf16.msra.mxu1 %v5911_v33 }
 0x621   : > { %5712 = vmatprep.subr.bf16.mxu1 %v5912_v59 }
 0x622   : > { %5665 = vmatmul.mubr.bf16.gmra.mxu1 %v6511_v40  ;;  %v5905_v40 = vld [vmem:[%s7875_s1 + $0x320] sm:$0xff]  }
 0x623   : > { %5668 = vmatprep.mubr.bf16.mxu1 %v6523_v55  ;;  %5682 = vmatprep.subr.bf16.mxu0 %v5905_v40  ;;  %v5906_v55 = vld [vmem:[%s7875_s1 + $0x318] sm:$0xff]  }
 0x624   : > { %5683 = vmatpush3.bf16.msra.mxu0 %v5905_v40  ;;  %5713 = vmatpush3.bf16.msra.mxu1 %v5912_v59 }
 0x625   : > { %5684 = vmatprep.subr.bf16.mxu0 %v5906_v55  ;;  %5714 = vmatprep.subr.bf16.mxu1 %v5913_v36 }
 0x628   : > { %5685 = vmatpush3.bf16.msra.mxu0 %v5906_v55  ;;  %5715 = vmatpush3.bf16.msra.mxu1 %v5913_v36 }
 0x629   : > { %5716 = vmatprep.subr.bf16.mxu1 %v5914_v10 }
 0x62a   : > { %5669 = vmatmul.mubr.bf16.gmra.mxu1 %v6525_v56  ;;  %v5907_v56 = vld [vmem:[%s7875_s1 + $0x310] sm:$0xff]  }
 0x62b   : > { %5672 = vmatprep.mubr.bf16.mxu1 %v6537_v5  ;;  %5686 = vmatprep.subr.bf16.mxu0 %v5907_v56  ;;  %v5908_v5 = vld [vmem:[%s7875_s1 + $0x308] sm:$0xff]  }
 0x62c   : > { %5687 = vmatpush3.bf16.msra.mxu0 %v5907_v56  ;;  %5717 = vmatpush3.bf16.msra.mxu1 %v5914_v10 }
 0x62d   : > { %5688 = vmatprep.subr.bf16.mxu0 %v5908_v5 }
 0x630   : > { %5689 = vmatpush3.bf16.msra.mxu0 %v5908_v5 }
 0x632   : > { %5673 = vmatmul.mubr.bf16.gmra.mxu1 %v6539_v7  ;;  %v5909_v7 = vld [vmem:[%s7875_s1 + $0x300] sm:$0xff]  }
 0x633   : > { %5690 = vmatprep.subr.bf16.mxu0 %v5909_v7 }
 0x634   : > { %5691 = vmatpush3.bf16.msra.mxu0 %v5909_v7 }
 0x6a6   : > { %v5630_v24 = vpop.f32.mrf.mxu0 }
 0x6a8   : > { %v2344_v35 = vpop.f32.mrf.mxu0 }
 0x6aa   : > { %v5631_v25 = vpop.f32.mrf.mxu0 }
 0x6ac   : > { %v2347_v50 = vpop.f32.mrf.mxu0 }
 0x6ae   : > { %v5634_v54 = vpop.f32.mrf.mxu0 }
 0x6b0   : > { %v2360_v20 = vpop.f32.mrf.mxu0 }
 0x6b2   : > { %v5635_v57 = vpop.f32.mrf.mxu0 }
 0x6b4   : > { %v2363_v39 = vpop.f32.mrf.mxu0 }
 0x6b6   : > { %v5638_v56 = vpop.f32.mrf.mxu0 }
 0x6b8   : > { %v2376_v10 = vpop.f32.mrf.mxu0 }
 0x6ba   : > { %v5598_v18 = vpop.f32.mrf.mxu1  ;;  %v5639_v45 = vpop.f32.mrf.mxu0 }
 0x6bb   : > { %v2353_v32 = vadd.f32 %v5630_v24, %v5598_v18 }
 0x6bc   : > { %v2199_v29 = vpop.f32.mrf.mxu1 }
 0x6bd   : > { %v2345_v7 = vadd.f32 %v2344_v35, %v2199_v29 }
 0x6be   : > { %v5599_v37 = vpop.f32.mrf.mxu1 }
 0x6bf   : > { %v2356_v59 = vadd.f32 %v5631_v25, %v5599_v37 }
 0x6c0   : > { %v2202_v60 = vpop.f32.mrf.mxu1 }
 0x6c1   : > { %v2348_v8 = vadd.f32 %v2347_v50, %v2202_v60  ;;  %v2379_v50 = vpop.f32.mrf.mxu0 }
 0x6c2   : > { %v5602_v42 = vpop.f32.mrf.mxu1 }
 0x6c3   : > { %v2369_v18 = vadd.f32 %v5634_v54, %v5602_v42 }
 0x6c4   : > { %v2215_v47 = vpop.f32.mrf.mxu1 }
 0x6c5   : > { %v2361_v51 = vadd.f32 %v2360_v20, %v2215_v47 }
 0x6c6   : > { %v5603_v6 = vpop.f32.mrf.mxu1 }
 0x6c7   : > { %v2372_v37 = vadd.f32 %v5635_v57, %v5603_v6 }
 0x6c8   : > { %v2218_v53 = vpop.f32.mrf.mxu1 }
 0x6ca   : > { %v6893_v63 = vpop.f32.mrf.mxu1 }
 0x6cc   : > { %v2231_v4 = vpop.f32.mrf.mxu1 }
 0x6ce   : > { %v6895_v27 = vpop.f32.mrf.mxu1 }
 0x6cf   : > { %v2388_v6 = vadd.f32 %v5639_v45, %v6895_v27 }
 0x6d0   : > { %v6897_v31 = vpop.f32.mrf.mxu1 }
 0x6d2   : > { %v6899_v16 = vpop.f32.mrf.mxu1 }
 0x6d4   : > { %v6901_v17 = vpop.f32.mrf.mxu1 }
 0x6d6   : > { %v6903_v40 = vpop.f32.mrf.mxu1 }
 0x6d8   : > { %v6905_v55 = vpop.f32.mrf.mxu1 }
 0x6da   : > { %v5662_v5 = vpop.f32.mrf.mxu1 }
 0x6db   : > { %v2571_v46 = vadd.f32 %v5662_v5, %v2353_v32 }
 0x6dc   : > { %v2506_v33 = vpop.f32.mrf.mxu1 }
 0x6dd   : > { %v2569_v36 = vadd.f32 %v2506_v33, %v2345_v7  ;;  %v2603_v49 = vmul.f32 0.2, %v2571_v46  ;;  %vm2587_vm2 = vcmp.ge.f32.partialorder %v2571_v46, 0.0 }
 0x6de   : > { %v5663_v21 = vpop.f32.mrf.mxu1 }
 0x6df   : > { %v2572_v22 = vadd.f32 %v5663_v21, %v2356_v59  ;;  %v2601_v41 = vmul.f32 0.2, %v2569_v36  ;;  %vm2585_vm1 = vcmp.ge.f32.partialorder %v2569_v36, 0.0  ;;  %v2619_v5 = vsel %vm2587_vm2, %v2571_v46, %v2603_v49 }
 0x6e0   : > { %v2509_v15 = vpop.f32.mrf.mxu1  ;;  %v2385_v49 = vadd.f32 %v5638_v56, %v6893_v63 }
 0x6e1   : > { %vm2588_vm0 = vcmp.ge.f32.partialorder %v2572_v22, 0.0  ;;  %v2604_v52 = vmul.f32 0.2, %v2572_v22  ;;  %v2570_v44 = vadd.f32 %v2509_v15, %v2348_v8  ;;  %v2617_v60 = vsel %vm2585_vm1, %v2569_v36, %v2601_v41 }
 0x6e2   : > { %v5666_v14 = vpop.f32.mrf.mxu1  ;;  %v2364_v8 = vadd.f32 %v2363_v39, %v2218_v53  ;;  %v2377_v41 = vadd.f32 %v2376_v10, %v2231_v4 }
 0x6e3   : > { %vm2586_vm3 = vcmp.ge.f32.partialorder %v2570_v44, 0.0  ;;  %v2602_v24 = vmul.f32 0.2, %v2570_v44  ;;  %v2620_v29 = vsel %vm2588_vm0, %v2572_v22, %v2604_v52  ;;  %v2575_v7 = vadd.f32 %v5666_v14, %v2369_v18  ;;  %v5642_v52 = vpop.f32.mrf.mxu0 }
 0x6e4   : > { %v2522_v35 = vpop.f32.mrf.mxu1  ;;  %v2634_v33 = vpack.c.bf16 %v2620_v29, %v2619_v5  ;;  %v2380_v29 = vadd.f32 %v2379_v50, %v6897_v31  ;;  %v2401_v31 = vadd.f32 %v5642_v52, %v6899_v16 }
 0x6e5   : > { %v2573_v25 = vadd.f32 %v2522_v35, %v2361_v51  ;;  %v2618_v21 = vsel %vm2586_vm3, %v2570_v44, %v2602_v24  ;;  %v2607_v22 = vmul.f32 0.2, %v2575_v7  ;;  %vm2591_vm6 = vcmp.ge.f32.partialorder %v2575_v7, 0.0  ;;  %v2392_v39 = vpop.f32.mrf.mxu0 }
 0x6e6   : > { %v5667_v32 = vpop.f32.mrf.mxu1  ;;  %v2633_v15 = vpack.c.bf16 %v2618_v21, %v2617_v60  ;;  %v2393_v60 = vadd.f32 %v2392_v39, %v6901_v17  ;;  %v5916_v39 = vld [vmem:[%s7875_s1 + $0x348] sm:$0xff]  }
 0x6e7   : > { %v2576_v59 = vadd.f32 %v5667_v32, %v2372_v37  ;;  %v2605_v47 = vmul.f32 0.2, %v2573_v25  ;;  %vm2589_vm5 = vcmp.ge.f32.partialorder %v2573_v25, 0.0  ;;  %v2623_v18 = vsel %vm2591_vm6, %v2575_v7, %v2607_v22  ;;  %v5643_v45 = vpop.f32.mrf.mxu0 }
 0x6e8   : > { %v2525_v30 = vpop.f32.mrf.mxu1  ;;  %5692 = vmatprep.mubr.bf16.mxu0 %v2633_v15  ;;  %v2404_v7 = vadd.f32 %v5643_v45, %v6903_v40 }
 0x6e9   : > { %vm2592_vm4 = vcmp.ge.f32.partialorder %v2576_v59, 0.0  ;;  %v2608_v20 = vmul.f32 0.2, %v2576_v59  ;;  %v2574_v42 = vadd.f32 %v2525_v30, %v2364_v8  ;;  %5693 = vmatmul.mubr.bf16.vlgmr.msra.gmra.mxu0 %v2634_v33  ;;  %v2621_v54 = vsel %vm2589_vm5, %v2573_v25, %v2605_v47  ;;  %v2395_v33 = vpop.f32.mrf.mxu0 }
 0x6ea   : > { %v5670_v51 = vpop.f32.mrf.mxu1  ;;  %v2396_v22 = vadd.f32 %v2395_v33, %v6905_v55 }
 0x6eb   : > { %vm2590_vm7 = vcmp.ge.f32.partialorder %v2574_v42, 0.0  ;;  %v2606_v14 = vmul.f32 0.2, %v2574_v42  ;;  %v2624_v46 = vsel %vm2592_vm4, %v2576_v59, %v2608_v20  ;;  %v2579_v30 = vadd.f32 %v5670_v51, %v2385_v49 }
 0x6ec   : > { %v2538_v44 = vpop.f32.mrf.mxu1  ;;  %v2636_v10 = vpack.c.bf16 %v2624_v46, %v2623_v18  ;;  %v5920_v18 = vld [vmem:[%s7875_s1 + $0x3a8] sm:$0xff]  }
 0x6ed   : > { %v2577_v53 = vadd.f32 %v2538_v44, %v2377_v41  ;;  %v2622_v57 = vsel %vm2590_vm7, %v2574_v42, %v2606_v14  ;;  %v2611_v27 = vmul.f32 0.2, %v2579_v30  ;;  %vm2595_vm10 = vcmp.ge.f32.partialorder %v2579_v30, 0.0 }
 0x6ee   : > { %v5671_v36 = vpop.f32.mrf.mxu1  ;;  %v2635_v24 = vpack.c.bf16 %v2622_v57, %v2621_v54  ;;  %v5915_v57 = vld [vmem:[%s7875_s1 + $0x350] sm:$0xff]  }
 0x6ef   : > { %v2580_v4 = vadd.f32 %v5671_v36, %v2388_v6  ;;  %v2609_v37 = vmul.f32 0.2, %v2577_v53  ;;  %vm2593_vm9 = vcmp.ge.f32.partialorder %v2577_v53, 0.0  ;;  %v2627_v42 = vsel %vm2595_vm10, %v2579_v30, %v2611_v27  ;;  %5718 = vmatprep.subr.bf16.mxu1 %v5915_v57  ;;  %v5917_v30 = vld [vmem:[%s7875_s1 + $0x340] sm:$0xff]   ;;  %v5918_v36 = vld [vmem:[%s7875_s1 + $0x3b8] sm:$0xff]  }
 0x6f0   : > { %v2541_v35 = vpop.f32.mrf.mxu1  ;;  %5696 = vmatprep.mubr.bf16.mxu0 %v2635_v24  ;;  %5719 = vmatpush3.bf16.msra.mxu1 %v5915_v57  ;;  %v5919_v24 = vld [vmem:[%s7875_s1 + $0x3b0] sm:$0xff]  }
 0x6f1   : > { %vm2596_vm8 = vcmp.ge.f32.partialorder %v2580_v4, 0.0  ;;  %v2612_v63 = vmul.f32 0.2, %v2580_v4  ;;  %v2578_v56 = vadd.f32 %v2541_v35, %v2380_v29  ;;  %5697 = vmatmul.mubr.bf16.gmra.mxu0 %v2636_v10  ;;  %v2625_v15 = vsel %vm2593_vm9, %v2577_v53, %v2609_v37  ;;  %5720 = vmatprep.subr.bf16.mxu1 %v5916_v39  ;;  %v6935_v29 = vld [vmem:[%s7875_s1 + $0x3a0] sm:$0xff]  }
 0x6f2   : > { %v5674_v25 = vpop.f32.mrf.mxu1  ;;  %5740 = vmatprep.subr.bf16.mxu0 %v5918_v36 }
 0x6f3   : > { %vm2594_vm11 = vcmp.ge.f32.partialorder %v2578_v56, 0.0  ;;  %v2610_v21 = vmul.f32 0.2, %v2578_v56  ;;  %v2628_v5 = vsel %vm2596_vm8, %v2580_v4, %v2612_v63  ;;  %v2583_v59 = vadd.f32 %v5674_v25, %v2401_v31  ;;  %5741 = vmatpush3.bf16.msra.mxu0 %v5918_v36  ;;  %v6941_v4 = vld [vmem:[%s7875_s1 + $0x398] sm:$0xff]  }
 0x6f4   : > { %v2554_v50 = vpop.f32.mrf.mxu1  ;;  %v2638_v51 = vpack.c.bf16 %v2628_v5, %v2627_v42  ;;  %5721 = vmatpush3.bf16.msra.mxu1 %v5916_v39  ;;  %5742 = vmatprep.subr.bf16.mxu0 %v5919_v24 }
 0x6f5   : > { %v2581_v32 = vadd.f32 %v2554_v50, %v2393_v60  ;;  %v2626_v8 = vsel %vm2594_vm11, %v2578_v56, %v2610_v21  ;;  %v2615_v40 = vmul.f32 0.2, %v2583_v59  ;;  %vm2599_vm14 = vcmp.ge.f32.partialorder %v2583_v59, 0.0  ;;  %5722 = vmatprep.subr.bf16.mxu1 %v5917_v30 }
 0x6f6   : > { %v5675_v47 = vpop.f32.mrf.mxu1  ;;  %v2637_v20 = vpack.c.bf16 %v2626_v8, %v2625_v15 }
 0x6f7   : > { %v2584_v17 = vadd.f32 %v5675_v47, %v2404_v7  ;;  %v2613_v14 = vmul.f32 0.2, %v2581_v32  ;;  %vm2597_vm13 = vcmp.ge.f32.partialorder %v2581_v32, 0.0  ;;  %v2631_v54 = vsel %vm2599_vm14, %v2583_v59, %v2615_v40  ;;  %5743 = vmatpush3.bf16.msra.mxu0 %v5919_v24 }
 0x6f8   : > { %v2557_v41 = vpop.f32.mrf.mxu1  ;;  %5700 = vmatprep.mubr.bf16.mxu0 %v2637_v20  ;;  %5723 = vmatpush3.bf16.msra.mxu1 %v5917_v30 }
 0x6f9   : > { %vm2600_vm12 = vcmp.ge.f32.partialorder %v2584_v17, 0.0  ;;  %v2616_v16 = vmul.f32 0.2, %v2584_v17  ;;  %v2582_v52 = vadd.f32 %v2557_v41, %v2396_v22  ;;  %5701 = vmatmul.mubr.bf16.gmra.mxu0 %v2638_v51  ;;  %v2629_v46 = vsel %vm2597_vm13, %v2581_v32, %v2613_v14  ;;  %5772 = vmatprep.subr.bf16.mxu1 %v5918_v36 }
 0x6fa   : > { %5744 = vmatprep.subr.bf16.mxu0 %v5920_v18 }
 0x6fb   : > { %vm2598_vm15 = vcmp.ge.f32.partialorder %v2582_v52, 0.0  ;;  %v2614_v49 = vmul.f32 0.2, %v2582_v52  ;;  %v2632_v44 = vsel %vm2600_vm12, %v2584_v17, %v2616_v16  ;;  %5745 = vmatpush3.bf16.msra.mxu0 %v5920_v18 }
 0x6fc   : > { %v2640_v55 = vpack.c.bf16 %v2632_v44, %v2631_v54  ;;  %5746 = vmatprep.subr.bf16.mxu0 %v6935_v29 }
 0x6fd   : > { %v2630_v6 = vsel %vm2598_vm15, %v2582_v52, %v2614_v49 }
 0x6fe   : > { %v2639_v53 = vpack.c.bf16 %v2630_v6, %v2629_v46 }
 0x6ff   : > { %5747 = vmatpush3.bf16.msra.mxu0 %v6935_v29 }
 0x700   : > { %5704 = vmatprep.mubr.bf16.mxu0 %v2639_v53  ;;  %5748 = vmatprep.subr.bf16.mxu0 %v6941_v4 }
 0x701   : > { %5705 = vmatmul.mubr.bf16.gmra.mxu0 %v2640_v55 }
 0x703   : > { %5749 = vmatpush3.bf16.msra.mxu0 %v6941_v4 }
 0x7a9   : > { %v5694_v10 = vpop.f32.mrf.mxu0 }
 0x7aa   : > { %v2821_v45 = vmul.f32 0.2, %v5694_v10  ;;  %vm2805_vm2 = vcmp.ge.f32.partialorder %v5694_v10, 0.0 }
 0x7ab   : > { %v2740_v35 = vpop.f32.mrf.mxu0 }
 0x7ac   : > { %v2819_v63 = vmul.f32 0.2, %v2740_v35  ;;  %vm2803_vm1 = vcmp.ge.f32.partialorder %v2740_v35, 0.0  ;;  %v2837_v5 = vsel %vm2805_vm2, %v5694_v10, %v2821_v45 }
 0x7ad   : > { %v5695_v37 = vpop.f32.mrf.mxu0 }
 0x7ae   : > { %vm2806_vm0 = vcmp.ge.f32.partialorder %v5695_v37, 0.0  ;;  %v2822_v56 = vmul.f32 0.2, %v5695_v37  ;;  %v2835_v31 = vsel %vm2803_vm1, %v2740_v35, %v2819_v63 }
 0x7af   : > { %v2743_v27 = vpop.f32.mrf.mxu0 }
 0x7b0   : > { %vm2804_vm3 = vcmp.ge.f32.partialorder %v2743_v27, 0.0  ;;  %v2820_v25 = vmul.f32 0.2, %v2743_v27  ;;  %v2838_v60 = vsel %vm2806_vm0, %v5695_v37, %v2822_v56 }
 0x7b1   : > { %v5698_v21 = vpop.f32.mrf.mxu0  ;;  %v2852_v15 = vpack.c.bf16 %v2838_v60, %v2837_v5  ;;  %v5923_v5 = vld [vmem:[%s7875_s1 + $0x390] sm:$0xff]  }
 0x7b2   : > { %v2836_v50 = vsel %vm2804_vm3, %v2743_v27, %v2820_v25  ;;  %v2825_v47 = vmul.f32 0.2, %v5698_v21  ;;  %vm2809_vm6 = vcmp.ge.f32.partialorder %v5698_v21, 0.0  ;;  %5750 = vmatprep.subr.bf16.mxu0 %v5923_v5 }
 0x7b3   : > { %v2756_v7 = vpop.f32.mrf.mxu0  ;;  %v2851_v32 = vpack.c.bf16 %v2836_v50, %v2835_v31  ;;  %5751 = vmatpush3.bf16.msra.mxu0 %v5923_v5 }
 0x7b4   : > { %v2823_v33 = vmul.f32 0.2, %v2756_v7  ;;  %vm2807_vm5 = vcmp.ge.f32.partialorder %v2756_v7, 0.0  ;;  %v2841_v14 = vsel %vm2809_vm6, %v5698_v21, %v2825_v47 }
 0x7b5   : > { %v5699_v8 = vpop.f32.mrf.mxu0  ;;  %5724 = vmatprep.mubr.bf16.mxu1 %v2851_v32 }
 0x7b6   : > { %vm2810_vm4 = vcmp.ge.f32.partialorder %v5699_v8, 0.0  ;;  %v2826_v59 = vmul.f32 0.2, %v5699_v8  ;;  %5725 = vmatmul.mubr.bf16.vlgmr.msra.gmra.mxu1 %v2852_v15  ;;  %v2839_v51 = vsel %vm2807_vm5, %v2756_v7, %v2823_v33  ;;  %v5925_v7 = vld [vmem:[%s7875_s1 + $0x380] sm:$0xff]  }
 0x7b7   : > { %v2759_v20 = vpop.f32.mrf.mxu0  ;;  %5780 = vmatpush3.bf16.msra.mxu1 %v5918_v36 }
 0x7b8   : > { %vm2808_vm7 = vcmp.ge.f32.partialorder %v2759_v20, 0.0  ;;  %v2824_v42 = vmul.f32 0.2, %v2759_v20  ;;  %5773 = vmatprep.subr.bf16.mxu1 %v5919_v24  ;;  %v2842_v22 = vsel %vm2810_vm4, %v5699_v8, %v2826_v59 }
 0x7b9   : > { %v5702_v17 = vpop.f32.mrf.mxu0  ;;  %v2854_v40 = vpack.c.bf16 %v2842_v22, %v2841_v14 }
 0x7ba   : > { %v2840_v41 = vsel %vm2808_vm7, %v2759_v20, %v2824_v42  ;;  %v2829_v6 = vmul.f32 0.2, %v5702_v17  ;;  %vm2813_vm10 = vcmp.ge.f32.partialorder %v5702_v17, 0.0 }
 0x7bb   : > { %v2772_v16 = vpop.f32.mrf.mxu0  ;;  %v2853_v52 = vpack.c.bf16 %v2840_v41, %v2839_v51  ;;  %5781 = vmatpush3.bf16.msra.mxu1 %v5919_v24 }
 0x7bc   : > { %5774 = vmatprep.subr.bf16.mxu1 %v5920_v18  ;;  %v2827_v44 = vmul.f32 0.2, %v2772_v16  ;;  %vm2811_vm9 = vcmp.ge.f32.partialorder %v2772_v16, 0.0  ;;  %v2845_v36 = vsel %vm2813_vm10, %v5702_v17, %v2829_v6 }
 0x7bd   : > { %v5703_v49 = vpop.f32.mrf.mxu0  ;;  %5728 = vmatprep.mubr.bf16.mxu1 %v2853_v52 }
 0x7be   : > { %vm2814_vm8 = vcmp.ge.f32.partialorder %v5703_v49, 0.0  ;;  %v2830_v46 = vmul.f32 0.2, %v5703_v49  ;;  %5729 = vmatmul.mubr.bf16.gmra.mxu1 %v2854_v40  ;;  %v2843_v39 = vsel %vm2811_vm9, %v2772_v16, %v2827_v44 }
 0x7bf   : > { %v2775_v53 = vpop.f32.mrf.mxu0  ;;  %5782 = vmatpush3.bf16.msra.mxu1 %v5920_v18 }
 0x7c0   : > { %vm2812_vm11 = vcmp.ge.f32.partialorder %v2775_v53, 0.0  ;;  %v2828_v54 = vmul.f32 0.2, %v2775_v53  ;;  %5775 = vmatprep.subr.bf16.mxu1 %v6935_v29  ;;  %v2846_v55 = vsel %vm2814_vm8, %v5703_v49, %v2830_v46 }
 0x7c1   : > { %v5706_v57 = vpop.f32.mrf.mxu0  ;;  %v2856_v35 = vpack.c.bf16 %v2846_v55, %v2845_v36 }
 0x7c2   : > { %v2844_v30 = vsel %vm2812_vm11, %v2775_v53, %v2828_v54  ;;  %v2833_v56 = vmul.f32 0.2, %v5706_v57  ;;  %vm2817_vm14 = vcmp.ge.f32.partialorder %v5706_v57, 0.0 }
 0x7c3   : > { %v2788_v24 = vpop.f32.mrf.mxu0  ;;  %v2855_v10 = vpack.c.bf16 %v2844_v30, %v2843_v39  ;;  %5783 = vmatpush3.bf16.msra.mxu1 %v6935_v29 }
 0x7c4   : > { %5776 = vmatprep.subr.bf16.mxu1 %v6941_v4  ;;  %v2831_v18 = vmul.f32 0.2, %v2788_v24  ;;  %vm2815_vm13 = vcmp.ge.f32.partialorder %v2788_v24, 0.0  ;;  %v2849_v21 = vsel %vm2817_vm14, %v5706_v57, %v2833_v56 }
 0x7c5   : > { %v5707_v37 = vpop.f32.mrf.mxu0  ;;  %5732 = vmatprep.mubr.bf16.mxu1 %v2855_v10 }
 0x7c6   : > { %vm2818_vm12 = vcmp.ge.f32.partialorder %v5707_v37, 0.0  ;;  %v2834_v63 = vmul.f32 0.2, %v5707_v37  ;;  %5733 = vmatmul.mubr.bf16.gmra.mxu1 %v2856_v35  ;;  %v2847_v60 = vsel %vm2815_vm13, %v2788_v24, %v2831_v18 }
 0x7c7   : > { %v2791_v45 = vpop.f32.mrf.mxu0  ;;  %5784 = vmatpush3.bf16.msra.mxu1 %v6941_v4  ;;  %v5924_v4 = vld [vmem:[%s7875_s1 + $0x388] sm:$0xff]  }
 0x7c8   : > { %vm2816_vm15 = vcmp.ge.f32.partialorder %v2791_v45, 0.0  ;;  %v2832_v27 = vmul.f32 0.2, %v2791_v45  ;;  %v2850_v25 = vsel %vm2818_vm12, %v5707_v37, %v2834_v63  ;;  %5777 = vmatprep.subr.bf16.mxu1 %v5923_v5  ;;  %5752 = vmatprep.subr.bf16.mxu0 %v5924_v4 }
 0x7c9   : > { %v2858_v50 = vpack.c.bf16 %v2850_v25, %v2849_v21  ;;  %5753 = vmatpush3.bf16.msra.mxu0 %v5924_v4 }
 0x7ca   : > { %v2848_v29 = vsel %vm2816_vm15, %v2791_v45, %v2832_v27  ;;  %5754 = vmatprep.subr.bf16.mxu0 %v5925_v7 }
 0x7cb   : > { %v2857_v31 = vpack.c.bf16 %v2848_v29, %v2847_v60  ;;  %5785 = vmatpush3.bf16.msra.mxu1 %v5923_v5 }
 0x7cc   : > { %5778 = vmatprep.subr.bf16.mxu1 %v5924_v4 }
 0x7cd   : > { %5736 = vmatprep.mubr.bf16.mxu1 %v2857_v31  ;;  %5755 = vmatpush3.bf16.msra.mxu0 %v5925_v7 }
 0x7ce   : > { %5737 = vmatmul.mubr.bf16.gmra.mxu1 %v2858_v50 }
 0x7cf   : > { %5786 = vmatpush3.bf16.msra.mxu1 %v5924_v4 }
 0x7d0   : > { %5779 = vmatprep.subr.bf16.mxu1 %v5925_v7 }
 0x7d3   : > { %5787 = vmatpush3.bf16.msra.mxu1 %v5925_v7 }
 0x876   : > { %v5726_v32 = vpop.f32.mrf.mxu1 }
 0x877   : > { %v3039_v47 = vmul.f32 0.2, %v5726_v32  ;;  %vm3023_vm2 = vcmp.ge.f32.partialorder %v5726_v32, 0.0 }
 0x878   : > { %v2958_v15 = vpop.f32.mrf.mxu1 }
 0x879   : > { %v3037_v33 = vmul.f32 0.2, %v2958_v15  ;;  %vm3021_vm1 = vcmp.ge.f32.partialorder %v2958_v15, 0.0  ;;  %v3055_v14 = vsel %vm3023_vm2, %v5726_v32, %v3039_v47 }
 0x87a   : > { %v5727_v8 = vpop.f32.mrf.mxu1 }
 0x87b   : > { %vm3024_vm0 = vcmp.ge.f32.partialorder %v5727_v8, 0.0  ;;  %v3040_v59 = vmul.f32 0.2, %v5727_v8  ;;  %v3053_v51 = vsel %vm3021_vm1, %v2958_v15, %v3037_v33 }
 0x87c   : > { %v2961_v20 = vpop.f32.mrf.mxu1 }
 0x87d   : > { %vm3022_vm3 = vcmp.ge.f32.partialorder %v2961_v20, 0.0  ;;  %v3038_v42 = vmul.f32 0.2, %v2961_v20  ;;  %v3056_v22 = vsel %vm3024_vm0, %v5727_v8, %v3040_v59 }
 0x87e   : > { %v5730_v17 = vpop.f32.mrf.mxu1  ;;  %v3070_v40 = vpack.c.bf16 %v3056_v22, %v3055_v14  ;;  %v4212_v14 = vmul.f32 1.442695, %v6613_v48 }
 0x87f   : > { %v3054_v41 = vsel %vm3022_vm3, %v2961_v20, %v3038_v42  ;;  %v3043_v6 = vmul.f32 0.2, %v5730_v17  ;;  %vm3027_vm6 = vcmp.ge.f32.partialorder %v5730_v17, 0.0 }
 0x880   : > { %v2974_v16 = vpop.f32.mrf.mxu1  ;;  %v3069_v52 = vpack.c.bf16 %v3054_v41, %v3053_v51  ;;  %v4210_v41 = vmul.f32 1.442695, %v6605_v38  ;;  %v7199_v38 = vld [vmem:[%s6339_s24 + $0x8] sm:$0xff] }
 0x881   : > { %v3041_v44 = vmul.f32 0.2, %v2974_v16  ;;  %vm3025_vm5 = vcmp.ge.f32.partialorder %v2974_v16, 0.0  ;;  %v3059_v36 = vsel %vm3027_vm6, %v5730_v17, %v3043_v6  ;;  %8033 = vst [vmem:[#allocation60_spill] sm:$0xff] %v7199_v38 }
 0x882   : > { %v5731_v49 = vpop.f32.mrf.mxu1  ;;  %5756 = vmatprep.mubr.bf16.mxu0 %v3069_v52  ;;  %5978 = vpow2.f32 %v4210_v41 }
 0x883   : > { %vm3028_vm4 = vcmp.ge.f32.partialorder %v5731_v49, 0.0  ;;  %v3044_v46 = vmul.f32 0.2, %v5731_v49  ;;  %5757 = vmatmul.mubr.bf16.vlgmr.msra.gmra.mxu0 %v3070_v40  ;;  %v3057_v39 = vsel %vm3025_vm5, %v2974_v16, %v3041_v44  ;;  %v4218_v16 = vmul.f32 1.442695, %v6620_v58 }
 0x884   : > { %v2977_v53 = vpop.f32.mrf.mxu1  ;;  %5980 = vpow2.f32 %v4212_v14 }
 0x885   : > { %vm3026_vm7 = vcmp.ge.f32.partialorder %v2977_v53, 0.0  ;;  %v3042_v54 = vmul.f32 0.2, %v2977_v53  ;;  %v3060_v55 = vsel %vm3028_vm4, %v5731_v49, %v3044_v46  ;;  %5982 = vpow2.f32 %v4218_v16 }
 0x886   : > { %v5734_v57 = vpop.f32.mrf.mxu1  ;;  %v3072_v35 = vpack.c.bf16 %v3060_v55, %v3059_v36  ;;  %v4214_v36 = vmul.f32 1.442695, %v6624_v61  ;;  %v3239_v16 = vlaneseq }
 0x887   : > { %v3058_v30 = vsel %vm3026_vm7, %v2977_v53, %v3042_v54  ;;  %v3047_v56 = vmul.f32 0.2, %v5734_v57  ;;  %vm3031_vm10 = vcmp.ge.f32.partialorder %v5734_v57, 0.0 }
 0x888   : > { %v2990_v24 = vpop.f32.mrf.mxu1  ;;  %v3071_v10 = vpack.c.bf16 %v3058_v30, %v3057_v39 }
 0x889   : > { %v3045_v18 = vmul.f32 0.2, %v2990_v24  ;;  %vm3029_vm9 = vcmp.ge.f32.partialorder %v2990_v24, 0.0  ;;  %v3063_v31 = vsel %vm3031_vm10, %v5734_v57, %v3047_v56 }
 0x88a   : > { %v5735_v37 = vpop.f32.mrf.mxu1  ;;  %5760 = vmatprep.mubr.bf16.mxu0 %v3071_v10 }
 0x88b   : > { %vm3032_vm8 = vcmp.ge.f32.partialorder %v5735_v37, 0.0  ;;  %v3048_v63 = vmul.f32 0.2, %v5735_v37  ;;  %5761 = vmatmul.mubr.bf16.gmra.mxu0 %v3072_v35  ;;  %v3061_v29 = vsel %vm3029_vm9, %v2990_v24, %v3045_v18 }
 0x88c   : > { %v2993_v45 = vpop.f32.mrf.mxu1 }
 0x88d   : > { %vm3030_vm11 = vcmp.ge.f32.partialorder %v2993_v45, 0.0  ;;  %v3046_v27 = vmul.f32 0.2, %v2993_v45  ;;  %v3064_v25 = vsel %vm3032_vm8, %v5735_v37, %v3048_v63  ;;  %v4216_v63 = vmul.f32 1.442695, %v6629_v2 }
 0x88e   : > { %v5738_v60 = vpop.f32.mrf.mxu1  ;;  %v3074_v4 = vpack.c.bf16 %v3064_v25, %v3063_v31 }
 0x88f   : > { %v3062_v21 = vsel %vm3030_vm11, %v2993_v45, %v3046_v27  ;;  %v3051_v8 = vmul.f32 0.2, %v5738_v60  ;;  %vm3035_vm14 = vcmp.ge.f32.partialorder %v5738_v60, 0.0  ;;  %v5979_v45 = vpop.eup %5978 }
 0x890   : > { %v3006_v50 = vpop.f32.mrf.mxu1  ;;  %v3073_v5 = vpack.c.bf16 %v3062_v21, %v3061_v29 }
 0x891   : > { %v3049_v32 = vmul.f32 0.2, %v3006_v50  ;;  %vm3033_vm13 = vcmp.ge.f32.partialorder %v3006_v50, 0.0  ;;  %v3067_v22 = vsel %vm3035_vm14, %v5738_v60, %v3051_v8  ;;  %v5981_v25 = vpop.eup %5980 }
 0x892   : > { %v5739_v7 = vpop.f32.mrf.mxu1  ;;  %5764 = vmatprep.mubr.bf16.mxu1 %v3073_v5  ;;  %v6993_v21 = vpop.eup %5982 }
 0x893   : > { %vm3036_vm12 = vcmp.ge.f32.partialorder %v5739_v7, 0.0  ;;  %v3052_v15 = vmul.f32 0.2, %v5739_v7  ;;  %5765 = vmatmul.mubr.bf16.vlgmr.msra.gmra.mxu1 %v3074_v4  ;;  %v3065_v20 = vsel %vm3033_vm13, %v3006_v50, %v3049_v32 }
 0x894   : > { %v3009_v33 = vpop.f32.mrf.mxu1 }
 0x895   : > { %vm3034_vm15 = vcmp.ge.f32.partialorder %v3009_v33, 0.0  ;;  %v3050_v59 = vmul.f32 0.2, %v3009_v33  ;;  %v3068_v47 = vsel %vm3036_vm12, %v5739_v7, %v3052_v15 }
 0x896   : > { %v3076_v51 = vpack.c.bf16 %v3068_v47, %v3067_v22 }
 0x897   : > { %v3066_v42 = vsel %vm3034_vm15, %v3009_v33, %v3050_v59 }
 0x898   : > { %v3075_v17 = vpack.c.bf16 %v3066_v42, %v3065_v20  ;;  %v4220_v42 = vmul.f32 1.442695, %v6626_v0 }
 0x89a   : > { %5768 = vmatprep.mubr.bf16.mxu1 %v3075_v17 }
 0x89b   : > { %5769 = vmatmul.mubr.bf16.gmra.mxu1 %v3076_v51 }
 0x943   : > { %v6962_v52 = vpop.f32.mrf.mxu0 }
 0x944   : > { %8003 = vst [vmem:[#allocation30_spill] sm:$0xff] %v6962_v52  ;;  %v5020_v40 = vmul.f32 -1.442695, %v6962_v52  ;;  %v3471_v49 = vmul.f32 1.442695, %v6962_v52 }
 0x945   : > { %v6966_v44 = vpop.f32.mrf.mxu0 }
 0x946   : > { %8004 = vst [vmem:[#allocation31_spill] sm:$0xff] %v6966_v44  ;;  %5984 = vpow2.f32 %v5020_v40  ;;  %v5018_v46 = vmul.f32 -1.442695, %v6966_v44  ;;  %v3467_v6 = vmul.f32 1.442695, %v6966_v44 }
 0x947   : > { %5986 = vpow2.f32 %v3471_v49  ;;  %v6970_v53 = vpop.f32.mrf.mxu0 }
 0x948   : > { %8005 = vst [vmem:[#allocation32_spill] sm:$0xff] %v6970_v53  ;;  %5988 = vpow2.f32 %v5018_v46  ;;  %v5021_v54 = vmul.f32 -1.442695, %v6970_v53  ;;  %v3473_v55 = vmul.f32 1.442695, %v6970_v53 }
 0x949   : > { %5990 = vpow2.f32 %v3467_v6  ;;  %v6974_v57 = vpop.f32.mrf.mxu0 }
 0x94a   : > { %8006 = vst [vmem:[#allocation33_spill] sm:$0xff] %v6974_v57  ;;  %5992 = vpow2.f32 %v5021_v54  ;;  %v5019_v39 = vmul.f32 -1.442695, %v6974_v57  ;;  %v3469_v30 = vmul.f32 1.442695, %v6974_v57 }
 0x94b   : > { %5994 = vpow2.f32 %v3473_v55  ;;  %v6979_v24 = vpop.f32.mrf.mxu0 }
 0x94c   : > { %8007 = vst [vmem:[#allocation34_spill] sm:$0xff] %v6979_v24  ;;  %5996 = vpow2.f32 %v5019_v39  ;;  %v5024_v10 = vmul.f32 -1.442695, %v6979_v24  ;;  %v3479_v35 = vmul.f32 1.442695, %v6979_v24 }
 0x94d   : > { %5998 = vpow2.f32 %v3469_v30  ;;  %v6983_v37 = vpop.f32.mrf.mxu0  ;;  %v4232_v39 = vadd.f32 1e-08, %v5979_v45  ;;  %v4233_v45 = vadd.f32 1e-08, %v5981_v25 }
 0x94e   : > { %8008 = vst [vmem:[#allocation35_spill] sm:$0xff] %v6983_v37  ;;  %6000 = vpow2.f32 %v5024_v10  ;;  %v5022_v18 = vmul.f32 -1.442695, %v6983_v37  ;;  %v3475_v60 = vmul.f32 1.442695, %v6983_v37 }
 0x94f   : > { %6002 = vpow2.f32 %v4214_v36  ;;  %v6987_v56 = vpop.f32.mrf.mxu0 }
 0x950   : > { %8009 = vst [vmem:[#allocation36_spill] sm:$0xff] %v6987_v56  ;;  %6004 = vpow2.f32 %v5022_v18  ;;  %v5025_v27 = vmul.f32 -1.442695, %v6987_v56  ;;  %v3481_v8 = vmul.f32 1.442695, %v6987_v56 }
 0x951   : > { %6006 = vpow2.f32 %v3479_v35  ;;  %v6991_v29 = vpop.f32.mrf.mxu0  ;;  %v7008_v35 = vand.u32 127, %v3239_v16 }
 0x952   : > { %8010 = vst [vmem:[#allocation37_spill] sm:$0xff] %v6991_v29  ;;  %6008 = vpow2.f32 %v5025_v27  ;;  %v5023_v31 = vmul.f32 -1.442695, %v6991_v29  ;;  %v3477_v40 = vmul.f32 1.442695, %v6991_v29 }
 0x953   : > { %v5985_v50 = vpop.eup %5984  ;;  %6010 = vpow2.f32 %v4216_v63  ;;  %v6996_v5 = vpop.f32.mrf.mxu1  ;;  %8013 = vst [vmem:[#allocation40_spill] sm:$0xff] %v7008_v35  ;;  %vm3242_vm0 = vcmp.lt.s32.totalorder %v7008_v35, 4  ;;  %vm3241_vm1 = vcmp.eq.s32.totalorder %v7008_v35, 0  ;;  %vm4068_vm3 = vcmp.ge.s32.totalorder %v7008_v35, 1 }
 0x954   : > { %8011 = vst [vmem:[#allocation38_spill] sm:$0xff] %v6996_v5  ;;  %v5987_v4 = vpop.eup %5986  ;;  %v3293_v7 = vadd.f32 1.0, %v5985_v50  ;;  %6012 = vpow2.f32 %v5023_v31  ;;  %v5028_v32 = vmul.f32 -1.442695, %v6996_v5  ;;  %v3487_v18 = vmul.f32 1.442695, %v6996_v5  ;;  %vm7345_vm8 = vmand %vm4068_vm3, %vm3242_vm0 }
 0x955   : > { %v5989_v15 = vpop.eup %5988  ;;  %6014 = vpow2.f32 %v3475_v60  ;;  %v3501_v33 = vadd.f32 1e-08, %v5987_v4  ;;  %v7002_v41 = vpop.f32.mrf.mxu1 }
 0x956   : > { %v5991_v59 = vpop.eup %5990  ;;  %6016 = vrcp.f32 %v3293_v7  ;;  %v3291_v47 = vadd.f32 1.0, %v5989_v15  ;;  %8012 = vst [vmem:[#allocation39_spill] sm:$0xff] %v7002_v41  ;;  %v5026_v55 = vmul.f32 -1.442695, %v7002_v41  ;;  %v4259_v4 = vpop.permute.xlu1 %4258  ;;  %v3483_v15 = vmul.f32 1.442695, %v7002_v41 }
 0x957   : > { %v5993_v20 = vpop.eup %5992  ;;  %6018 = vpow2.f32 %v5028_v32  ;;  %3535 = vrot.lane.b32.xlu1 %v3501_v33, %s6288_s23  ;;  %v3499_v22 = vadd.f32 1e-08, %v5991_v59 }
 0x958   : > { %v5995_v17 = vpop.eup %5994  ;;  %6020 = vrcp.f32 %v3291_v47  ;;  %v3294_v51 = vadd.f32 1.0, %v5993_v20  ;;  %v4255_v47 = vpop.permute.xlu0 %4254 }
 0x959   : > { %v5997_v14 = vpop.eup %5996  ;;  %6022 = vpow2.f32 %v3481_v8  ;;  %3531 = vrot.lane.b32.xlu0 %v3499_v22, %s6288_s23  ;;  %v3502_v49 = vadd.f32 1e-08, %v5995_v17  ;;  %v7015_v8 = vpop.f32.mrf.mxu1 }
 0x95a   : > { %v5999_v46 = vpop.eup %5998  ;;  %6024 = vrcp.f32 %v3294_v51  ;;  %v3292_v6 = vadd.f32 1.0, %v5997_v14  ;;  %8014 = vst [vmem:[#allocation41_spill] sm:$0xff] %v7015_v8 }
 0x95b   : > { %v6001_v54 = vpop.eup %6000  ;;  %6026 = vpow2.f32 %v4220_v42  ;;  %3537 = vrot.lane.b32.xlu1 %v3502_v49, %s6288_s23  ;;  %v3500_v63 = vadd.f32 1e-08, %v5999_v46 }
 0x95c   : > { %v6003_v30 = vpop.eup %6002  ;;  %6028 = vrcp.f32 %v3292_v6  ;;  %v3297_v36 = vadd.f32 1.0, %v6001_v54  ;;  %v4261_v6 = vpop.permute.xlu1 %4260 }
 0x95d   : > { %v6005_v10 = vpop.eup %6004  ;;  %6030 = vpow2.f32 %v3477_v40  ;;  %4274 = vrot.lane.b32.xlu0 %v4232_v39, %s6287_s19  ;;  %v4234_v42 = vadd.f32 1e-08, %v6003_v30  ;;  %v7034_v40 = vpop.f32.mrf.mxu1  ;;  %v5029_v39 = vmul.f32 -1.442695, %v7015_v8 }
 0x95e   : > { %v6007_v27 = vpop.eup %6006  ;;  %6032 = vrcp.f32 %v3297_v36  ;;  %v3295_v60 = vadd.f32 1.0, %v6005_v10  ;;  %8016 = vst [vmem:[#allocation43_spill] sm:$0xff] %v7034_v40 }
 0x95f   : > { %v6009_v31 = vpop.eup %6008  ;;  %6034 = vpow2.f32 %v5026_v55  ;;  %3533 = vrot.lane.b32.xlu1 %v3500_v63, %s6288_s23  ;;  %v3505_v33 = vadd.f32 1e-08, %v6007_v27  ;;  %v4257_v63 = vpop.permute.xlu0 %4256 }
 0x960   : > { %v6011_v50 = vpop.eup %6010  ;;  %6036 = vrcp.f32 %v3295_v60  ;;  %v3298_v7 = vadd.f32 1.0, %v6009_v31  ;;  %v3489_v60 = vmul.f32 1.442695, %v7015_v8  ;;  %v5027_v31 = vmul.f32 -1.442695, %v7034_v40 }
 0x961   : > { %v6013_v32 = vpop.eup %6012  ;;  %6038 = vpow2.f32 %v3487_v18  ;;  %4276 = vrot.lane.b32.xlu0 %v4233_v45, %s6287_s19  ;;  %v4235_v10 = vadd.f32 1e-08, %v6011_v50 }
 0x962   : > { %v6015_v59 = vpop.eup %6014  ;;  %6040 = vrcp.f32 %v3298_v7  ;;  %v3296_v25 = vadd.f32 1.0, %v6013_v32 }
 0x963   : > { %v6017_v20 = vpop.eup %6016  ;;  %3543 = vrot.lane.b32.xlu1 %v3505_v33, %s6288_s23  ;;  %v3503_v49 = vadd.f32 1e-08, %v6015_v59 }
 0x964   : > { %v6019_v22 = vpop.eup %6018  ;;  %v3341_v17 = vsel %vm3242_vm0, %v6017_v20, 0.0  ;;  %6042 = vrcp.f32 %v3296_v25 }
 0x965   : > { %v6021_v51 = vpop.eup %6020  ;;  %v7032_v14 = vsel %vm3241_vm1, %v6962_v52, %v3341_v17  ;;  %v3301_v16 = vadd.f32 1.0, %v6019_v22  ;;  %6044 = vpow2.f32 %v3483_v15  ;;  %4278 = vrot.lane.b32.xlu0 %v4234_v42, %s6287_s19  ;;  %v4236_v42 = vadd.f32 1e-08, %v6993_v21  ;;  %v7079_v21 = vpop.f32.mrf.mxu1 }
 0x966   : > { %8015 = vst [vmem:[#allocation42_spill] sm:$0xff] %v7032_v14  ;;  %v6023_v46 = vpop.eup %6022  ;;  %6046 = vrcp.f32 %v4259_v4  ;;  %3373 = vst [vmem:[%s7024_s27 + $0x10] sm:$0xff] %v7032_v14  ;;  %v3846_v54 = vand.u32 2147483647, %v7032_v14  ;;  %v3339_v55 = vsel %vm3242_vm0, %v6021_v51, 0.0 }
 0x967   : > { %v6025_v30 = vpop.eup %6024  ;;  %v7046_v36 = vsel %vm3241_vm1, %v6966_v44, %v3339_v55  ;;  %6048 = vrcp.f32 %v3301_v16  ;;  %3539 = vrot.lane.b32.xlu1 %v3503_v49, %s6288_s23  ;;  %v3506_v50 = vadd.f32 1e-08, %v6023_v46  ;;  %v3485_v16 = vmul.f32 1.442695, %v7034_v40  ;;  %8020 = vst [vmem:[#allocation47_spill] sm:$0xff] %v7079_v21 }
 0x968   : > { %8017 = vst [vmem:[#allocation44_spill] sm:$0xff] %v7046_v36  ;;  %v6027_v18 = vpop.eup %6026  ;;  %6050 = vrcp.f32 %v4255_v47  ;;  %v3862_v27 = vsub.f32 0.0, %v3846_v54  ;;  %3371 = vst [vmem:[%s7024_s27] sm:$0xff] %v7046_v36  ;;  %v3844_v4 = vand.u32 2147483647, %v7046_v36  ;;  %v3342_v7 = vsel %vm3242_vm0, %v6025_v30, 0.0 }
 0x969   : > { %v6029_v45 = vpop.eup %6028  ;;  %6052 = vrcp.f32 %v4261_v6  ;;  %4280 = vrot.lane.b32.xlu0 %v4235_v10, %s6287_s19  ;;  %v7060_v33 = vsel %vm3241_vm1, %v6970_v53, %v3342_v7  ;;  %v7186_v53 = vld [vmem:[%s6339_s24] sm:$0xff] }
 0x96a   : > { %v6031_v32 = vpop.eup %6030  ;;  %v3880_v15 = vmul.f32 1.442695, %v3862_v27  ;;  %8018 = vst [vmem:[#allocation45_spill] sm:$0xff] %v7060_v33  ;;  %v3340_v59 = vsel %vm3242_vm0, %v6029_v45, 0.0  ;;  %6054 = vpow2.f32 %v5029_v39  ;;  %v3860_v25 = vsub.f32 0.0, %v3844_v4  ;;  %3374 = vst [vmem:[%s7024_s27 + $0x18] sm:$0xff] %v7060_v33  ;;  %v4267_v4 = vpop.permute.xlu0 %4266 }
 0x96b   : > { %v6033_v47 = vpop.eup %6032  ;;  %6056 = vrcp.f32 %v4257_v63  ;;  %v3847_v20 = vand.u32 2147483647, %v7060_v33  ;;  %3545 = vrot.lane.b32.xlu1 %v3506_v50, %s6288_s23  ;;  %v7072_v17 = vsel %vm3241_vm1, %v6974_v57, %v3340_v59  ;;  %v3504_v54 = vadd.f32 1e-08, %v6031_v32  ;;  %8031 = vst [vmem:[#allocation58_spill] sm:$0xff] %v7186_v53 }
 0x96c   : > { %v6035_v22 = vpop.eup %6034  ;;  %6058 = vpow2.f32 %v3880_v15  ;;  %8019 = vst [vmem:[#allocation46_spill] sm:$0xff] %v7072_v17  ;;  %v3345_v51 = vsel %vm3242_vm0, %v6033_v47, 0.0  ;;  %v3876_v46 = vmul.f32 1.442695, %v3860_v25  ;;  %3372 = vst [vmem:[%s7024_s27 + $0x8] sm:$0xff] %v7072_v17  ;;  %v7101_v15 = vpop.f32.mrf.mxu1  ;;  %v3812_v57 = vmul.f32 %v7186_v53, %v7046_v36 }
 0x96d   : > { %v6037_v49 = vpop.eup %6036  ;;  %v3863_v6 = vsub.f32 0.0, %v3847_v20  ;;  %6060 = vpow2.f32 %v3489_v60  ;;  %4282 = vrot.lane.b32.xlu0 %v4236_v42, %s6287_s19  ;;  %v3845_v39 = vand.u32 2147483647, %v7072_v17  ;;  %v7086_v30 = vsel %vm3241_vm1, %v6979_v24, %v3345_v51  ;;  %8023 = vst [vmem:[#allocation50_spill] sm:$0xff] %v7101_v15 }
 0x96e   : > { %v6039_v55 = vpop.eup %6038  ;;  %8021 = vst [vmem:[#allocation48_spill] sm:$0xff] %v7086_v30  ;;  %v3343_v10 = vsel %vm3242_vm0, %v6037_v49, 0.0  ;;  %6062 = vpow2.f32 %v5027_v31  ;;  %3377 = vst [vmem:[%s7024_s27 + $0x30] sm:$0xff] %v7086_v30  ;;  %v3299_v60 = vadd.f32 1.0, %v6035_v22  ;;  %v4237_v45 = vadd.f32 1e-08, %v6027_v18 }
 0x96f   : > { %v6041_v63 = vpop.eup %6040  ;;  %6064 = vpow2.f32 %v3876_v46  ;;  %v3882_v27 = vmul.f32 1.442695, %v3863_v6  ;;  %3541 = vrot.lane.b32.xlu1 %v3504_v54, %s6288_s23  ;;  %v3861_v7 = vsub.f32 0.0, %v3845_v39  ;;  %v3850_v50 = vand.u32 2147483647, %v7086_v30 }
 0x970   : > { %v7097_v32 = vsel %vm3241_vm1, %v6983_v37, %v3343_v10  ;;  %6066 = vpow2.f32 %v3485_v16  ;;  %v3509_v18 = vadd.f32 1e-08, %v6039_v55  ;;  %v3346_v42 = vsel %vm3242_vm0, %v6041_v63, 0.0  ;;  %v7129_v63 = vpop.f32.mrf.mxu1 }
 0x971   : > { %8022 = vst [vmem:[#allocation49_spill] sm:$0xff] %v7097_v32  ;;  %v6043_v31 = vpop.eup %6042  ;;  %6068 = vpow2.f32 %v3882_v27  ;;  %3375 = vst [vmem:[%s7024_s27 + $0x20] sm:$0xff] %v7097_v32  ;;  %4284 = vrot.lane.b32.xlu0 %v4237_v45, %s6287_s19  ;;  %v3878_v47 = vmul.f32 1.442695, %v3861_v7  ;;  %v3866_v25 = vsub.f32 0.0, %v3850_v50  ;;  %v7112_v51 = vsel %vm3241_vm1, %v6987_v56, %v3346_v42  ;;  %v4263_v45 = vpop.permute.xlu0 %4262 }
 0x972   : > { %v6045_v59 = vpop.eup %6044  ;;  %v3848_v20 = vand.u32 2147483647, %v7097_v32  ;;  %v3344_v16 = vsel %vm3242_vm0, %v6043_v31, 0.0  ;;  %6070 = vrcp.f32 %v3299_v60  ;;  %3378 = vst [vmem:[%s7024_s27 + $0x38] sm:$0xff] %v7112_v51  ;;  %v3851_v55 = vand.u32 2147483647, %v7112_v51 }
 0x973   : > { %v7107_v22 = vpop.eup %6046  ;;  %3551 = vrot.lane.b32.xlu1 %v3509_v18, %s6288_s23  ;;  %6072 = vpow2.f32 %v3878_v47  ;;  %v3888_v46 = vmul.f32 1.442695, %v3866_v25  ;;  %v7125_v39 = vsel %vm3241_vm1, %v6991_v29, %v3344_v16  ;;  %8025 = vst [vmem:[#allocation52_spill] sm:$0xff] %v7129_v63  ;;  %v3507_v27 = vadd.f32 1e-08, %v6045_v59  ;;  %v7177_v29 = vld [vmem:[%s6339_s24 + $0x10] sm:$0xff] }
 0x974   : > { %8024 = vst [vmem:[#allocation51_spill] sm:$0xff] %v7107_v22  ;;  %v6049_v49 = vpop.eup %6048  ;;  %v3864_v6 = vsub.f32 0.0, %v3848_v20  ;;  %3376 = vst [vmem:[%s7024_s27 + $0x28] sm:$0xff] %v7125_v39  ;;  %v5032_v50 = vmul.f32 -1.442695, %v7079_v21  ;;  %v3867_v18 = vsub.f32 0.0, %v3851_v55  ;;  %v3814_v56 = vmul.f32 %v7177_v29, %v7032_v14 }
 0x975   : > { %v7119_v54 = vpop.eup %6050  ;;  %v3349_v10 = vsel %vm3242_vm0, %v6049_v49, 0.0  ;;  %6074 = vpow2.f32 %v3888_v46  ;;  %v3849_v47 = vand.u32 2147483647, %v7125_v39  ;;  %v7150_v16 = vmul.f32 1.442695, %v7079_v21  ;;  %v7152_v49 = vpop.f32.mrf.mxu1  ;;  %8030 = vst [vmem:[#allocation57_spill] sm:$0xff] %v7177_v29 }
 0x976   : > { %v7131_v60 = vpop.eup %6052  ;;  %v3884_v7 = vmul.f32 1.442695, %v3864_v6  ;;  %6076 = vrcp.f32 %v4267_v4  ;;  %v7140_v25 = vsel %vm3241_vm1, %v6996_v5, %v3349_v10  ;;  %v3890_v42 = vmul.f32 1.442695, %v3867_v18  ;;  %8029 = vst [vmem:[#allocation56_spill] sm:$0xff] %v7152_v49  ;;  %v7222_v29 = vld [vmem:[%s6339_s24 + $0x20] sm:$0xff] }
 0x977   : > { %8026 = vst [vmem:[#allocation53_spill] sm:$0xff] %v7131_v60  ;;  %v6055_v31 = vpop.eup %6054  ;;  %8027 = vst [vmem:[#allocation54_spill] sm:$0xff] %v7140_v25  ;;  %3547 = vrot.lane.b32.xlu1 %v3507_v27, %s6288_s23  ;;  %v3865_v4 = vsub.f32 0.0, %v3849_v47  ;;  %v7156_v10 = vmul.f32 -1.442695, %v7101_v15  ;;  %v3796_v24 = vmax.f32 %v7046_v36, 0.0 }
 0x978   : > { %v7143_v59 = vpop.eup %6056  ;;  %6078 = vpow2.f32 %v3884_v7  ;;  %3381 = vst [vmem:[%s7024_s27 + $0x50] sm:$0xff] %v7140_v25  ;;  %v3302_v55 = vadd.f32 1.0, %v6055_v31  ;;  %v7162_v18 = vmul.f32 -1.442695, %v7129_v63  ;;  %v7167_v5 = vmul.f32 1.442695, %v7129_v63 }
 0x979   : > { %8028 = vst [vmem:[#allocation55_spill] sm:$0xff] %v7143_v59  ;;  %v7147_v20 = vpop.eup %6058  ;;  %6080 = vrcp.f32 %v4263_v45  ;;  %v3886_v7 = vmul.f32 1.442695, %v3865_v4  ;;  %v7159_v45 = vmul.f32 1.442695, %v7101_v15  ;;  %v3798_v4 = vmax.f32 %v7032_v14, 0.0 }
 0x97a   : > { %v6061_v46 = vpop.eup %6060  ;;  %v3926_v6 = vadd.f32 1.0, %v7147_v20  ;;  %6082 = vpow2.f32 %v5032_v50  ;;  %v7170_v50 = vmul.f32 -1.442695, %v7152_v49  ;;  %v7173_v31 = vmul.f32 1.442695, %v7152_v49  ;;  %8035 = vst [vmem:[#allocation62_spill] sm:$0xff] %v7222_v29 }
 0x97b   : > { %v6063_v27 = vpop.eup %6062  ;;  %6084 = vpow2.f32 %v3890_v42  ;;  %v3510_v44 = vadd.f32 1e-08, %v6061_v46  ;;  %v3799_v52 = vmax.f32 %v7060_v33, 0.0  ;;  %v3797_v48 = vmax.f32 %v7072_v17, 0.0 }
 0x97c   : > { %v7164_v47 = vpop.eup %6064  ;;  %6086 = vlog2.f32 %v3926_v6  ;;  %v3300_v58 = vadd.f32 1.0, %v6063_v27  ;;  %v3813_v46 = vmul.f32 %v7199_v38, %v7072_v17  ;;  %v7208_v27 = vld [vmem:[%s6339_s24 + $0x30] sm:$0xff]  ;;  %v3854_v53 = vand.u32 2147483647, %v7140_v25 }
 0x97d   : > { %v6067_v42 = vpop.eup %6066  ;;  %v3908_v6 = vadd.f32 1.0, %v7164_v47  ;;  %6088 = vpow2.f32 %v3886_v7  ;;  %v7193_v7 = vld [vmem:[%s6339_s24 + $0x18] sm:$0xff]  ;;  %3553 = vrot.lane.b32.xlu1 %v3510_v44, %s6288_s23  ;;  %8034 = vst [vmem:[#allocation61_spill] sm:$0xff] %v7208_v27  ;;  %v3818_v36 = vmul.f32 %v7208_v27, %v7086_v30  ;;  %v3929_v17 = vmul.f32 -0.5, %v7147_v20 }
 0x97e   : > { %v7182_v37 = vpop.eup %6068  ;;  %6090 = vrcp.f32 %v3302_v55  ;;  %8032 = vst [vmem:[#allocation59_spill] sm:$0xff] %v7193_v7  ;;  %v3815_v61 = vmul.f32 %v7193_v7, %v7060_v33  ;;  %v3802_v55 = vmax.f32 %v7086_v30, 0.0  ;;  %v3800_v44 = vmax.f32 %v7097_v32, 0.0 }
 0x97f   : > { %6092 = vlog2.f32 %v3908_v6  ;;  %v3935_v0 = vadd.f32 1.0, %v7182_v37  ;;  %v6071_v2 = vpop.eup %6070  ;;  %v3508_v7 = vadd.f32 1e-08, %v6067_v42  ;;  %v3816_v30 = vmul.f32 %v7222_v29, %v7097_v32 }
 0x980   : > { %v7205_v6 = vpop.eup %6072  ;;  %v3347_v33 = vsel %vm3242_vm0, %v6071_v2, 0.0  ;;  %v7233_v49 = vsub.f32 %v3798_v4, %v3814_v56  ;;  %v7235_v42 = vsub.f32 %v3796_v24, %v3812_v57  ;;  %v3932_v29 = vand.u32 2147483647, %v7147_v20 }
 0x981   : > { %6094 = vlog2.f32 %v3935_v0  ;;  %v3917_v38 = vadd.f32 1.0, %v7205_v6  ;;  %v3911_v0 = vmul.f32 -0.5, %v7164_v47  ;;  %v7229_v2 = vsel %vm3241_vm1, %v7002_v41, %v3347_v33  ;;  %3549 = vrot.lane.b32.xlu1 %v3508_v7, %s6288_s23 }
 0x982   : > { %v7218_v14 = vpop.eup %6074  ;;  %8036 = vst [vmem:[#allocation63_spill] sm:$0xff] %v7229_v2  ;;  %6096 = vrcp.f32 %v3300_v58  ;;  %3379 = vst [vmem:[%s7024_s27 + $0x40] sm:$0xff] %v7229_v2  ;;  %v7244_v33 = vsub.f32 %v3799_v52, %v3815_v61  ;;  %v7246_v58 = vsub.f32 %v3797_v48, %v3813_v46  ;;  %v3870_v41 = vsub.f32 0.0, %v3854_v53 }
 0x983   : > { %v7231_v27 = vpop.eup %6076  ;;  %6098 = vlog2.f32 %v3917_v38  ;;  %v3962_v63 = vadd.f32 1.0, %v7218_v14  ;;  %v3930_v57 = vadd.f32 1.0, %v3929_v17  ;;  %v3938_v38 = vmul.f32 -0.5, %v7182_v37 }
 0x984   : > { %8037 = vst [vmem:[#allocation64_spill] sm:$0xff] %v7231_v27  ;;  %v3912_v7 = vadd.f32 1.0, %v3911_v0  ;;  %v3914_v15 = vand.u32 2147483647, %v7164_v47  ;;  %v7253_v25 = vsub.f32 %v3802_v55, %v3818_v36  ;;  %v7255_v61 = vsub.f32 %v3800_v44, %v3816_v30  ;;  %v7269_v30 = vld [vmem:[%s6339_s24 + $0x28] sm:$0xff] }
 0x985   : > { %v7241_v32 = vpop.eup %6078  ;;  %6100 = vlog2.f32 %v3962_v63  ;;  %v3941_v52 = vand.u32 2147483647, %v7182_v37  ;;  %v3920_v53 = vmul.f32 -0.5, %v7205_v6  ;;  %v3852_v17 = vand.u32 2147483647, %v7229_v2  ;;  %8041 = vst [vmem:[#allocation66_spill] sm:$0xff] %v7269_v30 }
 0x986   : > { %v7248_v56 = vpop.eup %6080  ;;  %v3944_v24 = vadd.f32 1.0, %v7241_v32  ;;  %vm7262_vm2 = vcmp.lt.f32.partialorder %v3932_v29, 0.0004427343  ;;  %v3965_v0 = vmul.f32 -0.5, %v7218_v14  ;;  %v7273_v55 = vmul.f32 %v7269_v30, %v7125_v39 }
 0x987   : > { %8038 = vst [vmem:[#allocation65_spill] sm:$0xff] %v7248_v56  ;;  %v6083_v4 = vpop.eup %6082  ;;  %v3939_v60 = vadd.f32 1.0, %v3938_v38  ;;  %v7278_v59 = vmul.f32 1.442695, %v3870_v41  ;;  %vm7281_vm4 = vcmp.lt.f32.partialorder %v3914_v15, 0.0004427343 }
 0x988   : > { %v7257_v48 = vpop.eup %6084  ;;  %6102 = vlog2.f32 %v3944_v24  ;;  %v3931_v24 = vmul.f32 %v7147_v20, %v3930_v57  ;;  %v3305_v29 = vadd.f32 1.0, %v6083_v4  ;;  %v3923_v36 = vand.u32 2147483647, %v7205_v6 }
 0x989   : > { %v6087_v63 = vpop.eup %6086  ;;  %v3947_v30 = vmul.f32 -0.5, %v7241_v32  ;;  %v3913_v20 = vmul.f32 %v7164_v47, %v3912_v7  ;;  %vm7289_vm5 = vcmp.lt.f32.partialorder %v3941_v52, 0.0004427343  ;;  %v3921_v57 = vadd.f32 1.0, %v3920_v53 }
 0x98a   : > { %v7275_v44 = vpop.eup %6088  ;;  %v3868_v38 = vsub.f32 0.0, %v3852_v17  ;;  %v3966_v15 = vadd.f32 1.0, %v3965_v0  ;;  %v3950_v56 = vand.u32 2147483647, %v7241_v32  ;;  %v3928_v34 = vmul.f32 0.6931472, %v6087_v63 }
 0x98b   : > { %v6091_v27 = vpop.eup %6090  ;;  %v3953_v19 = vadd.f32 1.0, %v7275_v44  ;;  %v3940_v11 = vmul.f32 %v7182_v37, %v3939_v60  ;;  %vm7297_vm6 = vcmp.lt.f32.partialorder %v3923_v36, 0.0004427343  ;;  %v3948_v52 = vadd.f32 1.0, %v3947_v30 }
 0x98c   : > { %v6093_v26 = vpop.eup %6092  ;;  %v3892_v22 = vmul.f32 1.442695, %v3868_v38  ;;  %v3350_v47 = vsel %vm3242_vm0, %v6091_v27, 0.0  ;;  %v3968_v17 = vand.u32 2147483647, %v7218_v14  ;;  %v3922_v63 = vmul.f32 %v7205_v6, %v3921_v57 }
 0x98d   : > { %v3910_v4 = vmul.f32 0.6931472, %v6093_v26  ;;  %6104 = vlog2.f32 %v3953_v19  ;;  %v3971_v26 = vadd.f32 1.0, %v7257_v48  ;;  %v7305_v53 = vsel %vm3241_vm1, %v7015_v8, %v3350_v47 }
 0x98e   : > { %v6095_v2 = vpop.eup %6094  ;;  %6106 = vpow2.f32 %v3892_v22  ;;  %3382 = vst [vmem:[%s7024_s27 + $0x58] sm:$0xff] %v7305_v53  ;;  %v3967_v0 = vmul.f32 %v7218_v14, %v3966_v15  ;;  %v3855_v36 = vand.u32 2147483647, %v7305_v53  ;;  %v3934_v1 = vsel %vm7262_vm2, %v3931_v24, %v3928_v34 }
 0x98f   : > { %v6097_v19 = vpop.eup %6096  ;;  %v3916_v37 = vsel %vm7281_vm4, %v3913_v20, %v3910_v4  ;;  %v3937_v60 = vmul.f32 0.6931472, %v6095_v2  ;;  %vm7319_vm7 = vcmp.lt.f32.partialorder %v3950_v56, 0.0004427343  ;;  %v3949_v57 = vmul.f32 %v7241_v32, %v3948_v52 }
 0x990   : > { %v6099_v27 = vpop.eup %6098  ;;  %v3348_v30 = vsel %vm3242_vm0, %v6097_v19, 0.0  ;;  %v4052_v14 = vadd.f32 %v3916_v37, %v7235_v42  ;;  %6108 = vlog2.f32 %v3971_v26  ;;  %v3956_v38 = vmul.f32 -0.5, %v7275_v44  ;;  %v4269_v26 = vpop.permute.xlu0 %4268 }
 0x991   : > { %v3919_v2 = vmul.f32 0.6931472, %v6099_v27  ;;  %v7326_v22 = vsel %vm3241_vm1, %v7034_v40, %v3348_v30  ;;  %v3943_v34 = vsel %vm7289_vm5, %v3940_v11, %v3937_v60  ;;  %v3959_v46 = vand.u32 2147483647, %v7275_v44  ;;  %v8079_v40 = vld [vmem:[#allocation52_spill] sm:$0xff] }
 0x992   : > { %v6101_v6 = vpop.eup %6100  ;;  %3380 = vst [vmem:[%s7024_s27 + $0x48] sm:$0xff] %v7326_v22  ;;  %v3853_v24 = vand.u32 2147483647, %v7326_v22  ;;  %v4054_v42 = vadd.f32 %v3934_v1, %v7233_v49  ;;  %v3871_v15 = vsub.f32 0.0, %v3855_v36  ;;  %6110 = vrcp.f32 %v3305_v29 }
 0x993   : > { %v3925_v56 = vsel %vm7297_vm6, %v3922_v63, %v3919_v2  ;;  %v3964_v41 = vmul.f32 0.6931472, %v6101_v6  ;;  %6112 = vpow2.f32 %v7150_v16  ;;  %v4070_v49 = vsel %vm7345_vm8, %v4052_v14, 0.0 }
 0x994   : > { %v4053_v32 = vadd.f32 %v3925_v56, %v7246_v58  ;;  %v3869_v7 = vsub.f32 0.0, %v3853_v24  ;;  %v4055_v58 = vadd.f32 %v3943_v34, %v7244_v33  ;;  %v3957_v52 = vadd.f32 1.0, %v3956_v38 }
 0x995   : > { %v6103_v4 = vpop.eup %6102  ;;  %6114 = vpow2.f32 %v7156_v10  ;;  %v4072_v16 = vsel %vm7345_vm8, %v4054_v42, 0.0  ;;  %vm7360_vm9 = vcmp.lt.f32.partialorder %v3968_v17, 0.0004427343  ;;  %v3898_v1 = vmul.f32 1.442695, %v3871_v15 }
 0x996   : > { %v3946_v47 = vmul.f32 0.6931472, %v6103_v4  ;;  %v4071_v29 = vsel %vm7345_vm8, %v4053_v32, 0.0  ;;  %v3894_v60 = vmul.f32 1.442695, %v3869_v7  ;;  %6116 = vpow2.f32 %v7159_v45 }
 0x997   : > { %v4086_v19 = vadd.f32 %v4071_v29, %v4070_v49  ;;  %v3970_v30 = vsel %vm7360_vm9, %v3967_v0, %v3964_v41  ;;  %v4073_v10 = vsel %vm7345_vm8, %v4055_v58, 0.0  ;;  %v3958_v17 = vmul.f32 %v7275_v44, %v3957_v52  ;;  %v4265_v44 = vpop.permute.xlu0 %4264 }
 0x998   : > { %v3952_v37 = vsel %vm7319_vm7, %v3949_v57, %v3946_v47  ;;  %6118 = vpow2.f32 %v3894_v60  ;;  %vm3960_vm10 = vcmp.lt.f32.partialorder %v3959_v46, 0.0004427343  ;;  %v4058_v0 = vadd.f32 %v3970_v30, %v7253_v25  ;;  %v7412_v60 = vld [vmem:[%s6339_s24 + $0x38] sm:$0xff] }
 0x999   : > { %v4056_v33 = vadd.f32 %v3952_v37, %v7255_v61  ;;  %v4087_v36 = vadd.f32 %v4086_v19, %v4072_v16  ;;  %6120 = vpow2.f32 %v7162_v18  ;;  %v8054_v61 = vmax.f32 %v7125_v39, 0.0 }
 0x99a   : > { %v6105_v63 = vpop.eup %6104  ;;  %6122 = vpow2.f32 %v7278_v59  ;;  %v4158_v59 = vsub.f32 %v6585_v12, %v6747_v3  ;;  %v4160_v25 = vsub.f32 %v6580_v9, %v6744_v62  ;;  %v3974_v56 = vmul.f32 -0.5, %v7257_v48 }
 0x99b   : > { %v3955_v2 = vmul.f32 0.6931472, %v6105_v63  ;;  %v3833_v20 = vsub.f32 %v8054_v61, %v7273_v55  ;;  %v4088_v45 = vadd.f32 %v4087_v36, %v4073_v10  ;;  %v7376_v6 = vpop.eup %6106  ;;  %v4074_v14 = vsel %vm7345_vm8, %v4056_v33, 0.0  ;;  %v4271_v47 = vpop.permute.xlu0 %4270 }
 0x99c   : > { %6124 = vpow2.f32 %v7170_v50  ;;  %v3980_v34 = vadd.f32 1.0, %v7376_v6  ;;  %v4174_v15 = vmul.f32 %v4158_v59, %v4158_v59  ;;  %v4176_v41 = vmul.f32 %v4160_v25, %v4160_v25 }
 0x99d   : > { %v3961_v57 = vsel %vm3960_vm10, %v3958_v17, %v3955_v2  ;;  %v4089_v38 = vadd.f32 %v4088_v45, %v4074_v14  ;;  %6126 = vpow2.f32 %v3898_v1  ;;  %v6109_v55 = vpop.eup %6108  ;;  %v3975_v7 = vadd.f32 1.0, %v3974_v56  ;;  %v8055_v1 = vld [vmem:[#allocation51_spill] sm:$0xff] }
 0x99e   : > { %v4057_v18 = vadd.f32 %v3961_v57, %v3833_v20  ;;  %6128 = vpow2.f32 %v7173_v31  ;;  %v4076_v31 = vsel %vm7345_vm8, %v4058_v0, 0.0  ;;  %v4162_v58 = vsub.f32 %v6597_v28, %v6763_v13  ;;  %v8060_v56 = vld [vmem:[#allocation63_spill] sm:$0xff] }
 0x99f   : > { %6130 = vlog2.f32 %v3980_v34  ;;  %v6111_v24 = vpop.eup %6110  ;;  %v3803_v52 = vmax.f32 %v7112_v51, 0.0  ;;  %v4164_v19 = vsub.f32 %v6594_v23, %v6756_v43  ;;  %v3819_v16 = vmul.f32 %v7412_v60, %v7112_v51 }
 0x9a0   : > { %v4075_v50 = vsel %vm7345_vm8, %v4057_v18, 0.0  ;;  %6132 = vpow2.f32 %v7167_v5  ;;  %v6113_v4 = vpop.eup %6112  ;;  %v3353_v32 = vsel %vm3242_vm0, %v6111_v24, 0.0  ;;  %v3973_v27 = vmul.f32 0.6931472, %v6109_v55 }
 0x9a1   : > { %v4090_v46 = vadd.f32 %v4089_v38, %v4075_v50  ;;  %6134 = vrcp.f32 %v4269_v26  ;;  %v7401_v5 = vsel %vm3241_vm1, %v7079_v21, %v3353_v32  ;;  %v3513_v49 = vadd.f32 1e-08, %v6113_v4 }
 0x9a2   : > { %v6115_v29 = vpop.eup %6114  ;;  %6136 = vrcp.f32 %v4265_v44  ;;  %v3977_v26 = vand.u32 2147483647, %v7257_v48  ;;  %3385 = vst [vmem:[%s7024_s27 + $0x70] sm:$0xff] %v7401_v5  ;;  %v3983_v33 = vmul.f32 -0.5, %v7376_v6  ;;  %v4303_v30 = vmul.f32 %v7119_v54, %v4174_v15  ;;  %v8058_v54 = vld [vmem:[#allocation21_spill] sm:$0xff]  ;;  %v8059_v44 = vld [vmem:[#allocation7_spill] sm:$0xff] }
 0x9a3   : > { %v7394_v42 = vadd.f32 %v4090_v46, %v4076_v31  ;;  %v6117_v37 = vpop.eup %6116  ;;  %v3303_v63 = vadd.f32 1.0, %v6115_v29  ;;  %3559 = vrot.lane.b32.xlu0 %v3513_v49, %s6288_s23  ;;  %6138 = vrcp.f32 %v4271_v47  ;;  %v4307_v10 = vmul.f32 %v8055_v1, %v4176_v41  ;;  %v7440_v46 = vld [vmem:[%s6339_s24 + $0x40] sm:$0xff]  ;;  %v8061_v41 = vld [vmem:[#allocation65_spill] sm:$0xff]  ;;  %v8063_v49 = vld [vmem:[#allocation3_spill] sm:$0xff] }
 0x9a4   : > { %v3511_v2 = vadd.f32 1e-08, %v6117_v37  ;;  %v3976_v61 = vmul.f32 %v7257_v48, %v3975_v7  ;;  %v4178_v45 = vmul.f32 %v4162_v58, %v4162_v58  ;;  %vm7426_vm11 = vcmp.lt.f32.partialorder %v3977_v26, 0.0004427343  ;;  %v8062_v7 = vld [vmem:[#allocation17_spill] sm:$0xff]  ;;  %v8065_v37 = vld [vmem:[#allocation6_spill] sm:$0xff] }
 0x9a5   : > { %v7418_v36 = vpop.eup %6118  ;;  %6140 = vrcp.f32 %v3303_v63  ;;  %v4163_v18 = vsub.f32 %v8059_v44, %v8058_v54  ;;  %v4180_v38 = vmul.f32 %v4164_v19, %v4164_v19  ;;  %v3835_v48 = vsub.f32 %v3803_v52, %v3819_v16  ;;  %v8064_v19 = vld [vmem:[#allocation20_spill] sm:$0xff]  ;;  %v8067_v1 = vld [vmem:[#allocation2_spill] sm:$0xff] }
 0x9a6   : > { %v6121_v17 = vpop.eup %6120  ;;  %v3989_v20 = vadd.f32 1.0, %v7418_v36  ;;  %3555 = vrot.lane.b32.xlu1 %v3511_v2, %s6288_s23  ;;  %v3979_v59 = vsel %vm7426_vm11, %v3976_v61, %v3973_v27  ;;  %v3984_v25 = vadd.f32 1.0, %v3983_v33  ;;  %v3804_v50 = vmax.f32 %v8060_v56, 0.0 }
 0x9a7   : > { %v7424_v0 = vpop.eup %6122  ;;  %v3306_v57 = vadd.f32 1.0, %v6121_v17  ;;  %4350 = vrot.lane.b32.xlu0 %v4303_v30, %s6289_s16  ;;  %v3820_v24 = vmul.f32 %v7440_v46, %v8060_v56  ;;  %v3986_v31 = vand.u32 2147483647, %v7376_v6  ;;  %v3858_v15 = vand.u32 2147483647, %v7401_v5  ;;  %v8066_v30 = vld [vmem:[#allocation16_spill] sm:$0xff] }
 0x9a8   : > { %6142 = vlog2.f32 %v3989_v20  ;;  %v4311_v47 = vmul.f32 %v8061_v41, %v4178_v45  ;;  %v4159_v58 = vsub.f32 %v8063_v49, %v8062_v7  ;;  %v4059_v52 = vadd.f32 %v3979_v59, %v3835_v48 }
 0x9a9   : > { %v6125_v34 = vpop.eup %6124  ;;  %6144 = vrcp.f32 %v3306_v57  ;;  %v4165_v16 = vsub.f32 %v8065_v37, %v8064_v19  ;;  %v3985_v63 = vmul.f32 %v7376_v6, %v3984_v25  ;;  %v4161_v2 = vsub.f32 %v8067_v1, %v8066_v30 }
 0x9aa   : > { %v7436_v55 = vpop.eup %6126  ;;  %v3304_v4 = vadd.f32 1.0, %v6125_v34  ;;  %v3998_v17 = vadd.f32 1.0, %v7424_v0  ;;  %v3836_v20 = vsub.f32 %v3804_v50, %v3820_v24  ;;  %vm3987_vm12 = vcmp.lt.f32.partialorder %v3986_v31, 0.0004427343  ;;  %v8069_v24 = vld [vmem:[#allocation9_spill] sm:$0xff] }
 0x9ab   : > { %v6129_v32 = vpop.eup %6128  ;;  %4354 = vrot.lane.b32.xlu0 %v4307_v10, %s6289_s16  ;;  %v4179_v45 = vmul.f32 %v4163_v18, %v4163_v18  ;;  %v4007_v14 = vadd.f32 1.0, %v7436_v55  ;;  %v3874_v34 = vsub.f32 0.0, %v3858_v15  ;;  %v4175_v48 = vmul.f32 %v4159_v58, %v4159_v58  ;;  %v8068_v18 = vld [vmem:[#allocation23_spill] sm:$0xff] }
 0x9ac   : > { %v6131_v29 = vpop.eup %6130  ;;  %6146 = vrcp.f32 %v3304_v4  ;;  %v3512_v26 = vadd.f32 1e-08, %v6129_v32  ;;  %v4077_v6 = vsel %vm7345_vm8, %v4059_v52, 0.0  ;;  %v4273_v4 = vpop.permute.xlu0 %4272  ;;  %v4181_v50 = vmul.f32 %v4165_v16, %v4165_v16  ;;  %v8070_v16 = vld [vmem:[#allocation64_spill] sm:$0xff] }
 0x9ad   : > { %v6133_v27 = vpop.eup %6132  ;;  %v3982_v33 = vmul.f32 0.6931472, %v6131_v29  ;;  %6148 = vlog2.f32 %v3998_v17  ;;  %v4166_v31 = vsub.f32 %v8069_v24, %v8068_v18  ;;  %v4177_v32 = vmul.f32 %v4161_v2, %v4161_v2  ;;  %v8072_v2 = vld [vmem:[#allocation25_spill] sm:$0xff]  ;;  %v8073_v17 = vld [vmem:[#allocation11_spill] sm:$0xff] }
 0x9ae   : > { %v6135_v61 = vpop.eup %6134  ;;  %3557 = vrot.lane.b32.xlu1 %v3512_v26, %s6288_s23  ;;  %v3514_v59 = vadd.f32 1e-08, %v6133_v27  ;;  %6150 = vlog2.f32 %v4007_v14  ;;  %v4092_v41 = vadd.f32 %v7394_v42, %v4077_v6  ;;  %v3992_v15 = vmul.f32 -0.5, %v7418_v36 }
 0x9af   : > { %v3988_v57 = vsel %vm3987_vm12, %v3985_v63, %v3982_v33  ;;  %v6137_v25 = vpop.eup %6136  ;;  %4358 = vrot.lane.b32.xlu0 %v4311_v47, %s6289_s16  ;;  %v3904_v52 = vmul.f32 1.442695, %v3874_v34  ;;  %6152 = vrcp.f32 %v4273_v4  ;;  %v4315_v33 = vmul.f32 %v8070_v16, %v4180_v38  ;;  %v8071_v63 = vld [vmem:[#allocation55_spill] sm:$0xff]  ;;  %v8074_v34 = vld [vmem:[#allocation53_spill] sm:$0xff]  ;;  %v8076_v4 = vld [vmem:[#allocation50_spill] sm:$0xff] }
 0x9b0   : > { %v4060_v10 = vadd.f32 %v3988_v57, %v3836_v20  ;;  %v7468_v29 = vpop.eup %6138  ;;  %v4313_v26 = vmul.f32 %v6137_v25, %v4179_v45  ;;  %v4305_v42 = vmul.f32 %v8071_v63, %v4175_v48  ;;  %v4167_v20 = vsub.f32 %v8073_v17, %v8072_v2 }
 0x9b1   : > { %v4317_v57 = vmul.f32 %v6135_v61, %v4181_v50  ;;  %v4182_v45 = vmul.f32 %v4166_v31, %v4166_v31  ;;  %v4309_v6 = vmul.f32 %v8074_v34, %v4177_v32  ;;  %v3993_v38 = vadd.f32 1.0, %v3992_v15 }
 0x9b2   : > { %3561 = vrot.lane.b32.xlu1 %v3514_v59, %s6288_s23  ;;  %v4078_v58 = vsel %vm7345_vm8, %v4060_v10, 0.0  ;;  %v6141_v47 = vpop.eup %6140  ;;  %v8075_v59 = vld [vmem:[#allocation54_spill] sm:$0xff]  ;;  %v3995_v48 = vand.u32 2147483647, %v7418_v36  ;;  %6154 = vpow2.f32 %v3904_v52  ;;  %v4001_v31 = vmul.f32 -0.5, %v7424_v0 }
 0x9b3   : > { %v7470_v27 = vadd.f32 %v4092_v41, %v4078_v58  ;;  %v3351_v14 = vsel %vm3242_vm0, %v6141_v47, 0.0  ;;  %4360 = vrot.lane.b32.xlu0 %v4313_v26, %s6289_s16  ;;  %v3806_v25 = vmax.f32 %v8075_v59, 0.0  ;;  %v7489_v58 = vld [vmem:[%s6339_s24 + $0x50] sm:$0xff]  ;;  %v3807_v15 = vmax.f32 %v7305_v53, 0.0  ;;  %v7499_v26 = vld [vmem:[%s6339_s24 + $0x58] sm:$0xff] }
 0x9b4   : > { %v7485_v41 = vsel %vm3241_vm1, %v8076_v4, %v3351_v14  ;;  %v3822_v61 = vmul.f32 %v7489_v58, %v8075_v59  ;;  %v3823_v47 = vmul.f32 %v7499_v26, %v7305_v53  ;;  %v4010_v63 = vmul.f32 -0.5, %v7436_v55  ;;  %v7506_v14 = vld [vmem:[%s6339_s24 + $0x48] sm:$0xff] }
 0x9b5   : > { %v6143_v10 = vpop.eup %6142  ;;  %3383 = vst [vmem:[%s7024_s27 + $0x60] sm:$0xff] %v7485_v41  ;;  %v3856_v50 = vand.u32 2147483647, %v7485_v41  ;;  %v3805_v52 = vmax.f32 %v7326_v22, 0.0  ;;  %v3821_v34 = vmul.f32 %v7506_v14, %v7326_v22  ;;  %v3994_v21 = vmul.f32 %v7418_v36, %v3993_v38  ;;  %v8081_v36 = vld [vmem:[#allocation56_spill] sm:$0xff] }
 0x9b6   : > { %4352 = vrot.lane.b32.xlu1 %v4305_v42, %s6289_s16  ;;  %v6145_v32 = vpop.eup %6144  ;;  %v3991_v16 = vmul.f32 0.6931472, %v6143_v10  ;;  %vm7514_vm13 = vcmp.lt.f32.partialorder %v3995_v48, 0.0004427343  ;;  %v4002_v48 = vadd.f32 1.0, %v4001_v31  ;;  %v3838_v31 = vsub.f32 %v3806_v25, %v3822_v61 }
 0x9b7   : > { %v3872_v59 = vsub.f32 0.0, %v3856_v50  ;;  %v3354_v4 = vsel %vm3242_vm0, %v6145_v32, 0.0  ;;  %4362 = vrot.lane.b32.xlu0 %v4315_v33, %s6289_s16  ;;  %v3837_v17 = vsub.f32 %v3805_v52, %v3821_v34  ;;  %v4319_v10 = vmul.f32 %v7468_v29, %v4182_v45 }
 0x9b8   : > { %v7521_v8 = vsel %vm3241_vm1, %v8079_v40, %v3354_v4  ;;  %v3997_v4 = vsel %vm7514_vm13, %v3994_v21, %v3991_v16  ;;  %v4183_v21 = vmul.f32 %v4167_v20, %v4167_v20  ;;  %v4003_v19 = vmul.f32 %v7424_v0, %v4002_v48  ;;  %v8086_v48 = vld [vmem:[#allocation45_spill] sm:$0xff] }
 0x9b9   : > { %v6147_v42 = vpop.eup %6146  ;;  %8080 = vst [vmem:[#allocation51_spill] sm:$0xff] %v7521_v8  ;;  %v3900_v50 = vmul.f32 1.442695, %v3872_v59  ;;  %3386 = vst [vmem:[%s7024_s27 + $0x78] sm:$0xff] %v7521_v8  ;;  %v3859_v33 = vand.u32 2147483647, %v7521_v8  ;;  %v4061_v16 = vadd.f32 %v3997_v4, %v3837_v17  ;;  %v3427_v11 = vsub.f32 %v8060_v56, %v7440_v46 }
 0x9ba   : > { %v3352_v2 = vsel %vm3242_vm0, %v6147_v42, 0.0  ;;  %4356 = vrot.lane.b32.xlu1 %v4309_v6, %s6289_s16  ;;  %v6149_v32 = vpop.eup %6148  ;;  %v4004_v6 = vand.u32 2147483647, %v7424_v0  ;;  %v4011_v59 = vadd.f32 1.0, %v4010_v63  ;;  %v8087_v4 = vld [vmem:[#allocation60_spill] sm:$0xff]  ;;  %vm3755_vm5 = vcmask 7168  }
 0x9bb   : > { %v7532_v38 = vsel %vm3241_vm1, %v8081_v36, %v3352_v2  ;;  %v6151_v40 = vpop.eup %6150  ;;  %6156 = vpow2.f32 %v3900_v50  ;;  %v3875_v18 = vsub.f32 0.0, %v3859_v33  ;;  %4364 = vrot.lane.b32.xlu0 %v4317_v57, %s6289_s16  ;;  %v4013_v2 = vand.u32 2147483647, %v7436_v55 }
 0x9bc   : > { %8082 = vst [vmem:[#allocation63_spill] sm:$0xff] %v7532_v38  ;;  %3384 = vst [vmem:[%s7024_s27 + $0x68] sm:$0xff] %v7532_v38  ;;  %v3857_v42 = vand.u32 2147483647, %v7532_v38  ;;  %v4000_v24 = vmul.f32 0.6931472, %v6149_v32  ;;  %v4012_v52 = vmul.f32 %v7436_v55, %v4011_v59  ;;  %v6153_v34 = vpop.eup %6152  ;;  %v3839_v50 = vsub.f32 %v3807_v15, %v3823_v47 }
 0x9bd   : > { %v3906_v36 = vmul.f32 1.442695, %v3875_v18  ;;  %vm4005_vm14 = vcmp.lt.f32.partialorder %v4004_v6, 0.0004427343  ;;  %v4009_v63 = vmul.f32 0.6931472, %v6151_v40  ;;  %v4321_v17 = vmul.f32 %v6153_v34, %v4183_v21 }
 0x9be   : > { %v3873_v35 = vsub.f32 0.0, %v3857_v42  ;;  %v4006_v57 = vsel %vm4005_vm14, %v4003_v19, %v4000_v24  ;;  %vm4014_vm15 = vcmp.lt.f32.partialorder %v4013_v2, 0.0004427343  ;;  %v4079_v0 = vsel %vm7345_vm8, %v4061_v16, 0.0  ;;  %v8083_v47 = vld [vmem:[#allocation57_spill] sm:$0xff]  ;;  %v8088_v42 = vld [vmem:[#allocation46_spill] sm:$0xff] }
 0x9bf   : > { %6158 = vpow2.f32 %v3906_v36  ;;  %4366 = vrot.lane.b32.xlu0 %v4319_v10, %s6289_s16  ;;  %v4015_v29 = vsel %vm4014_vm15, %v4012_v52, %v4009_v63  ;;  %v4062_v20 = vadd.f32 %v4006_v57, %v3838_v31  ;;  %v4094_v40 = vadd.f32 %v7470_v27, %v4079_v0  ;;  %v8084_v27 = vld [vmem:[#allocation42_spill] sm:$0xff]  ;;  %v8085_v36 = vld [vmem:[#allocation59_spill] sm:$0xff]  ;;  %v8090_v10 = vld [vmem:[#allocation44_spill] sm:$0xff] }
 0x9c0   : > { %v3902_v37 = vmul.f32 1.442695, %v3873_v35  ;;  %v4063_v18 = vadd.f32 %v4015_v29, %v3839_v50  ;;  %v7548_v35 = vpop.eup %6154  ;;  %v3421_v33 = vsub.f32 %v8084_v27, %v8083_v47  ;;  %v3422_v32 = vsub.f32 %v8086_v48, %v8085_v36  ;;  %v8089_v31 = vld [vmem:[#allocation58_spill] sm:$0xff]  ;;  %v8091_v16 = vld [vmem:[#allocation61_spill] sm:$0xff]  ;;  %v8092_v63 = vld [vmem:[#allocation48_spill] sm:$0xff] }
 0x9c1   : > { %v4080_v55 = vsel %vm7345_vm8, %v4062_v20, 0.0  ;;  %v4034_v19 = vadd.f32 1.0, %v7548_v35  ;;  %v3420_v6 = vsub.f32 %v8088_v42, %v8087_v4  ;;  %v3419_v21 = vsub.f32 %v8090_v10, %v8089_v31  ;;  %v8093_v57 = vld [vmem:[#allocation22_spill] sm:$0xff]  ;;  %v8094_v29 = vld [vmem:[#allocation8_spill] sm:$0xff] }
 0x9c2   : > { %6160 = vpow2.f32 %v3902_v37  ;;  %v4095_v45 = vadd.f32 %v4094_v40, %v4080_v55  ;;  %v4081_v37 = vsel %vm7345_vm8, %v4063_v18, 0.0  ;;  %v3425_v52 = vsub.f32 %v8092_v63, %v8091_v16  ;;  %v8096_v18 = vld [vmem:[#allocation10_spill] sm:$0xff]  ;;  %v8100_v16 = vld [vmem:[#allocation49_spill] sm:$0xff] }
 0x9c3   : > { %4368 = vrot.lane.b32.xlu0 %v4321_v17, %s6289_s16  ;;  %v4168_v20 = vsub.f32 %v8094_v29, %v8093_v57  ;;  %v8095_v17 = vld [vmem:[#allocation24_spill] sm:$0xff]  ;;  %v3437_v55 = vmul.f32 %v3421_v33, %v3421_v33  ;;  %v4040_v29 = vand.u32 2147483647, %v7548_v35  ;;  %vm4526_vm6 = vcmask 64512  }
 0x9c4   : > { %v7557_v25 = vadd.f32 %v4095_v45, %v4081_v37  ;;  %v4169_v0 = vsub.f32 %v8096_v18, %v8095_v17  ;;  %v3438_v45 = vmul.f32 %v3422_v32, %v3422_v32  ;;  %v3441_v36 = vmul.f32 %v3425_v52, %v3425_v52 }
 0x9c5   : > { %v7582_v4 = vmul.f32 %v4168_v20, %v4168_v20  ;;  %v3810_v20 = vmax.f32 %v7401_v5, 0.0  ;;  %vm7646_vm2 = vcmp.lt.f32.partialorder %v4040_v29, 0.0004427343 }
 0x9c6   : > { %v7584_v42 = vmul.f32 %v4169_v0, %v4169_v0  ;;  %v3454_v32 = vmul.f32 -0.5, %v3438_v45  ;;  %v7601_v0 = vld [vmem:[%s6339_s24 + $0x70] sm:$0xff] }
 0x9c8   : > { %v7559_v61 = vpop.eup %6156 }
 0x9c9   : > { %v3536_v24 = vpop.permute.xlu1 %3535  ;;  %v4016_v59 = vadd.f32 1.0, %v7559_v61  ;;  %v4019_v52 = vmul.f32 -0.5, %v7559_v61  ;;  %v4022_v57 = vand.u32 2147483647, %v7559_v61 }
 0x9ca   : > { %6162 = vrcp.f32 %v3536_v24  ;;  %v3435_v24 = vmul.f32 %v3419_v21, %v3419_v21  ;;  %v8099_v21 = vld [vmem:[#allocation62_spill] sm:$0xff] }
 0x9cb   : > { %v3532_v15 = vpop.permute.xlu0 %3531  ;;  %6164 = vlog2.f32 %v4034_v19  ;;  %v3436_v19 = vmul.f32 %v3420_v6, %v3420_v6  ;;  %v3423_v63 = vsub.f32 %v8100_v16, %v8099_v21  ;;  %v3809_v21 = vmax.f32 %v7532_v38, 0.0  ;;  %v7622_v16 = vld [vmem:[%s6339_s24 + $0x68] sm:$0xff] }
 0x9cc   : > { %v7572_v34 = vpop.eup %6158  ;;  %v7592_v10 = vmul.f32 -0.5, %v3435_v24  ;;  %v7608_v24 = vsub.f32 %v7112_v51, %v7412_v60  ;;  %8102 = vst [vmem:[#allocation65_spill] sm:$0xff] %v7622_v16  ;;  %vm4023_vm0 = vcmp.lt.f32.partialorder %v4022_v57, 0.0004427343 }
 0x9cd   : > { %v3538_v2 = vpop.permute.xlu1 %3537  ;;  %v4043_v27 = vadd.f32 1.0, %v7572_v34  ;;  %v7590_v6 = vmul.f32 -0.5, %v3436_v19  ;;  %v3808_v19 = vmax.f32 %v7485_v41, 0.0 }
 0x9ce   : > { %6166 = vrcp.f32 %v3538_v2  ;;  %v8098_v2 = vld [vmem:[#allocation13_spill] sm:$0xff] }
 0x9cf   : > { %v4275_v50 = vpop.permute.xlu0 %4274  ;;  %6168 = vlog2.f32 %v4016_v59  ;;  %v7578_v40 = vpop.eup %6160  ;;  %v8097_v59 = vld [vmem:[#allocation27_spill] sm:$0xff] }
 0x9d0   : > { %6170 = vrcp.f32 %v4275_v50  ;;  %v4025_v47 = vadd.f32 1.0, %v7578_v40  ;;  %v7588_v33 = vsub.f32 %v8098_v2, %v8097_v59  ;;  %v7597_v50 = vmul.f32 -0.5, %v3441_v36 }
 0x9d1   : > { %6172 = vrcp.f32 %v3532_v15  ;;  %v3534_v37 = vpop.permute.xlu1 %3533  ;;  %v3453_v15 = vmul.f32 -0.5, %v3437_v55  ;;  %v3826_v55 = vmul.f32 %v7601_v0, %v7401_v5  ;;  %v4037_v36 = vmul.f32 -0.5, %v7548_v35 }
 0x9d2   : > { %6174 = vrcp.f32 %v3534_v37  ;;  %v3825_v59 = vmul.f32 %v7622_v16, %v7532_v38  ;;  %v4020_v2 = vadd.f32 1.0, %v4019_v52  ;;  %v4028_v17 = vmul.f32 -0.5, %v7578_v40 }
 0x9d3   : > { %v4277_v48 = vpop.permute.xlu0 %4276  ;;  %6176 = vlog2.f32 %v4025_v47  ;;  %v8101_v47 = vld [vmem:[#allocation66_spill] sm:$0xff]  ;;  %v3842_v18 = vsub.f32 %v3810_v20, %v3826_v55  ;;  %v4038_v52 = vadd.f32 1.0, %v4037_v36 }
 0x9d4   : > { %6178 = vrcp.f32 %v4277_v48  ;;  %v7616_v48 = vld [vmem:[%s6339_s24 + $0x60] sm:$0xff]  ;;  %v3841_v20 = vsub.f32 %v3809_v21, %v3825_v59  ;;  %v4021_v13 = vmul.f32 %v7559_v61, %v4020_v2  ;;  %v4029_v28 = vadd.f32 1.0, %v4028_v17 }
 0x9d5   : > { %v3544_v31 = vpop.permute.xlu1 %3543  ;;  %6180 = vlog2.f32 %v4043_v27  ;;  %v7612_v27 = vsub.f32 %v7125_v39, %v8101_v47  ;;  %v7626_v47 = vmul.f32 %v3423_v63, %v3423_v63 }
 0x9d6   : > { %6182 = vrcp.f32 %v3544_v31  ;;  %v3824_v31 = vmul.f32 %v7616_v48, %v7485_v41 }
 0x9d7   : > { %v6163_v45 = vpop.eup %6162  ;;  %v4279_v37 = vpop.permute.xlu0 %4278 }
 0x9d8   : > { %v3584_v51 = vmul.f32 %v6163_v45, %v3453_v15  ;;  %v6165_v60 = vpop.eup %6164  ;;  %6184 = vrcp.f32 %v4279_v37  ;;  %v3811_v45 = vmax.f32 %v7521_v8, 0.0  ;;  %v7634_v37 = vld [vmem:[%s6339_s24 + $0x78] sm:$0xff] }
 0x9d9   : > { %v3540_v39 = vpop.permute.xlu1 %3539  ;;  %v3827_v63 = vmul.f32 %v7634_v37, %v7521_v8  ;;  %v4036_v55 = vmul.f32 0.6931472, %v6165_v60  ;;  %v4031_v8 = vand.u32 2147483647, %v7578_v40 }
 0x9da   : > { %6186 = vrcp.f32 %v3540_v39  ;;  %3631 = vrot.lane.b32.xlu1 %v3584_v51, %s6290_s21  ;;  %v4046_v39 = vmul.f32 -0.5, %v7572_v34  ;;  %v3840_v51 = vsub.f32 %v3808_v19, %v3824_v31  ;;  %v4039_v31 = vmul.f32 %v7548_v35, %v4038_v52 }
 0x9db   : > { %v6167_v38 = vpop.eup %6166  ;;  %v4281_v15 = vpop.permute.xlu0 %4280  ;;  %v3843_v59 = vsub.f32 %v3811_v45, %v3827_v63  ;;  %vm4032_vm3 = vcmp.lt.f32.partialorder %v4031_v8, 0.0004427343 }
 0x9dc   : > { %v6169_v16 = vpop.eup %6168  ;;  %v3586_v43 = vmul.f32 %v6167_v38, %v3454_v32  ;;  %6188 = vrcp.f32 %v4281_v15  ;;  %v4047_v21 = vadd.f32 1.0, %v4046_v39 }
 0x9dd   : > { %v6171_v23 = vpop.eup %6170  ;;  %v3546_v54 = vpop.permute.xlu1 %3545  ;;  %v4018_v44 = vmul.f32 0.6931472, %v6169_v16 }
 0x9de   : > { %v6173_v30 = vpop.eup %6172  ;;  %6190 = vrcp.f32 %v3546_v54  ;;  %3633 = vrot.lane.b32.xlu1 %v3586_v43, %s6290_s21  ;;  %v4323_v36 = vmul.f32 %v6171_v23, %v7582_v4  ;;  %v4049_v23 = vand.u32 2147483647, %v7572_v34  ;;  %v4048_v63 = vmul.f32 %v7572_v34, %v4047_v21 }
 0x9df   : > { %v6175_v38 = vpop.eup %6174  ;;  %v4283_v32 = vpop.permute.xlu0 %4282  ;;  %v4024_v19 = vsel %vm4023_vm0, %v4021_v13, %v4018_v44  ;;  %v4030_v13 = vmul.f32 %v7578_v40, %v4029_v28  ;;  %v4042_v44 = vsel %vm7646_vm2, %v4039_v31, %v4036_v55  ;;  %v3580_v29 = vmul.f32 %v6173_v30, %v7592_v10 }
 0x9e0   : > { %v6177_v16 = vpop.eup %6176  ;;  %4370 = vrot.lane.b32.xlu0 %v4323_v36, %s6289_s16  ;;  %v3582_v61 = vmul.f32 %v6175_v38, %v7590_v6  ;;  %v4064_v43 = vadd.f32 %v4024_v19, %v3840_v51  ;;  %6192 = vrcp.f32 %v4283_v32  ;;  %vm4050_vm4 = vcmp.lt.f32.partialorder %v4049_v23, 0.0004427343  ;;  %v8105_v36 = vld [vmem:[#allocation29_spill] sm:$0xff]  ;;  %v8106_v38 = vld [vmem:[#allocation15_spill] sm:$0xff] }
 0x9e1   : > { %v6179_v57 = vpop.eup %6178  ;;  %v3542_v17 = vpop.permute.xlu1 %3541  ;;  %v4027_v4 = vmul.f32 0.6931472, %v6177_v16  ;;  %v4066_v39 = vadd.f32 %v4042_v44, %v3842_v18  ;;  %v3455_v30 = vmul.f32 -0.5, %v7626_v47  ;;  %v3442_v10 = vmul.f32 %v7608_v24, %v7608_v24 }
 0x9e2   : > { %v6181_v35 = vpop.eup %6180  ;;  %6194 = vrcp.f32 %v3542_v17  ;;  %3629 = vrot.lane.b32.xlu1 %v3582_v61, %s6290_s21  ;;  %v4082_v2 = vsel %vm7345_vm8, %v4064_v43, 0.0  ;;  %v4186_v24 = vmul.f32 %v7588_v33, %v7588_v33  ;;  %v4171_v32 = vsub.f32 %v8106_v38, %v8105_v36 }
 0x9e3   : > { %v6183_v6 = vpop.eup %6182  ;;  %v4285_v60 = vpop.permute.xlu0 %4284  ;;  %v4033_v15 = vsel %vm4032_vm3, %v4030_v13, %v4027_v4  ;;  %v4045_v45 = vmul.f32 0.6931472, %v6181_v35  ;;  %v4097_v28 = vadd.f32 %v7557_v25, %v4082_v2  ;;  %v4325_v25 = vmul.f32 %v6179_v57, %v7584_v42  ;;  %v8107_v4 = vld [vmem:[#allocation26_spill] sm:$0xff]  ;;  %v8108_v13 = vld [vmem:[#allocation12_spill] sm:$0xff] }
 0x9e4   : > { %3627 = vrot.lane.b32.xlu0 %v3580_v29, %s6290_s21  ;;  %v3592_v40 = vmul.f32 %v6183_v6, %v7597_v50  ;;  %v4065_v52 = vadd.f32 %v4033_v15, %v3841_v20  ;;  %6196 = vrcp.f32 %v4285_v60  ;;  %v4084_v19 = vsel %vm7345_vm8, %v4066_v39, 0.0 }
 0x9e5   : > { %v3552_v8 = vpop.permute.xlu1 %3551  ;;  %v4051_v51 = vsel %vm4050_vm4, %v4048_v63, %v4045_v45  ;;  %v6185_v55 = vpop.eup %6184  ;;  %v3440_v42 = vmul.f32 %v7612_v27, %v7612_v27  ;;  %v3458_v33 = vmul.f32 -0.5, %v3442_v10  ;;  %v4187_v27 = vmul.f32 %v4171_v32, %v4171_v32  ;;  %v8109_v45 = vld [vmem:[#allocation28_spill] sm:$0xff]  ;;  %v8110_v63 = vld [vmem:[#allocation14_spill] sm:$0xff] }
 0x9e6   : > { %6198 = vrcp.f32 %v3552_v8  ;;  %3639 = vrot.lane.b32.xlu1 %v3592_v40, %s6290_s21  ;;  %v4067_v34 = vadd.f32 %v4051_v51, %v3843_v59  ;;  %v4083_v50 = vsel %vm7345_vm8, %v4065_v52, 0.0  ;;  %v6278_v59 = vld [vmem:[%s7024_s27 + $0x50] sm:$0xff]  ;;  %v4327_v54 = vmul.f32 %v6185_v55, %v4186_v24 }
 0x9e7   : > { %v6187_v18 = vpop.eup %6186  ;;  %v4098_v20 = vadd.f32 %v4097_v28, %v4083_v50  ;;  %v3429_v21 = vsub.f32 %v6278_v59, %v7489_v58  ;;  %v4172_v58 = vsub.f32 %v8108_v13, %v8107_v4  ;;  %v3456_v29 = vmul.f32 -0.5, %v3440_v42 }
 0x9e8   : > { %4372 = vrot.lane.b32.xlu0 %v4325_v25, %s6289_s16  ;;  %v3588_v47 = vmul.f32 %v6187_v18, %v3455_v30  ;;  %v4085_v23 = vsel %vm7345_vm8, %v4067_v34, 0.0  ;;  %v4173_v28 = vsub.f32 %v8110_v63, %v8109_v45  ;;  %v3443_v30 = vmul.f32 %v3427_v11, %v3427_v11 }
 0x9e9   : > { %v3548_v31 = vpop.permute.xlu1 %3547  ;;  %v4099_v16 = vadd.f32 %v4098_v20, %v4084_v19  ;;  %v6189_v61 = vpop.eup %6188  ;;  %v3445_v2 = vmul.f32 %v3429_v21, %v3429_v21  ;;  %v4188_v15 = vmul.f32 %v4172_v58, %v4172_v58  ;;  %v3430_v50 = vsub.f32 %v7305_v53, %v7499_v26 }
 0x9ea   : > { %6200 = vrcp.f32 %v3548_v31  ;;  %3635 = vrot.lane.b32.xlu1 %v3588_v47, %s6290_s21  ;;  %v4329_v35 = vmul.f32 %v6189_v61, %v4187_v27  ;;  %v4189_v46 = vmul.f32 %v4173_v28, %v4173_v28  ;;  %v3459_v25 = vmul.f32 -0.5, %v3443_v30 }
 0x9eb   : > { %v6191_v43 = vpop.eup %6190  ;;  %v7683_v57 = vadd.f32 %v4099_v16, %v4085_v23  ;;  %v3461_v8 = vmul.f32 -0.5, %v3445_v2  ;;  %v3446_v20 = vmul.f32 %v3430_v50, %v3430_v50  ;;  %v3428_v47 = vsub.f32 %v7326_v22, %v7506_v14 }
 0x9ec   : > { %4374 = vrot.lane.b32.xlu0 %v4327_v54, %s6289_s16  ;;  %v3594_v17 = vmul.f32 %v6191_v43, %v3458_v33  ;;  %v4110_v53 = vsub.f32 %v6747_v3, %v6585_v12  ;;  %v4111_v22 = vsub.f32 %v8062_v7, %v8063_v49  ;;  %v4112_v54 = vsub.f32 %v6744_v62, %v6580_v9 }
 0x9ed   : > { %v6193_v44 = vpop.eup %6192  ;;  %v3462_v24 = vmul.f32 -0.5, %v3446_v20  ;;  %v3444_v32 = vmul.f32 %v3428_v47, %v3428_v47  ;;  %v3433_v33 = vsub.f32 %v7401_v5, %v7601_v0  ;;  %v3431_v27 = vsub.f32 %v7485_v41, %v7616_v48  ;;  %v8112_v0 = vld [vmem:[#allocation5_spill] sm:$0xff] }
 0x9ee   : > { %3641 = vrot.lane.b32.xlu1 %v3594_v17, %s6290_s21  ;;  %v4331_v39 = vmul.f32 %v6193_v44, %v4188_v15  ;;  %v4126_v26 = vmul.f32 1.442695, %v4110_v53  ;;  %v4128_v43 = vmul.f32 1.442695, %v4111_v22  ;;  %v4130_v58 = vmul.f32 1.442695, %v4112_v54 }
 0x9ef   : > { %v6195_v6 = vpop.eup %6194  ;;  %v3554_v52 = vpop.permute.xlu1 %3553  ;;  %v3460_v42 = vmul.f32 -0.5, %v3444_v32  ;;  %v8111_v44 = vld [vmem:[#allocation16_spill] sm:$0xff]  ;;  %v3449_v2 = vmul.f32 %v3433_v33, %v3433_v33 }
 0x9f0   : > { %4376 = vrot.lane.b32.xlu0 %v4329_v35, %s6289_s16  ;;  %v3590_v60 = vmul.f32 %v6195_v6, %v3456_v29  ;;  %6202 = vrcp.f32 %v3554_v52  ;;  %v4113_v35 = vsub.f32 %v8111_v44, %v8067_v1  ;;  %v3447_v6 = vmul.f32 %v3431_v27, %v3431_v27 }
 0x9f1   : > { %v6197_v40 = vpop.eup %6196  ;;  %v3465_v15 = vmul.f32 -0.5, %v3449_v2  ;;  %v8124_v2 = vld [vmem:[#allocation23_spill] sm:$0xff] }
 0x9f2   : > { %3637 = vrot.lane.b32.xlu1 %v3590_v60, %s6290_s21  ;;  %v4333_v55 = vmul.f32 %v6197_v40, %v4189_v46  ;;  %v4132_v60 = vmul.f32 1.442695, %v4113_v35  ;;  %v8113_v40 = vld [vmem:[#allocation19_spill] sm:$0xff] }
 0x9f3   : > { %v6199_v10 = vpop.eup %6198  ;;  %v3550_v51 = vpop.permute.xlu1 %3549  ;;  %v4114_v52 = vsub.f32 %v8113_v40, %v8112_v0 }
 0x9f4   : > { %4378 = vrot.lane.b32.xlu0 %v4331_v39, %s6289_s16  ;;  %v3600_v56 = vmul.f32 %v6199_v10, %v3461_v8  ;;  %6204 = vrcp.f32 %v3550_v51  ;;  %v3463_v39 = vmul.f32 -0.5, %v3447_v6  ;;  %v8114_v10 = vld [vmem:[#allocation7_spill] sm:$0xff] }
 0x9f5   : > { %6206 = vpow2.f32 %v4126_v26  ;;  %v4134_v30 = vmul.f32 1.442695, %v4114_v52 }
 0x9f6   : > { %3647 = vrot.lane.b32.xlu1 %v3600_v56, %s6290_s21  ;;  %v8115_v56 = vld [vmem:[#allocation21_spill] sm:$0xff] }
 0x9f7   : > { %v6201_v34 = vpop.eup %6200  ;;  %v4115_v46 = vsub.f32 %v8115_v56, %v8114_v10 }
 0x9f8   : > { %4380 = vrot.lane.b32.xlu0 %v4333_v55, %s6289_s16  ;;  %v3596_v18 = vmul.f32 %v6201_v34, %v3459_v25  ;;  %v8116_v25 = vld [vmem:[#allocation51_spill] sm:$0xff] }
 0x9f9   : > { %v3434_v34 = vsub.f32 %v8116_v25, %v7634_v37  ;;  %v8126_v25 = vld [vmem:[#allocation25_spill] sm:$0xff] }
 0x9fa   : > { %3643 = vrot.lane.b32.xlu1 %v3596_v18, %s6290_s21  ;;  %v8118_v18 = vld [vmem:[#allocation18_spill] sm:$0xff] }
 0x9fb   : > { %v3450_v32 = vmul.f32 %v3434_v34, %v3434_v34 }
 0x9fd   : > { %v6203_v19 = vpop.eup %6202 }
 0x9fe   : > { %v3602_v31 = vmul.f32 %v6203_v19, %v3462_v24  ;;  %v4136_v24 = vmul.f32 1.442695, %v4115_v46  ;;  %v8119_v19 = vld [vmem:[#allocation65_spill] sm:$0xff] }
 0xa00   : > { %3649 = vrot.lane.b32.xlu1 %v3602_v31, %s6290_s21  ;;  %v8120_v31 = vld [vmem:[#allocation63_spill] sm:$0xff] }
 0xa01   : > { %v6205_v59 = vpop.eup %6204 }
 0xa02   : > { %v3598_v21 = vmul.f32 %v6205_v59, %v3460_v42  ;;  %v6207_v23 = vpop.eup %6206  ;;  %v3432_v42 = vsub.f32 %v8120_v31, %v8119_v19 }
 0xa04   : > { %3645 = vrot.lane.b32.xlu1 %v3598_v21, %s6290_s21 }
 0xa15   : > { %v3560_v16 = vpop.permute.xlu0 %3559 }
 0xa16   : > { %6208 = vrcp.f32 %v3560_v16  ;;  %v8122_v16 = vld [vmem:[#allocation20_spill] sm:$0xff] }
 0xa18   : > { %v3556_v14 = vpop.permute.xlu1 %3555 }
 0xa19   : > { %v4351_v61 = vpop.permute.xlu0 %4350  ;;  %6210 = vrcp.f32 %v3556_v14  ;;  %v3466_v14 = vmul.f32 -0.5, %v3450_v32  ;;  %v8127_v32 = vld [vmem:[#allocation8_spill] sm:$0xff] }
 0xa1a   : > { %v4398_v17 = vadd.f32 %v6207_v23, %v4351_v61  ;;  %6212 = vpow2.f32 %v4128_v43  ;;  %v3448_v61 = vmul.f32 %v3432_v42, %v3432_v42 }
 0xa1b   : > { %6214 = vpow2.f32 %v4130_v58 }
 0xa1c   : > { %v5034_v11 = vadd.f32 -1.0, %v4398_v17 }
 0xa1d   : > { %v4355_v51 = vpop.permute.xlu0 %4354 }
 0xa1e   : > { %v4430_v41 = vadd.f32 %v5034_v11, %v6585_v12  ;;  %v8117_v12 = vld [vmem:[#allocation4_spill] sm:$0xff] }
 0xa1f   : > { %v4116_v20 = vsub.f32 %v8118_v18, %v8117_v12 }
 0xa20   : > { %v3558_v29 = vpop.permute.xlu1 %3557  ;;  %v4446_v50 = vsub.f32 %v4430_v41, %v6747_v3  ;;  %v8121_v3 = vld [vmem:[#allocation6_spill] sm:$0xff] }
 0xa21   : > { %v4359_v21 = vpop.permute.xlu0 %4358  ;;  %v4138_v37 = vmul.f32 1.442695, %v4116_v20  ;;  %v4117_v22 = vsub.f32 %v8122_v16, %v8121_v3 }
 0xa23   : > { %v6209_v5 = vpop.eup %6208  ;;  %v4140_v35 = vmul.f32 1.442695, %v4117_v22  ;;  %v8130_v22 = vld [vmem:[#allocation24_spill] sm:$0xff] }
 0xa24   : > { %v3562_v28 = vpop.permute.xlu1 %3561  ;;  %v3608_v48 = vmul.f32 %v6209_v5, %v3465_v15 }
 0xa25   : > { %6216 = vrcp.f32 %v3562_v28  ;;  %v4361_v6 = vpop.permute.xlu0 %4360 }
 0xa26   : > { %6218 = vrcp.f32 %v3558_v29  ;;  %v6211_v8 = vpop.eup %6210  ;;  %3655 = vrot.lane.b32.xlu0 %v3608_v48, %s6290_s21  ;;  %v8123_v29 = vld [vmem:[#allocation9_spill] sm:$0xff] }
 0xa27   : > { %6220 = vpow2.f32 %v4132_v60  ;;  %v3604_v55 = vmul.f32 %v6211_v8, %v3463_v39  ;;  %v6213_v59 = vpop.eup %6212  ;;  %v4118_v11 = vsub.f32 %v8124_v2, %v8123_v29  ;;  %v3464_v60 = vmul.f32 -0.5, %v3448_v61  ;;  %v8131_v61 = vld [vmem:[#allocation30_spill] sm:$0xff] }
 0xa28   : > { %v4353_v47 = vpop.permute.xlu1 %4352  ;;  %6222 = vpow2.f32 %v4134_v30  ;;  %v6215_v26 = vpop.eup %6214 }
 0xa29   : > { %3651 = vrot.lane.b32.xlu1 %v3604_v55, %s6290_s21  ;;  %v4399_v53 = vadd.f32 %v6213_v59, %v4353_v47  ;;  %6224 = vpow2.f32 %v4136_v24  ;;  %v4400_v33 = vadd.f32 %v6215_v26, %v4355_v51  ;;  %v4142_v41 = vmul.f32 1.442695, %v4118_v11  ;;  %v4363_v30 = vpop.permute.xlu0 %4362  ;;  %v8125_v55 = vld [vmem:[#allocation11_spill] sm:$0xff]  ;;  %v8129_v26 = vld [vmem:[#allocation10_spill] sm:$0xff] }
 0xa2a   : > { %4478 = vrot.lane.b32.xlu0 %v4446_v50, %s6287_s19  ;;  %6226 = vpow2.f32 %v4138_v37  ;;  %v4119_v34 = vsub.f32 %v8126_v25, %v8125_v55 }
 0xa2b   : > { %v5035_v23 = vadd.f32 -1.0, %v4399_v53  ;;  %v5036_v15 = vadd.f32 -1.0, %v4400_v33  ;;  %6228 = vpow2.f32 %v4140_v35 }
 0xa2c   : > { %v4357_v27 = vpop.permute.xlu1 %4356  ;;  %6230 = vpow2.f32 %v4142_v41  ;;  %v4144_v31 = vmul.f32 1.442695, %v4119_v34 }
 0xa2d   : > { %v4431_v28 = vadd.f32 %v5035_v23, %v8063_v49  ;;  %v4432_v39 = vadd.f32 %v6580_v9, %v5036_v15  ;;  %v8128_v9 = vld [vmem:[#allocation22_spill] sm:$0xff]  ;;  %v4365_v42 = vpop.permute.xlu0 %4364 }
 0xa2e   : > { %v4120_v19 = vsub.f32 %v8128_v9, %v8127_v32  ;;  %6232 = vpow2.f32 %v4144_v31  ;;  %v8135_v31 = vld [vmem:[#allocation33_spill] sm:$0xff] }
 0xa2f   : > { %v4447_v51 = vsub.f32 %v4431_v28, %v8062_v7  ;;  %v4448_v24 = vsub.f32 %v4432_v39, %v6744_v62  ;;  %v4124_v39 = vsub.f32 %v8107_v4, %v8108_v13 }
 0xa32   : > { %v6217_v54 = vpop.eup %6216 }
 0xa33   : > { %v3610_v43 = vmul.f32 %v6217_v54, %v3466_v14  ;;  %v6219_v17 = vpop.eup %6218  ;;  %v4121_v14 = vsub.f32 %v8130_v22, %v8129_v26  ;;  %v3389_v54 = vadd.f32 1.837877, %v8131_v61 }
 0xa34   : > { %v6221_v58 = vpop.eup %6220  ;;  %v3606_v52 = vmul.f32 %v6219_v17, %v3464_v60  ;;  %v4367_v17 = vpop.permute.xlu0 %4366 }
 0xa35   : > { %3657 = vrot.lane.b32.xlu1 %v3610_v43, %s6290_s21  ;;  %v4401_v5 = vadd.f32 %v6221_v58, %v4357_v27  ;;  %v6223_v48 = vpop.eup %6222  ;;  %v4148_v27 = vmul.f32 1.442695, %v4121_v14  ;;  %v8132_v58 = vld [vmem:[#allocation13_spill] sm:$0xff] }
 0xa36   : > { %v4402_v8 = vadd.f32 %v6223_v48, %v4359_v21  ;;  %v6225_v49 = vpop.eup %6224 }
 0xa37   : > { %v5037_v46 = vadd.f32 -1.0, %v4401_v5  ;;  %v4403_v20 = vadd.f32 %v6225_v49, %v4361_v6  ;;  %v6227_v7 = vpop.eup %6226  ;;  %v3405_v6 = vmul.f32 -0.5, %v3389_v54 }
 0xa38   : > { %v5038_v50 = vadd.f32 -1.0, %v4402_v8  ;;  %v4404_v53 = vadd.f32 %v6227_v7, %v4363_v30  ;;  %v6229_v62 = vpop.eup %6228  ;;  %v4369_v48 = vpop.permute.xlu0 %4368  ;;  %v8136_v7 = vld [vmem:[#allocation32_spill] sm:$0xff] }
 0xa39   : > { %3653 = vrot.lane.b32.xlu1 %v3606_v52, %s6290_s21  ;;  %v4433_v47 = vadd.f32 %v8067_v1, %v5037_v46  ;;  %v5039_v21 = vadd.f32 -1.0, %v4403_v20  ;;  %v4146_v1 = vmul.f32 1.442695, %v4120_v19  ;;  %v4405_v43 = vadd.f32 %v6229_v62, %v4365_v42  ;;  %v6231_v11 = vpop.eup %6230 }
 0xa3a   : > { %v4434_v59 = vadd.f32 %v5038_v50, %v8112_v0  ;;  %v5040_v23 = vadd.f32 -1.0, %v4404_v53  ;;  %v4406_v28 = vadd.f32 %v6231_v11, %v4367_v17  ;;  %v4154_v20 = vmul.f32 1.442695, %v4124_v39 }
 0xa3b   : > { %v4449_v37 = vsub.f32 %v4433_v47, %v8111_v44  ;;  %v4435_v33 = vadd.f32 %v5039_v21, %v8114_v10  ;;  %v8133_v44 = vld [vmem:[#allocation27_spill] sm:$0xff]  ;;  %6234 = vpow2.f32 %v4146_v1  ;;  %v5041_v15 = vadd.f32 -1.0, %v4405_v43  ;;  %v6233_v50 = vpop.eup %6232 }
 0xa3c   : > { %v4450_v0 = vsub.f32 %v4434_v59, %v8113_v40  ;;  %v4122_v35 = vsub.f32 %v8133_v44, %v8132_v58  ;;  %v4436_v60 = vadd.f32 %v8117_v12, %v5040_v23  ;;  %6236 = vpow2.f32 %v4148_v27  ;;  %v8137_v23 = vld [vmem:[#allocation34_spill] sm:$0xff] }
 0xa3d   : > { %4480 = vrot.lane.b32.xlu1 %v4447_v51, %s6287_s19  ;;  %v4451_v10 = vsub.f32 %v4435_v33, %v8115_v56  ;;  %v4123_v40 = vsub.f32 %v8105_v36, %v8106_v38  ;;  %v4437_v12 = vadd.f32 %v8121_v3, %v5041_v15  ;;  %v5042_v8 = vadd.f32 -1.0, %v4406_v28  ;;  %v8134_v51 = vld [vmem:[#allocation31_spill] sm:$0xff] }
 0xa3e   : > { %v4150_v52 = vmul.f32 1.442695, %v4122_v35  ;;  %v4452_v56 = vsub.f32 %v4436_v60, %v8118_v18  ;;  %v3387_v34 = vadd.f32 1.837877, %v8134_v51  ;;  %v3388_v3 = vadd.f32 1.837877, %v8135_v31 }
 0xa3f   : > { %v4152_v46 = vmul.f32 1.442695, %v4123_v40  ;;  %v4438_v47 = vadd.f32 %v5042_v8, %v8123_v29  ;;  %v4453_v19 = vsub.f32 %v4437_v12, %v8122_v16  ;;  %v4125_v18 = vsub.f32 %v8109_v45, %v8110_v63  ;;  %v8138_v28 = vld [vmem:[#allocation35_spill] sm:$0xff] }
 0xa40   : > { %6238 = vpow2.f32 %v4150_v52  ;;  %v3390_v59 = vadd.f32 1.837877, %v8136_v7  ;;  %v3403_v21 = vmul.f32 -0.5, %v3387_v34  ;;  %v3404_v16 = vmul.f32 -0.5, %v3388_v3 }
 0xa41   : > { %4482 = vrot.lane.b32.xlu1 %v4448_v24, %s6287_s19  ;;  %v4407_v24 = vadd.f32 %v6233_v50, %v4369_v48  ;;  %6240 = vpow2.f32 %v4152_v46  ;;  %v4454_v29 = vsub.f32 %v4438_v47, %v8124_v2  ;;  %v4156_v54 = vmul.f32 1.442695, %v4125_v18 }
 0xa42   : > { %6242 = vpow2.f32 %v4154_v20  ;;  %v3406_v33 = vmul.f32 -0.5, %v3390_v59  ;;  %v3393_v43 = vadd.f32 1.837877, %v8137_v23 }
 0xa43   : > { %v5043_v1 = vadd.f32 -1.0, %v4407_v24  ;;  %6244 = vpow2.f32 %v4156_v54  ;;  %v8142_v54 = vld [vmem:[#allocation39_spill] sm:$0xff] }
 0xa44   : > { %v3409_v15 = vmul.f32 -0.5, %v3393_v43 }
 0xa45   : > { %4484 = vrot.lane.b32.xlu1 %v4449_v37, %s6287_s19 }
 0xa48   : > { %v6235_v37 = vpop.eup %6234 }
 0xa49   : > { %4486 = vrot.lane.b32.xlu1 %v4450_v0, %s6287_s19  ;;  %v6237_v17 = vpop.eup %6236 }
 0xa4c   : > { %v3632_v5 = vpop.permute.xlu1 %3631 }
 0xa4d   : > { %v3677_v41 = vadd.f32 %v3632_v5, %v3405_v6  ;;  %4488 = vrot.lane.b32.xlu1 %v4451_v10, %s6287_s19  ;;  %v4439_v6 = vadd.f32 %v5043_v1, %v8125_v55  ;;  %v3391_v10 = vadd.f32 1.837877, %v8138_v28  ;;  %v6239_v5 = vpop.eup %6238 }
 0xa4e   : > { %v6241_v46 = vpop.eup %6240 }
 0xa4f   : > { %3711 = vrot.lane.b32.xlu0 %v3677_v41, %s6288_s23  ;;  %v4455_v12 = vsub.f32 %v4439_v6, %v8126_v25  ;;  %v3407_v8 = vmul.f32 -0.5, %v3391_v10  ;;  %v8140_v25 = vld [vmem:[#allocation37_spill] sm:$0xff]  ;;  %v6243_v31 = vpop.eup %6242 }
 0xa50   : > { %v3634_v30 = vpop.permute.xlu1 %3633 }
 0xa51   : > { %4490 = vrot.lane.b32.xlu1 %v4452_v56, %s6287_s19  ;;  %v3678_v35 = vadd.f32 %v3634_v30, %v3406_v33  ;;  %v8139_v56 = vld [vmem:[#allocation36_spill] sm:$0xff]  ;;  %v3395_v33 = vadd.f32 1.837877, %v8142_v54 }
 0xa52   : > { %v4371_v49 = vpop.permute.xlu0 %4370  ;;  %v3394_v30 = vadd.f32 1.837877, %v8139_v56 }
 0xa53   : > { %v4408_v62 = vadd.f32 %v6235_v37, %v4371_v49 }
 0xa54   : > { %v3630_v42 = vpop.permute.xlu1 %3629  ;;  %v3410_v24 = vmul.f32 -0.5, %v3394_v30  ;;  %v8147_v30 = vld [vmem:[#allocation56_spill] sm:$0xff] }
 0xa55   : > { %4492 = vrot.lane.b32.xlu1 %v4453_v19, %s6287_s19  ;;  %v3676_v0 = vadd.f32 %v3630_v42, %v3404_v16  ;;  %v5044_v2 = vadd.f32 -1.0, %v4408_v62  ;;  %v3392_v19 = vadd.f32 1.837877, %v8140_v25 }
 0xa56   : > { %v3628_v53 = vpop.permute.xlu0 %3627 }
 0xa57   : > { %v3675_v14 = vadd.f32 %v3628_v53, %v3403_v21  ;;  %v4440_v39 = vadd.f32 %v8127_v32, %v5044_v2  ;;  %v3408_v21 = vmul.f32 -0.5, %v3392_v19  ;;  %v8141_v53 = vld [vmem:[#allocation38_spill] sm:$0xff] }
 0xa58   : > { %v3640_v61 = vpop.permute.xlu1 %3639 }
 0xa59   : > { %3707 = vrot.lane.b32.xlu0 %v3675_v14, %s6288_s23  ;;  %4494 = vrot.lane.b32.xlu1 %v4454_v29, %s6287_s19  ;;  %v3681_v41 = vadd.f32 %v3640_v61, %v3409_v15  ;;  %v4456_v47 = vsub.f32 %v4440_v39, %v8128_v9  ;;  %v3397_v9 = vadd.f32 1.837877, %v8141_v53  ;;  %v6245_v14 = vpop.eup %6244  ;;  %v8144_v15 = vld [vmem:[#allocation43_spill] sm:$0xff] }
 0xa5a   : > { %v4373_v27 = vpop.permute.xlu0 %4372  ;;  %v3396_v28 = vadd.f32 1.837877, %v8144_v15 }
 0xa5b   : > { %v4409_v11 = vadd.f32 %v6237_v17, %v4373_v27  ;;  %v3413_v61 = vmul.f32 -0.5, %v3397_v9  ;;  %v3411_v27 = vmul.f32 -0.5, %v3395_v33 }
 0xa5c   : > { %v3636_v60 = vpop.permute.xlu1 %3635 }
 0xa5d   : > { %3713 = vrot.lane.b32.xlu0 %v3678_v35, %s6288_s23  ;;  %3709 = vrot.lane.b32.xlu1 %v3676_v0, %s6288_s23  ;;  %v5045_v52 = vadd.f32 -1.0, %v4409_v11  ;;  %v3679_v50 = vadd.f32 %v3636_v60, %v3407_v8  ;;  %v8143_v35 = vld [vmem:[#allocation41_spill] sm:$0xff] }
 0xa5e   : > { %v4375_v40 = vpop.permute.xlu0 %4374 }
 0xa5f   : > { %v4410_v48 = vadd.f32 %v6239_v5, %v4375_v40  ;;  %v4441_v51 = vadd.f32 %v8129_v26, %v5045_v52  ;;  %v3412_v5 = vmul.f32 -0.5, %v3396_v28 }
 0xa60   : > { %v3642_v55 = vpop.permute.xlu1 %3641 }
 0xa61   : > { %3719 = vrot.lane.b32.xlu0 %v3681_v41, %s6288_s23  ;;  %4496 = vrot.lane.b32.xlu1 %v4455_v12, %s6287_s19  ;;  %v5046_v34 = vadd.f32 -1.0, %v4410_v48  ;;  %v4457_v42 = vsub.f32 %v4441_v51, %v8130_v22  ;;  %v3682_v7 = vadd.f32 %v3642_v55, %v3410_v24  ;;  %v8146_v48 = vld [vmem:[#allocation50_spill] sm:$0xff] }
 0xa62   : > { %v4377_v49 = vpop.permute.xlu0 %4376  ;;  %v3399_v39 = vadd.f32 1.837877, %v8146_v48 }
 0xa63   : > { %v4411_v20 = vadd.f32 %v6241_v46, %v4377_v49  ;;  %v4442_v3 = vadd.f32 %v5046_v34, %v8132_v58  ;;  %v3400_v46 = vadd.f32 1.837877, %v8147_v30  ;;  %v8148_v34 = vld [vmem:[#allocation52_spill] sm:$0xff] }
 0xa64   : > { %v3638_v32 = vpop.permute.xlu1 %3637  ;;  %v3415_v8 = vmul.f32 -0.5, %v3399_v39  ;;  %v3402_v49 = vadd.f32 1.837877, %v8148_v34 }
 0xa65   : > { %3715 = vrot.lane.b32.xlu0 %v3679_v50, %s6288_s23  ;;  %4498 = vrot.lane.b32.xlu1 %v4456_v47, %s6287_s19  ;;  %v5047_v26 = vadd.f32 -1.0, %v4411_v20  ;;  %v4458_v29 = vsub.f32 %v4442_v3, %v8133_v44  ;;  %v3680_v16 = vadd.f32 %v3638_v32, %v3408_v21  ;;  %v3398_v44 = vadd.f32 1.837877, %v8143_v35 }
 0xa66   : > { %v4379_v18 = vpop.permute.xlu0 %4378  ;;  %v3416_v50 = vmul.f32 -0.5, %v3400_v46  ;;  %v3418_v32 = vmul.f32 -0.5, %v3402_v49 }
 0xa67   : > { %v4412_v59 = vadd.f32 %v6243_v31, %v4379_v18  ;;  %v4443_v1 = vadd.f32 %v5047_v26, %v8106_v38 }
 0xa68   : > { %v3648_v37 = vpop.permute.xlu1 %3647 }
 0xa69   : > { %3721 = vrot.lane.b32.xlu0 %v3682_v7, %s6288_s23  ;;  %4500 = vrot.lane.b32.xlu1 %v4457_v42, %s6287_s19  ;;  %v5048_v58 = vadd.f32 -1.0, %v4412_v59  ;;  %v4459_v38 = vsub.f32 %v4443_v1, %v8105_v36  ;;  %v3685_v17 = vadd.f32 %v3648_v37, %v3413_v61 }
 0xa6a   : > { %v4381_v62 = vpop.permute.xlu0 %4380 }
 0xa6b   : > { %v4413_v22 = vadd.f32 %v6245_v14, %v4381_v62  ;;  %v4444_v23 = vadd.f32 %v8108_v13, %v5048_v58  ;;  %v3414_v13 = vmul.f32 -0.5, %v3398_v44 }
 0xa6c   : > { %v3644_v0 = vpop.permute.xlu1 %3643 }
 0xa6d   : > { %3717 = vrot.lane.b32.xlu0 %v3680_v16, %s6288_s23  ;;  %4502 = vrot.lane.b32.xlu1 %v4458_v29, %s6287_s19  ;;  %v5049_v43 = vadd.f32 -1.0, %v4413_v22  ;;  %v4460_v6 = vsub.f32 %v4444_v23, %v8107_v4  ;;  %v3683_v2 = vadd.f32 %v3644_v0, %v3411_v27  ;;  %v8145_v4 = vld [vmem:[#allocation47_spill] sm:$0xff] }
 0xa6e   : > { %v3401_v40 = vadd.f32 1.837877, %v8145_v4 }
 0xa6f   : > { %v4445_v11 = vadd.f32 %v8110_v63, %v5049_v43 }
 0xa70   : > { %v3417_v41 = vmul.f32 -0.5, %v3401_v40 }
 0xa71   : > { %3727 = vrot.lane.b32.xlu0 %v3685_v17, %s6288_s23  ;;  %4504 = vrot.lane.b32.xlu1 %v4459_v38, %s6287_s19  ;;  %v4461_v36 = vsub.f32 %v4445_v11, %v8109_v45 }
 0xa72   : > { %v3650_v60 = vpop.permute.xlu1 %3649 }
 0xa73   : > { %v3686_v10 = vadd.f32 %v3650_v60, %v3414_v13 }
 0xa75   : > { %3723 = vrot.lane.b32.xlu0 %v3683_v2, %s6288_s23  ;;  %4506 = vrot.lane.b32.xlu1 %v4460_v6, %s6287_s19 }
 0xa76   : > { %v3646_v52 = vpop.permute.xlu1 %3645 }
 0xa77   : > { %v3684_v63 = vadd.f32 %v3646_v52, %v3412_v5 }
 0xa79   : > { %3729 = vrot.lane.b32.xlu0 %v3686_v10, %s6288_s23  ;;  %4508 = vrot.lane.b32.xlu1 %v4461_v36, %s6287_s19 }
 0xa7d   : > { %3725 = vrot.lane.b32.xlu0 %v3684_v63, %s6288_s23 }
 0xa98   : > { %v3656_v12 = vpop.permute.xlu0 %3655 }
 0xa99   : > { %v3689_v55 = vadd.f32 %v3656_v12, %v3417_v41 }
 0xa9b   : > { %v3652_v56 = vpop.permute.xlu1 %3651  ;;  %3735 = vrot.lane.b32.xlu0 %v3689_v55, %s6288_s23 }
 0xa9c   : > { %v3687_v45 = vadd.f32 %v3652_v56, %v3415_v8  ;;  %v4479_v19 = vpop.permute.xlu0 %4478 }
 0xa9d   : > { %4101 = vadd.xlane.f32.xlu1 %v7683_v57  ;;  %v4527_v13 = vsel %vm4526_vm6, %v4479_v19, 0.0 }
 0xa9f   : > { %3731 = vrot.lane.b32.xlu0 %v3687_v45, %s6288_s23 }
 0xaa7   : > { %v3658_v51 = vpop.permute.xlu1 %3657 }
 0xaa8   : > { %v3690_v24 = vadd.f32 %v3658_v51, %v3418_v32 }
 0xaab   : > { %v3654_v20 = vpop.permute.xlu1 %3653 }
 0xaac   : > { %v3688_v47 = vadd.f32 %v3654_v20, %v3416_v50 }
 0xaae   : > { %3733 = vrot.lane.b32.xlu0 %v3688_v47, %s6288_s23 }
 0xaaf   : > { %v4481_v25 = vpop.permute.xlu1 %4480 }
 0xab0   : > { %v4528_v6 = vsel %vm4526_vm6, %v4481_v25, 0.0 }
 0xab1   : > { %v4529_v28 = vadd.f32 %v4528_v6, %v4527_v13 }
 0xab2   : > { %3737 = vrot.lane.b32.xlu0 %v3690_v24, %s6288_s23 }
 0xab3   : > { %v4483_v57 = vpop.permute.xlu1 %4482 }
 0xab4   : > { %v4530_v60 = vsel %vm4526_vm6, %v4483_v57, 0.0 }
 0xab5   : > { %v4531_v52 = vadd.f32 %v4530_v60, %v4529_v28 }
 0xab7   : > { %v4485_v3 = vpop.permute.xlu1 %4484 }
 0xab8   : > { %v4532_v5 = vsel %vm4526_vm6, %v4485_v3, 0.0 }
 0xab9   : > { %v4533_v41 = vadd.f32 %v4532_v5, %v4531_v52 }
 0xabb   : > { %v4487_v42 = vpop.permute.xlu1 %4486 }
 0xabc   : > { %v4534_v63 = vsel %vm4526_vm6, %v4487_v42, 0.0 }
 0xabd   : > { %v4535_v8 = vadd.f32 %v4534_v63, %v4533_v41 }
 0xabf   : > { %v4489_v7 = vpop.permute.xlu1 %4488 }
 0xac0   : > { %v4536_v12 = vsel %vm4526_vm6, %v4489_v7, 0.0 }
 0xac1   : > { %v3712_v31 = vpop.permute.xlu0 %3711  ;;  %v4537_v46 = vadd.f32 %v4536_v12, %v4535_v8  ;;  %v8149_v8 = vld [vmem:[#allocation40_spill] sm:$0xff] }
 0xac2   : > { %v3759_v54 = vsel %vm3755_vm5, %v3712_v31, 0.0  ;;  %vm4569_vm7 = vcmp.eq.s32.totalorder %v8149_v8, 2  ;;  %vm4568_vm8 = vcmp.eq.s32.totalorder %v8149_v8, 1 }
 0xac3   : > { %v4491_v21 = vpop.permute.xlu1 %4490 }
 0xac4   : > { %v4538_v30 = vsel %vm4526_vm6, %v4491_v21, 0.0 }
 0xac5   : > { %v4539_v49 = vadd.f32 %v4538_v30, %v4537_v46 }
 0xac7   : > { %v4493_v9 = vpop.permute.xlu1 %4492 }
 0xac8   : > { %v4540_v34 = vsel %vm4526_vm6, %v4493_v9, 0.0 }
 0xac9   : > { %v4541_v32 = vadd.f32 %v4540_v34, %v4539_v49 }
 0xacb   : > { %v3708_v26 = vpop.permute.xlu0 %3707  ;;  %v4495_v14 = vpop.permute.xlu1 %4494 }
 0xacc   : > { %v3756_v29 = vsel %vm3755_vm5, %v3708_v26, 0.0  ;;  %v4542_v20 = vsel %vm4526_vm6, %v4495_v14, 0.0 }
 0xacd   : > { %v4543_v57 = vadd.f32 %v4542_v20, %v4541_v32 }
 0xacf   : > { %v3714_v18 = vpop.permute.xlu0 %3713  ;;  %v3710_v58 = vpop.permute.xlu1 %3709 }
 0xad0   : > { %v3757_v16 = vsel %vm3755_vm5, %v3710_v58, 0.0  ;;  %v3761_v43 = vsel %vm3755_vm5, %v3714_v18, 0.0 }
 0xad1   : > { %v3758_v22 = vadd.f32 %v3757_v16, %v3756_v29 }
 0xad3   : > { %v3720_v59 = vpop.permute.xlu0 %3719  ;;  %v4497_v61 = vpop.permute.xlu1 %4496  ;;  %v3760_v33 = vadd.f32 %v3759_v54, %v3758_v22 }
 0xad4   : > { %v3767_v15 = vsel %vm3755_vm5, %v3720_v59, 0.0  ;;  %v4544_v19 = vsel %vm4526_vm6, %v4497_v61, 0.0 }
 0xad5   : > { %v3762_v17 = vadd.f32 %v3761_v43, %v3760_v33  ;;  %v4545_v42 = vadd.f32 %v4544_v19, %v4543_v57 }
 0xad7   : > { %v3716_v53 = vpop.permute.xlu0 %3715  ;;  %v4499_v0 = vpop.permute.xlu1 %4498 }
 0xad8   : > { %v3763_v38 = vsel %vm3755_vm5, %v3716_v53, 0.0  ;;  %v4546_v31 = vsel %vm4526_vm6, %v4499_v0, 0.0 }
 0xad9   : > { %v3764_v35 = vadd.f32 %v3763_v38, %v3762_v17  ;;  %v4547_v21 = vadd.f32 %v4546_v31, %v4545_v42 }
 0xadb   : > { %v3722_v37 = vpop.permute.xlu0 %3721  ;;  %v4501_v2 = vpop.permute.xlu1 %4500 }
 0xadc   : > { %v3769_v4 = vsel %vm3755_vm5, %v3722_v37, 0.0  ;;  %v4548_v59 = vsel %vm4526_vm6, %v4501_v2, 0.0 }
 0xadf   : > { %v3718_v1 = vpop.permute.xlu0 %3717  ;;  %v4503_v48 = vpop.permute.xlu1 %4502 }
 0xae0   : > { %v3765_v27 = vsel %vm3755_vm5, %v3718_v1, 0.0  ;;  %v4550_v37 = vsel %vm4526_vm6, %v4503_v48, 0.0  ;;  %v4549_v1 = vadd.f32 %v4548_v59, %v4547_v21 }
 0xae1   : > { %v3766_v11 = vadd.f32 %v3765_v27, %v3764_v35 }
 0xae2   : > { %v4551_v16 = vadd.f32 %v4550_v37, %v4549_v1 }
 0xae3   : > { %v3728_v62 = vpop.permute.xlu0 %3727  ;;  %v3768_v36 = vadd.f32 %v3767_v15, %v3766_v11  ;;  %v4505_v50 = vpop.permute.xlu1 %4504 }
 0xae4   : > { %v3775_v47 = vsel %vm3755_vm5, %v3728_v62, 0.0  ;;  %v4552_v29 = vsel %vm4526_vm6, %v4505_v50, 0.0 }
 0xae5   : > { %v3770_v39 = vadd.f32 %v3769_v4, %v3768_v36  ;;  %v4553_v43 = vadd.f32 %v4552_v29, %v4551_v16 }
 0xae7   : > { %v3724_v23 = vpop.permute.xlu0 %3723  ;;  %v4507_v18 = vpop.permute.xlu1 %4506 }
 0xae8   : > { %v3771_v40 = vsel %vm3755_vm5, %v3724_v23, 0.0  ;;  %v4554_v33 = vsel %vm4526_vm6, %v4507_v18, 0.0 }
 0xae9   : > { %v3772_v56 = vadd.f32 %v3771_v40, %v3770_v39  ;;  %v4555_v0 = vadd.f32 %v4554_v33, %v4553_v43 }
 0xaeb   : > { %v3730_v44 = vpop.permute.xlu0 %3729  ;;  %v4509_v22 = vpop.permute.xlu1 %4508 }
 0xaec   : > { %v3777_v3 = vsel %vm3755_vm5, %v3730_v44, 0.0  ;;  %v4556_v17 = vsel %vm4526_vm6, %v4509_v22, 0.0 }
 0xaed   : > { %v4557_v27 = vadd.f32 %v4556_v17, %v4555_v0 }
 0xaef   : > { %v3726_v10 = vpop.permute.xlu0 %3725 }
 0xaf0   : > { %v3773_v55 = vsel %vm3755_vm5, %v3726_v10, 0.0 }
 0xaf1   : > { %v3774_v51 = vadd.f32 %v3773_v55, %v3772_v56 }
 0xaf3   : > { %v3776_v24 = vadd.f32 %v3775_v47, %v3774_v51 }
 0xaf5   : > { %v3778_v7 = vadd.f32 %v3777_v3, %v3776_v24 }
 0xb0d   : > { %v3736_v45 = vpop.permute.xlu0 %3735 }
 0xb0e   : > { %v3783_v62 = vsel %vm3755_vm5, %v3736_v45, 0.0 }
 0xb11   : > { %v3732_v25 = vpop.permute.xlu0 %3731 }
 0xb12   : > { %v3779_v26 = vsel %vm3755_vm5, %v3732_v25, 0.0 }
 0xb13   : > { %v3780_v53 = vadd.f32 %v3779_v26, %v3778_v7 }
 0xb20   : > { %v3734_v9 = vpop.permute.xlu0 %3733 }
 0xb21   : > { %v3781_v14 = vsel %vm3755_vm5, %v3734_v9, 0.0 }
 0xb22   : > { %v3782_v58 = vadd.f32 %v3781_v14, %v3780_v53 }
 0xb24   : > { %v3738_v61 = vpop.permute.xlu0 %3737  ;;  %v3784_v54 = vadd.f32 %v3783_v62, %v3782_v58 }
 0xb25   : > { %v3785_v23 = vsel %vm3755_vm5, %v3738_v61, 0.0 }
 0xb26   : > { %v3786_v38 = vadd.f32 %v3785_v23, %v3784_v54  ;;  %v4102_v35 = vpop.xlane.xlu1 %4101 }
 0xb27   : > { %v4103_v44 = vrot.slane %v4102_v35, 4 }
 0xb28   : > { %3787 = vadd.xlane.f32.xlu0 %v3786_v38 }
 0xb29   : > { %v4104_v11 = vadd.f32 %v4103_v44, %v4102_v35 }
 0xb2b   : > { %v4105_v6 = vrot.slane %v4104_v11, 2 }
 0xb2c   : > { %4558 = vadd.xlane.f32.xlu0 %v4557_v27 }
 0xb2d   : > { %v4106_v15 = vadd.f32 %v4105_v6, %v4104_v11 }
 0xb2f   : > { %v4107_v63 = vrot.slane %v4106_v15, 1 }
 0xb31   : > { %v4108_v39 = vadd.f32 %v4107_v63, %v4106_v15 }
 0xbb1   : > { %v3788_v2 = vpop.xlane.xlu0 %3787 }
 0xbb2   : > { %v3789_v13 = vrot.slane %v3788_v2, 4 }
 0xbb4   : > { %v3790_v60 = vadd.f32 %v3789_v13, %v3788_v2 }
 0xbb5   : > { %v4559_v28 = vpop.xlane.xlu0 %4558 }
 0xbb6   : > { %v3791_v36 = vrot.slane %v3790_v60, 2  ;;  %v4560_v10 = vrot.slane %v4559_v28, 4 }
 0xbb8   : > { %v4561_v5 = vadd.f32 %v4560_v10, %v4559_v28  ;;  %v3792_v52 = vadd.f32 %v3791_v36, %v3790_v60 }
 0xbba   : > { %v4562_v4 = vrot.slane %v4561_v5, 2  ;;  %v3793_v40 = vrot.slane %v3792_v52, 1 }
 0xbbc   : > { %v4563_v41 = vadd.f32 %v4562_v4, %v4561_v5  ;;  %v3794_v48 = vadd.f32 %v3793_v40, %v3792_v52 }
 0xbbe   : > { %5788 = vpush %v3794_v48  ;;  %v4564_v12 = vrot.slane %v4563_v41, 1 }
 0xbbf   : > { %5790 = vpush %v4108_v39 }
 0xbc0   : > { %v4565_v55 = vadd.f32 %v4564_v12, %v4563_v41 }
 0xbc2   : > { %5792 = vpush %v4565_v55 }
 0xbef   : > { %s5789_s24 = spop %5788 }
 0xbf0   : > { %s5791_s19 = spop %5790  ;;  %v4574_v46 = vstv %s5789_s24 }
 0xbf1   : > { %v4572_v45 = vstv %s5791_s19 }
 0xbf3   : > { %s5793_s28 = spop %5792 }
 0xbf4   : > { %s4567_s30 = smul.f32 0.5, %s5793_s28 }
 0xbf6   : > { %v4570_v56 = vstv %s4567_s30 }
 0xbf7   : > { %v4571_v30 = vsel %vm4569_vm7, %v4570_v56, 0.0 }
 0xbf8   : > { %v4573_v51 = vsel %vm4568_vm8, %v4572_v45, %v4571_v30 }
 0xbf9   : > { %v4575_v34 = vsel %vm3241_vm1, %v4574_v46, %v4573_v51 }
 0xbfa   : > { %4576 = vst [vmem:[%s184_s6] sm:$0xff] %v4575_v34 }
 0xbfb PF: > { %s14_s12 = sadd.s32 1, %s6285_s12  }
 0xbfc   : > { %p11_p5 = scmp.ge.s32.totalorder %s14_s12, 4  }
 0xbfe   :  { %13 = sbr.rel (!%p11_p5) target bundleno = 1 (0x1), region = 84 }

</bundles_post_ra>
